<compile_context>
chip_gen: v5e
topology: v5e:2x2
jax: 0.10.0
libtpu: 0.0.40
codegen_flags: <defaults>
</compile_context>

<pallas_src>
import jax
import jax.numpy as jnp
import numpy as np
from jax import lax
from jax.experimental import pallas as pl
from jax.experimental.pallas import tpu as pltpu

N_FILTERS = 16
N_CLASSES = 10
IN_CH = 3
KSIZE = 5
PAD = 2
H = W = 32            # implied by fc in_features = 16 * 16 * 16
PH = PW = 16          # pooled spatial
P = PH * PW           # 256 pooled positions per image
KTAPS = IN_CH * KSIZE * KSIZE  # 75


def _round_up(x, m):
    return (x + m - 1) // m * m


def _convnet2_kernel(p_ref, cw_ref, cb_ref, fw_ref, fb_ref, o_ref, pooled_ref):
    # p_ref     : (4, 75, B*256) bf16   im2col patches, lane index = b*256 + p
    # cw_ref    : (16, 75)       bf16   conv weight (flattened C,kh,kw)
    # cb_ref    : (16, 1)        f32    conv bias
    # fw_ref    : (16, 10, 256)  f32    fc weight, fw[c, cls, p] (lane-dense)
    # fb_ref    : (1, 10)        f32    fc bias
    # o_ref     : (B, 10)        f32    logits for this batch tile
    # pooled_ref: (B, 16, 256)   f32    VMEM scratch (image-major pooled acts)
    bt = o_ref.shape[0]

    cw = cw_ref[...]            # hoisted loads (no per-iteration re-load/broadcast)
    cb = cb_ref[...]

    # Conv + bias + ReLU per 2x2 pooling sub-position, elementwise max = maxpool.
    pooled = None
    for j in range(4):
        conv = jnp.dot(cw, p_ref[j], preferred_element_type=jnp.float32)  # (16, B*256)
        conv = jnp.maximum(conv + cb, 0.0)
        pooled = conv if j == 0 else jnp.maximum(pooled, conv)

    # Re-tile channel-major (16, B*256) -> image-major scratch (B, 16, 256).
    # Each store is a lane-aligned (multiple of 128) slice written to a
    # contiguous (16, 256) block -- no relayout on either side.
    for b in range(bt):
        pooled_ref[b] = pooled[:, b * P:(b + 1) * P]

    # FC: out[b, cls] = sum_{c,p} pooled[b, c, p] * fw[c, cls, p] + fb[cls]
    # 16 lane-dense (B,256) @ (10,256)^T dots per *tile* (M = B, not 1).
    acc = jnp.zeros((bt, N_CLASSES), jnp.float32)
    for c in range(N_FILTERS):
        x_c = pooled_ref[:, c, :]                      # (B, 256) strided load
        acc = acc + lax.dot_general(
            x_c, fw_ref[c],
            dimension_numbers=(((1,), (1,)), ((), ())),
            preferred_element_type=jnp.float32)
    o_ref[...] = (acc + fb_ref[...]).astype(o_ref.dtype)


def _im2col_pooled(x):
    """x: (N, 3, 32, 32) NCHW -> (4, 75, N*256), lane order = image-major then pooled pos."""
    n = x.shape[0]
    xp = jnp.pad(x, ((0, 0), (0, 0), (PAD, PAD), (PAD, PAD)))  # (N, 3, 36, 36)
    subpos = []
    for dy in range(2):
        for dx in range(2):
            taps = []
            for kh in range(KSIZE):
                for kw in range(KSIZE):
                    sl = lax.slice(
                        xp,
                        (0, 0, dy + kh, dx + kw),
                        (n, IN_CH, dy + kh + 2 * PH - 1, dx + kw + 2 * PW - 1),
                        (1, 1, 2, 2),
                    )                                           # (N, 3, 16, 16)
                    taps.append(sl.reshape(n, IN_CH, P))
            t = jnp.stack(taps, axis=2).reshape(n, KTAPS, P)    # k = c*25 + kh*5 + kw
            subpos.append(t)
    pat = jnp.stack(subpos, axis=0)                             # (4, N, 75, 256)
    pat = pat.transpose(0, 2, 1, 3).reshape(4, KTAPS, n * P)    # lane = b*256 + p
    return pat


def convnet2_forward(x, conv_w, conv_b, fc_w, fc_b, *, batch_tile=64):
    """x: (N, 3, 32, 32) float32 NCHW; params in torch shapes."""
    n = x.shape[0]
    bt = min(_round_up(batch_tile, 8), _round_up(n, 8))   # batch tile (multiple of 8)
    n_pad = _round_up(n, bt)
    if n_pad != n:
        x = jnp.pad(x, ((0, n_pad - n), (0, 0), (0, 0), (0, 0)))

    patches = _im2col_pooled(x).astype(jnp.bfloat16)            # (4, 75, n_pad*256)
    cw = conv_w.reshape(N_FILTERS, KTAPS).astype(jnp.bfloat16)  # (16, 75)
    cb = conv_b.reshape(N_FILTERS, 1).astype(jnp.float32)       # (16, 1)
    # torch flatten order of pooled acts is (C, H, W): column index = c*256 + p.
    # Lane-dense fc weight: fw[c, cls, p] = fc_w[cls, c*256 + p]  -> (16, 10, 256)
    fw = fc_w.reshape(N_CLASSES, N_FILTERS, P).transpose(1, 0, 2).astype(jnp.float32)
    fb = fc_b.reshape(1, N_CLASSES).astype(jnp.float32)         # (1, 10)

    out = pl.pallas_call(
        _convnet2_kernel,
        out_shape=jax.ShapeDtypeStruct((n_pad, N_CLASSES), jnp.float32),
        grid=(n_pad // bt,),
        in_specs=[
            pl.BlockSpec((4, KTAPS, bt * P), lambda i: (0, 0, i)),
            pl.BlockSpec((N_FILTERS, KTAPS), lambda i: (0, 0)),
            pl.BlockSpec((N_FILTERS, 1), lambda i: (0, 0)),
            pl.BlockSpec((N_FILTERS, N_CLASSES, P), lambda i: (0, 0, 0)),
            pl.BlockSpec((1, N_CLASSES), lambda i: (0, 0)),
        ],
        out_specs=pl.BlockSpec((bt, N_CLASSES), lambda i: (i, 0)),
        scratch_shapes=[pltpu.VMEM((bt, N_FILTERS, P), jnp.float32)],
        compiler_params=pltpu.CompilerParams(
            dimension_semantics=("parallel",),       # shards batch tiles across TCs (v7x)
            vmem_limit_bytes=48 * 1024 * 1024,       # fits v7x 64 MiB/TC; above v5e default
        ),
    )(patches, cw, cb, fw, fb)
    return out[:n]


def reference(x, conv_w, conv_b, fc_w, fc_b):
    """Pure-JAX reference with PyTorch semantics (NCHW, f32)."""
    y = lax.conv_general_dilated(
        x, conv_w, window_strides=(1, 1), padding=((PAD, PAD), (PAD, PAD)),
        dimension_numbers=("NCHW", "OIHW", "NCHW"))
    y = jnp.maximum(y + conv_b[None, :, None, None], 0.0)               # (N,16,32,32)
    y = y.reshape(x.shape[0], N_FILTERS, PH, 2, PW, 2).max(axis=(3, 5))  # maxpool 2x2
    y = y.reshape(x.shape[0], -1)                                        # (N, 4096) (C,H,W)
    return y @ fc_w.T + fc_b


if __name__ == "__main__":
    key = jax.random.PRNGKey(0)
    k1, k2, k3, k4, k5 = jax.random.split(key, 5)
    x = jax.random.normal(k1, (2, IN_CH, H, W), dtype=jnp.float32)
    conv_w = 0.1 * jax.random.normal(k2, (N_FILTERS, IN_CH, KSIZE, KSIZE), dtype=jnp.float32)
    conv_b = 0.1 * jax.random.normal(k3, (N_FILTERS,), dtype=jnp.float32)
    fc_w = 0.02 * jax.random.normal(k4, (N_CLASSES, N_FILTERS * PH * PW), dtype=jnp.float32)
    fc_b = 0.1 * jax.random.normal(k5, (N_CLASSES,), dtype=jnp.float32)

    out = jax.block_until_ready(convnet2_forward(x, conv_w, conv_b, fc_w, fc_b))
    ref = reference(x, conv_w, conv_b, fc_w, fc_b)
    # bf16 patches/conv-weight (f32 accumulation) -> loosened tolerance.
    np.testing.assert_allclose(np.asarray(out), np.asarray(ref), rtol=3e-2, atol=3e-2)
    print("KERNEL_OK")
</pallas_src>

<mosaic_0001>
module attributes {stable_mosaic.version = 11 : i64} {
  func.func @_convnet2_kernel(%arg0: i32, %arg1: memref<4x75x2048xbf16, #tpu.memory_space<vmem>>, %arg2: memref<16x75xbf16, #tpu.memory_space<vmem>>, %arg3: memref<16x1xf32, #tpu.memory_space<vmem>>, %arg4: memref<16x10x256xf32, #tpu.memory_space<vmem>>, %arg5: memref<1x10xf32, #tpu.memory_space<vmem>>, %arg6: memref<8x10xf32, #tpu.memory_space<vmem>>, %arg7: memref<8x16x256xf32, #tpu.memory_space<vmem>>) attributes {dimension_semantics = [#tpu.dimension_semantics<parallel>], iteration_bounds = array<i64: 1>, scalar_prefetch = 0 : i64, scratch_operands = 1 : i64, tpu.core_type = #tpu.core_type<tc>, window_params = [{transform_indices = @transform_0, window_bounds = array<i64: 4, 75, 2048>}, {pipeline_mode = #tpu.pipeline_mode<synchronous>, transform_indices = @transform_1, window_bounds = array<i64: 16, 75>}, {pipeline_mode = #tpu.pipeline_mode<synchronous>, transform_indices = @transform_2, window_bounds = array<i64: 16, 1>}, {pipeline_mode = #tpu.pipeline_mode<synchronous>, transform_indices = @transform_3, window_bounds = array<i64: 16, 10, 256>}, {pipeline_mode = #tpu.pipeline_mode<synchronous>, transform_indices = @transform_4, window_bounds = array<i64: 1, 10>}, {transform_indices = @transform_5, window_bounds = array<i64: 8, 10>}]} {
    %c0 = arith.constant 0 : index
    %c0_0 = arith.constant 0 : index
    %0 = vector.load %arg2[%c0, %c0_0] : memref<16x75xbf16, #tpu.memory_space<vmem>>, vector<16x75xbf16>
    %c0_1 = arith.constant 0 : index
    %c0_2 = arith.constant 0 : index
    %1 = vector.load %arg3[%c0_1, %c0_2] : memref<16x1xf32, #tpu.memory_space<vmem>>, vector<16x1xf32>
    %c0_3 = arith.constant 0 : index
    %c0_4 = arith.constant 0 : index
    %c0_5 = arith.constant 0 : index
    %2 = vector.load %arg1[%c0_3, %c0_4, %c0_5] : memref<4x75x2048xbf16, #tpu.memory_space<vmem>>, vector<1x75x2048xbf16>
    %3 = vector.shape_cast %2 : vector<1x75x2048xbf16> to vector<75x2048xbf16>
    %cst = arith.constant dense<0.000000e+00> : vector<16x2048xf32>
    %4 = tpu.matmul %0, %3, %cst {dimension_numbers = #tpu.dot_dimension_numbers<[1], [0], [0], [1], [0, 0, 1, 1], [], []>} : vector<16x75xbf16>, vector<75x2048xbf16>, vector<16x2048xf32> -> vector<16x2048xf32>
    %5 = vector.broadcast %1 : vector<16x1xf32> to vector<16x2048xf32>
    %6 = arith.addf %4, %5 : vector<16x2048xf32>
    %cst_6 = arith.constant 0.000000e+00 : f32
    %7 = vector.broadcast %cst_6 : f32 to vector<16x2048xf32>
    %8 = arith.maximumf %6, %7 : vector<16x2048xf32>
    %c1 = arith.constant 1 : index
    %c0_7 = arith.constant 0 : index
    %c0_8 = arith.constant 0 : index
    %9 = vector.load %arg1[%c1, %c0_7, %c0_8] : memref<4x75x2048xbf16, #tpu.memory_space<vmem>>, vector<1x75x2048xbf16>
    %10 = vector.shape_cast %9 : vector<1x75x2048xbf16> to vector<75x2048xbf16>
    %cst_9 = arith.constant dense<0.000000e+00> : vector<16x2048xf32>
    %11 = tpu.matmul %0, %10, %cst_9 {dimension_numbers = #tpu.dot_dimension_numbers<[1], [0], [0], [1], [0, 0, 1, 1], [], []>} : vector<16x75xbf16>, vector<75x2048xbf16>, vector<16x2048xf32> -> vector<16x2048xf32>
    %12 = vector.broadcast %1 : vector<16x1xf32> to vector<16x2048xf32>
    %13 = arith.addf %11, %12 : vector<16x2048xf32>
    %cst_10 = arith.constant 0.000000e+00 : f32
    %14 = vector.broadcast %cst_10 : f32 to vector<16x2048xf32>
    %15 = arith.maximumf %13, %14 : vector<16x2048xf32>
    %16 = arith.maximumf %8, %15 : vector<16x2048xf32>
    %c2 = arith.constant 2 : index
    %c0_11 = arith.constant 0 : index
    %c0_12 = arith.constant 0 : index
    %17 = vector.load %arg1[%c2, %c0_11, %c0_12] : memref<4x75x2048xbf16, #tpu.memory_space<vmem>>, vector<1x75x2048xbf16>
    %18 = vector.shape_cast %17 : vector<1x75x2048xbf16> to vector<75x2048xbf16>
    %cst_13 = arith.constant dense<0.000000e+00> : vector<16x2048xf32>
    %19 = tpu.matmul %0, %18, %cst_13 {dimension_numbers = #tpu.dot_dimension_numbers<[1], [0], [0], [1], [0, 0, 1, 1], [], []>} : vector<16x75xbf16>, vector<75x2048xbf16>, vector<16x2048xf32> -> vector<16x2048xf32>
    %20 = vector.broadcast %1 : vector<16x1xf32> to vector<16x2048xf32>
    %21 = arith.addf %19, %20 : vector<16x2048xf32>
    %cst_14 = arith.constant 0.000000e+00 : f32
    %22 = vector.broadcast %cst_14 : f32 to vector<16x2048xf32>
    %23 = arith.maximumf %21, %22 : vector<16x2048xf32>
    %24 = arith.maximumf %16, %23 : vector<16x2048xf32>
    %c3 = arith.constant 3 : index
    %c0_15 = arith.constant 0 : index
    %c0_16 = arith.constant 0 : index
    %25 = vector.load %arg1[%c3, %c0_15, %c0_16] : memref<4x75x2048xbf16, #tpu.memory_space<vmem>>, vector<1x75x2048xbf16>
    %26 = vector.shape_cast %25 : vector<1x75x2048xbf16> to vector<75x2048xbf16>
    %cst_17 = arith.constant dense<0.000000e+00> : vector<16x2048xf32>
    %27 = tpu.matmul %0, %26, %cst_17 {dimension_numbers = #tpu.dot_dimension_numbers<[1], [0], [0], [1], [0, 0, 1, 1], [], []>} : vector<16x75xbf16>, vector<75x2048xbf16>, vector<16x2048xf32> -> vector<16x2048xf32>
    %28 = vector.broadcast %1 : vector<16x1xf32> to vector<16x2048xf32>
    %29 = arith.addf %27, %28 : vector<16x2048xf32>
    %cst_18 = arith.constant 0.000000e+00 : f32
    %30 = vector.broadcast %cst_18 : f32 to vector<16x2048xf32>
    %31 = arith.maximumf %29, %30 : vector<16x2048xf32>
    %32 = arith.maximumf %24, %31 : vector<16x2048xf32>
    %33 = vector.extract_strided_slice %32 {offsets = [0, 0], sizes = [16, 256], strides = [1, 1]} : vector<16x2048xf32> to vector<16x256xf32>
    %c0_19 = arith.constant 0 : index
    %c0_20 = arith.constant 0 : index
    %c0_21 = arith.constant 0 : index
    %34 = vector.load %arg7[%c0_19, %c0_20, %c0_21] : memref<8x16x256xf32, #tpu.memory_space<vmem>>, vector<1x16x256xf32>
    %35 = vector.shape_cast %34 : vector<1x16x256xf32> to vector<16x256xf32>
    %36 = vector.shape_cast %33 : vector<16x256xf32> to vector<1x16x256xf32>
    tpu.vector_store %arg7[%c0_19, %c0_20, %c0_21], %36 {strides = array<i32>} : memref<8x16x256xf32, #tpu.memory_space<vmem>>, vector<1x16x256xf32>,
    %37 = vector.extract_strided_slice %32 {offsets = [0, 256], sizes = [16, 256], strides = [1, 1]} : vector<16x2048xf32> to vector<16x256xf32>
    %c1_22 = arith.constant 1 : index
    %c0_23 = arith.constant 0 : index
    %c0_24 = arith.constant 0 : index
    %38 = vector.load %arg7[%c1_22, %c0_23, %c0_24] : memref<8x16x256xf32, #tpu.memory_space<vmem>>, vector<1x16x256xf32>
    %39 = vector.shape_cast %38 : vector<1x16x256xf32> to vector<16x256xf32>
    %40 = vector.shape_cast %37 : vector<16x256xf32> to vector<1x16x256xf32>
    tpu.vector_store %arg7[%c1_22, %c0_23, %c0_24], %40 {strides = array<i32>} : memref<8x16x256xf32, #tpu.memory_space<vmem>>, vector<1x16x256xf32>,
    %41 = vector.extract_strided_slice %32 {offsets = [0, 512], sizes = [16, 256], strides = [1, 1]} : vector<16x2048xf32> to vector<16x256xf32>
    %c2_25 = arith.constant 2 : index
    %c0_26 = arith.constant 0 : index
    %c0_27 = arith.constant 0 : index
    %42 = vector.load %arg7[%c2_25, %c0_26, %c0_27] : memref<8x16x256xf32, #tpu.memory_space<vmem>>, vector<1x16x256xf32>
    %43 = vector.shape_cast %42 : vector<1x16x256xf32> to vector<16x256xf32>
    %44 = vector.shape_cast %41 : vector<16x256xf32> to vector<1x16x256xf32>
    tpu.vector_store %arg7[%c2_25, %c0_26, %c0_27], %44 {strides = array<i32>} : memref<8x16x256xf32, #tpu.memory_space<vmem>>, vector<1x16x256xf32>,
    %45 = vector.extract_strided_slice %32 {offsets = [0, 768], sizes = [16, 256], strides = [1, 1]} : vector<16x2048xf32> to vector<16x256xf32>
    %c3_28 = arith.constant 3 : index
    %c0_29 = arith.constant 0 : index
    %c0_30 = arith.constant 0 : index
    %46 = vector.load %arg7[%c3_28, %c0_29, %c0_30] : memref<8x16x256xf32, #tpu.memory_space<vmem>>, vector<1x16x256xf32>
    %47 = vector.shape_cast %46 : vector<1x16x256xf32> to vector<16x256xf32>
    %48 = vector.shape_cast %45 : vector<16x256xf32> to vector<1x16x256xf32>
    tpu.vector_store %arg7[%c3_28, %c0_29, %c0_30], %48 {strides = array<i32>} : memref<8x16x256xf32, #tpu.memory_space<vmem>>, vector<1x16x256xf32>,
    %49 = vector.extract_strided_slice %32 {offsets = [0, 1024], sizes = [16, 256], strides = [1, 1]} : vector<16x2048xf32> to vector<16x256xf32>
    %c4 = arith.constant 4 : index
    %c0_31 = arith.constant 0 : index
    %c0_32 = arith.constant 0 : index
    %50 = vector.load %arg7[%c4, %c0_31, %c0_32] : memref<8x16x256xf32, #tpu.memory_space<vmem>>, vector<1x16x256xf32>
    %51 = vector.shape_cast %50 : vector<1x16x256xf32> to vector<16x256xf32>
    %52 = vector.shape_cast %49 : vector<16x256xf32> to vector<1x16x256xf32>
    tpu.vector_store %arg7[%c4, %c0_31, %c0_32], %52 {strides = array<i32>} : memref<8x16x256xf32, #tpu.memory_space<vmem>>, vector<1x16x256xf32>,
    %53 = vector.extract_strided_slice %32 {offsets = [0, 1280], sizes = [16, 256], strides = [1, 1]} : vector<16x2048xf32> to vector<16x256xf32>
    %c5 = arith.constant 5 : index
    %c0_33 = arith.constant 0 : index
    %c0_34 = arith.constant 0 : index
    %54 = vector.load %arg7[%c5, %c0_33, %c0_34] : memref<8x16x256xf32, #tpu.memory_space<vmem>>, vector<1x16x256xf32>
    %55 = vector.shape_cast %54 : vector<1x16x256xf32> to vector<16x256xf32>
    %56 = vector.shape_cast %53 : vector<16x256xf32> to vector<1x16x256xf32>
    tpu.vector_store %arg7[%c5, %c0_33, %c0_34], %56 {strides = array<i32>} : memref<8x16x256xf32, #tpu.memory_space<vmem>>, vector<1x16x256xf32>,
    %57 = vector.extract_strided_slice %32 {offsets = [0, 1536], sizes = [16, 256], strides = [1, 1]} : vector<16x2048xf32> to vector<16x256xf32>
    %c6 = arith.constant 6 : index
    %c0_35 = arith.constant 0 : index
    %c0_36 = arith.constant 0 : index
    %58 = vector.load %arg7[%c6, %c0_35, %c0_36] : memref<8x16x256xf32, #tpu.memory_space<vmem>>, vector<1x16x256xf32>
    %59 = vector.shape_cast %58 : vector<1x16x256xf32> to vector<16x256xf32>
    %60 = vector.shape_cast %57 : vector<16x256xf32> to vector<1x16x256xf32>
    tpu.vector_store %arg7[%c6, %c0_35, %c0_36], %60 {strides = array<i32>} : memref<8x16x256xf32, #tpu.memory_space<vmem>>, vector<1x16x256xf32>,
    %61 = vector.extract_strided_slice %32 {offsets = [0, 1792], sizes = [16, 256], strides = [1, 1]} : vector<16x2048xf32> to vector<16x256xf32>
    %c7 = arith.constant 7 : index
    %c0_37 = arith.constant 0 : index
    %c0_38 = arith.constant 0 : index
    %62 = vector.load %arg7[%c7, %c0_37, %c0_38] : memref<8x16x256xf32, #tpu.memory_space<vmem>>, vector<1x16x256xf32>
    %63 = vector.shape_cast %62 : vector<1x16x256xf32> to vector<16x256xf32>
    %64 = vector.shape_cast %61 : vector<16x256xf32> to vector<1x16x256xf32>
    tpu.vector_store %arg7[%c7, %c0_37, %c0_38], %64 {strides = array<i32>} : memref<8x16x256xf32, #tpu.memory_space<vmem>>, vector<1x16x256xf32>,
    %cst_39 = arith.constant 0.000000e+00 : f32
    %65 = vector.broadcast %cst_39 : f32 to vector<8x10xf32>
    %c0_40 = arith.constant 0 : index
    %c0_41 = arith.constant 0 : index
    %c0_42 = arith.constant 0 : index
    %66 = vector.load %arg7[%c0_40, %c0_41, %c0_42] : memref<8x16x256xf32, #tpu.memory_space<vmem>>, vector<8x1x256xf32>
    %67 = vector.shape_cast %66 : vector<8x1x256xf32> to vector<8x256xf32>
    %c0_43 = arith.constant 0 : index
    %c0_44 = arith.constant 0 : index
    %c0_45 = arith.constant 0 : index
    %68 = vector.load %arg4[%c0_43, %c0_44, %c0_45] : memref<16x10x256xf32, #tpu.memory_space<vmem>>, vector<1x10x256xf32>
    %69 = vector.shape_cast %68 : vector<1x10x256xf32> to vector<10x256xf32>
    %cst_46 = arith.constant dense<0.000000e+00> : vector<8x10xf32>
    %70 = tpu.matmul %67, %69, %cst_46 {dimension_numbers = #tpu.dot_dimension_numbers<[1], [1], [0], [0], [0, 0, 1, 0], [], []>} : vector<8x256xf32>, vector<10x256xf32>, vector<8x10xf32> -> vector<8x10xf32>
    %71 = arith.addf %65, %70 : vector<8x10xf32>
    %c0_47 = arith.constant 0 : index
    %c1_48 = arith.constant 1 : index
    %c0_49 = arith.constant 0 : index
    %72 = vector.load %arg7[%c0_47, %c1_48, %c0_49] : memref<8x16x256xf32, #tpu.memory_space<vmem>>, vector<8x1x256xf32>
    %73 = vector.shape_cast %72 : vector<8x1x256xf32> to vector<8x256xf32>
    %c1_50 = arith.constant 1 : index
    %c0_51 = arith.constant 0 : index
    %c0_52 = arith.constant 0 : index
    %74 = vector.load %arg4[%c1_50, %c0_51, %c0_52] : memref<16x10x256xf32, #tpu.memory_space<vmem>>, vector<1x10x256xf32>
    %75 = vector.shape_cast %74 : vector<1x10x256xf32> to vector<10x256xf32>
    %cst_53 = arith.constant dense<0.000000e+00> : vector<8x10xf32>
    %76 = tpu.matmul %73, %75, %cst_53 {dimension_numbers = #tpu.dot_dimension_numbers<[1], [1], [0], [0], [0, 0, 1, 0], [], []>} : vector<8x256xf32>, vector<10x256xf32>, vector<8x10xf32> -> vector<8x10xf32>
    %77 = arith.addf %71, %76 : vector<8x10xf32>
    %c0_54 = arith.constant 0 : index
    %c2_55 = arith.constant 2 : index
    %c0_56 = arith.constant 0 : index
    %78 = vector.load %arg7[%c0_54, %c2_55, %c0_56] : memref<8x16x256xf32, #tpu.memory_space<vmem>>, vector<8x1x256xf32>
    %79 = vector.shape_cast %78 : vector<8x1x256xf32> to vector<8x256xf32>
    %c2_57 = arith.constant 2 : index
    %c0_58 = arith.constant 0 : index
    %c0_59 = arith.constant 0 : index
    %80 = vector.load %arg4[%c2_57, %c0_58, %c0_59] : memref<16x10x256xf32, #tpu.memory_space<vmem>>, vector<1x10x256xf32>
    %81 = vector.shape_cast %80 : vector<1x10x256xf32> to vector<10x256xf32>
    %cst_60 = arith.constant dense<0.000000e+00> : vector<8x10xf32>
    %82 = tpu.matmul %79, %81, %cst_60 {dimension_numbers = #tpu.dot_dimension_numbers<[1], [1], [0], [0], [0, 0, 1, 0], [], []>} : vector<8x256xf32>, vector<10x256xf32>, vector<8x10xf32> -> vector<8x10xf32>
    %83 = arith.addf %77, %82 : vector<8x10xf32>
    %c0_61 = arith.constant 0 : index
    %c3_62 = arith.constant 3 : index
    %c0_63 = arith.constant 0 : index
    %84 = vector.load %arg7[%c0_61, %c3_62, %c0_63] : memref<8x16x256xf32, #tpu.memory_space<vmem>>, vector<8x1x256xf32>
    %85 = vector.shape_cast %84 : vector<8x1x256xf32> to vector<8x256xf32>
    %c3_64 = arith.constant 3 : index
    %c0_65 = arith.constant 0 : index
    %c0_66 = arith.constant 0 : index
    %86 = vector.load %arg4[%c3_64, %c0_65, %c0_66] : memref<16x10x256xf32, #tpu.memory_space<vmem>>, vector<1x10x256xf32>
    %87 = vector.shape_cast %86 : vector<1x10x256xf32> to vector<10x256xf32>
    %cst_67 = arith.constant dense<0.000000e+00> : vector<8x10xf32>
    %88 = tpu.matmul %85, %87, %cst_67 {dimension_numbers = #tpu.dot_dimension_numbers<[1], [1], [0], [0], [0, 0, 1, 0], [], []>} : vector<8x256xf32>, vector<10x256xf32>, vector<8x10xf32> -> vector<8x10xf32>
    %89 = arith.addf %83, %88 : vector<8x10xf32>
    %c0_68 = arith.constant 0 : index
    %c4_69 = arith.constant 4 : index
    %c0_70 = arith.constant 0 : index
    %90 = vector.load %arg7[%c0_68, %c4_69, %c0_70] : memref<8x16x256xf32, #tpu.memory_space<vmem>>, vector<8x1x256xf32>
    %91 = vector.shape_cast %90 : vector<8x1x256xf32> to vector<8x256xf32>
    %c4_71 = arith.constant 4 : index
    %c0_72 = arith.constant 0 : index
    %c0_73 = arith.constant 0 : index
    %92 = vector.load %arg4[%c4_71, %c0_72, %c0_73] : memref<16x10x256xf32, #tpu.memory_space<vmem>>, vector<1x10x256xf32>
    %93 = vector.shape_cast %92 : vector<1x10x256xf32> to vector<10x256xf32>
    %cst_74 = arith.constant dense<0.000000e+00> : vector<8x10xf32>
    %94 = tpu.matmul %91, %93, %cst_74 {dimension_numbers = #tpu.dot_dimension_numbers<[1], [1], [0], [0], [0, 0, 1, 0], [], []>} : vector<8x256xf32>, vector<10x256xf32>, vector<8x10xf32> -> vector<8x10xf32>
    %95 = arith.addf %89, %94 : vector<8x10xf32>
    %c0_75 = arith.constant 0 : index
    %c5_76 = arith.constant 5 : index
    %c0_77 = arith.constant 0 : index
    %96 = vector.load %arg7[%c0_75, %c5_76, %c0_77] : memref<8x16x256xf32, #tpu.memory_space<vmem>>, vector<8x1x256xf32>
    %97 = vector.shape_cast %96 : vector<8x1x256xf32> to vector<8x256xf32>
    %c5_78 = arith.constant 5 : index
    %c0_79 = arith.constant 0 : index
    %c0_80 = arith.constant 0 : index
    %98 = vector.load %arg4[%c5_78, %c0_79, %c0_80] : memref<16x10x256xf32, #tpu.memory_space<vmem>>, vector<1x10x256xf32>
    %99 = vector.shape_cast %98 : vector<1x10x256xf32> to vector<10x256xf32>
    %cst_81 = arith.constant dense<0.000000e+00> : vector<8x10xf32>
    %100 = tpu.matmul %97, %99, %cst_81 {dimension_numbers = #tpu.dot_dimension_numbers<[1], [1], [0], [0], [0, 0, 1, 0], [], []>} : vector<8x256xf32>, vector<10x256xf32>, vector<8x10xf32> -> vector<8x10xf32>
    %101 = arith.addf %95, %100 : vector<8x10xf32>
    %c0_82 = arith.constant 0 : index
    %c6_83 = arith.constant 6 : index
    %c0_84 = arith.constant 0 : index
    %102 = vector.load %arg7[%c0_82, %c6_83, %c0_84] : memref<8x16x256xf32, #tpu.memory_space<vmem>>, vector<8x1x256xf32>
    %103 = vector.shape_cast %102 : vector<8x1x256xf32> to vector<8x256xf32>
    %c6_85 = arith.constant 6 : index
    %c0_86 = arith.constant 0 : index
    %c0_87 = arith.constant 0 : index
    %104 = vector.load %arg4[%c6_85, %c0_86, %c0_87] : memref<16x10x256xf32, #tpu.memory_space<vmem>>, vector<1x10x256xf32>
    %105 = vector.shape_cast %104 : vector<1x10x256xf32> to vector<10x256xf32>
    %cst_88 = arith.constant dense<0.000000e+00> : vector<8x10xf32>
    %106 = tpu.matmul %103, %105, %cst_88 {dimension_numbers = #tpu.dot_dimension_numbers<[1], [1], [0], [0], [0, 0, 1, 0], [], []>} : vector<8x256xf32>, vector<10x256xf32>, vector<8x10xf32> -> vector<8x10xf32>
    %107 = arith.addf %101, %106 : vector<8x10xf32>
    %c0_89 = arith.constant 0 : index
    %c7_90 = arith.constant 7 : index
    %c0_91 = arith.constant 0 : index
    %108 = vector.load %arg7[%c0_89, %c7_90, %c0_91] : memref<8x16x256xf32, #tpu.memory_space<vmem>>, vector<8x1x256xf32>
    %109 = vector.shape_cast %108 : vector<8x1x256xf32> to vector<8x256xf32>
    %c7_92 = arith.constant 7 : index
    %c0_93 = arith.constant 0 : index
    %c0_94 = arith.constant 0 : index
    %110 = vector.load %arg4[%c7_92, %c0_93, %c0_94] : memref<16x10x256xf32, #tpu.memory_space<vmem>>, vector<1x10x256xf32>
    %111 = vector.shape_cast %110 : vector<1x10x256xf32> to vector<10x256xf32>
    %cst_95 = arith.constant dense<0.000000e+00> : vector<8x10xf32>
    %112 = tpu.matmul %109, %111, %cst_95 {dimension_numbers = #tpu.dot_dimension_numbers<[1], [1], [0], [0], [0, 0, 1, 0], [], []>} : vector<8x256xf32>, vector<10x256xf32>, vector<8x10xf32> -> vector<8x10xf32>
    %113 = arith.addf %107, %112 : vector<8x10xf32>
    %c0_96 = arith.constant 0 : index
    %c8 = arith.constant 8 : index
    %c0_97 = arith.constant 0 : index
    %114 = vector.load %arg7[%c0_96, %c8, %c0_97] : memref<8x16x256xf32, #tpu.memory_space<vmem>>, vector<8x1x256xf32>
    %115 = vector.shape_cast %114 : vector<8x1x256xf32> to vector<8x256xf32>
    %c8_98 = arith.constant 8 : index
    %c0_99 = arith.constant 0 : index
    %c0_100 = arith.constant 0 : index
    %116 = vector.load %arg4[%c8_98, %c0_99, %c0_100] : memref<16x10x256xf32, #tpu.memory_space<vmem>>, vector<1x10x256xf32>
    %117 = vector.shape_cast %116 : vector<1x10x256xf32> to vector<10x256xf32>
    %cst_101 = arith.constant dense<0.000000e+00> : vector<8x10xf32>
    %118 = tpu.matmul %115, %117, %cst_101 {dimension_numbers = #tpu.dot_dimension_numbers<[1], [1], [0], [0], [0, 0, 1, 0], [], []>} : vector<8x256xf32>, vector<10x256xf32>, vector<8x10xf32> -> vector<8x10xf32>
    %119 = arith.addf %113, %118 : vector<8x10xf32>
    %c0_102 = arith.constant 0 : index
    %c9 = arith.constant 9 : index
    %c0_103 = arith.constant 0 : index
    %120 = vector.load %arg7[%c0_102, %c9, %c0_103] : memref<8x16x256xf32, #tpu.memory_space<vmem>>, vector<8x1x256xf32>
    %121 = vector.shape_cast %120 : vector<8x1x256xf32> to vector<8x256xf32>
    %c9_104 = arith.constant 9 : index
    %c0_105 = arith.constant 0 : index
    %c0_106 = arith.constant 0 : index
    %122 = vector.load %arg4[%c9_104, %c0_105, %c0_106] : memref<16x10x256xf32, #tpu.memory_space<vmem>>, vector<1x10x256xf32>
    %123 = vector.shape_cast %122 : vector<1x10x256xf32> to vector<10x256xf32>
    %cst_107 = arith.constant dense<0.000000e+00> : vector<8x10xf32>
    %124 = tpu.matmul %121, %123, %cst_107 {dimension_numbers = #tpu.dot_dimension_numbers<[1], [1], [0], [0], [0, 0, 1, 0], [], []>} : vector<8x256xf32>, vector<10x256xf32>, vector<8x10xf32> -> vector<8x10xf32>
    %125 = arith.addf %119, %124 : vector<8x10xf32>
    %c0_108 = arith.constant 0 : index
    %c10 = arith.constant 10 : index
    %c0_109 = arith.constant 0 : index
    %126 = vector.load %arg7[%c0_108, %c10, %c0_109] : memref<8x16x256xf32, #tpu.memory_space<vmem>>, vector<8x1x256xf32>
    %127 = vector.shape_cast %126 : vector<8x1x256xf32> to vector<8x256xf32>
    %c10_110 = arith.constant 10 : index
    %c0_111 = arith.constant 0 : index
    %c0_112 = arith.constant 0 : index
    %128 = vector.load %arg4[%c10_110, %c0_111, %c0_112] : memref<16x10x256xf32, #tpu.memory_space<vmem>>, vector<1x10x256xf32>
    %129 = vector.shape_cast %128 : vector<1x10x256xf32> to vector<10x256xf32>
    %cst_113 = arith.constant dense<0.000000e+00> : vector<8x10xf32>
    %130 = tpu.matmul %127, %129, %cst_113 {dimension_numbers = #tpu.dot_dimension_numbers<[1], [1], [0], [0], [0, 0, 1, 0], [], []>} : vector<8x256xf32>, vector<10x256xf32>, vector<8x10xf32> -> vector<8x10xf32>
    %131 = arith.addf %125, %130 : vector<8x10xf32>
    %c0_114 = arith.constant 0 : index
    %c11 = arith.constant 11 : index
    %c0_115 = arith.constant 0 : index
    %132 = vector.load %arg7[%c0_114, %c11, %c0_115] : memref<8x16x256xf32, #tpu.memory_space<vmem>>, vector<8x1x256xf32>
    %133 = vector.shape_cast %132 : vector<8x1x256xf32> to vector<8x256xf32>
    %c11_116 = arith.constant 11 : index
    %c0_117 = arith.constant 0 : index
    %c0_118 = arith.constant 0 : index
    %134 = vector.load %arg4[%c11_116, %c0_117, %c0_118] : memref<16x10x256xf32, #tpu.memory_space<vmem>>, vector<1x10x256xf32>
    %135 = vector.shape_cast %134 : vector<1x10x256xf32> to vector<10x256xf32>
    %cst_119 = arith.constant dense<0.000000e+00> : vector<8x10xf32>
    %136 = tpu.matmul %133, %135, %cst_119 {dimension_numbers = #tpu.dot_dimension_numbers<[1], [1], [0], [0], [0, 0, 1, 0], [], []>} : vector<8x256xf32>, vector<10x256xf32>, vector<8x10xf32> -> vector<8x10xf32>
    %137 = arith.addf %131, %136 : vector<8x10xf32>
    %c0_120 = arith.constant 0 : index
    %c12 = arith.constant 12 : index
    %c0_121 = arith.constant 0 : index
    %138 = vector.load %arg7[%c0_120, %c12, %c0_121] : memref<8x16x256xf32, #tpu.memory_space<vmem>>, vector<8x1x256xf32>
    %139 = vector.shape_cast %138 : vector<8x1x256xf32> to vector<8x256xf32>
    %c12_122 = arith.constant 12 : index
    %c0_123 = arith.constant 0 : index
    %c0_124 = arith.constant 0 : index
    %140 = vector.load %arg4[%c12_122, %c0_123, %c0_124] : memref<16x10x256xf32, #tpu.memory_space<vmem>>, vector<1x10x256xf32>
    %141 = vector.shape_cast %140 : vector<1x10x256xf32> to vector<10x256xf32>
    %cst_125 = arith.constant dense<0.000000e+00> : vector<8x10xf32>
    %142 = tpu.matmul %139, %141, %cst_125 {dimension_numbers = #tpu.dot_dimension_numbers<[1], [1], [0], [0], [0, 0, 1, 0], [], []>} : vector<8x256xf32>, vector<10x256xf32>, vector<8x10xf32> -> vector<8x10xf32>
    %143 = arith.addf %137, %142 : vector<8x10xf32>
    %c0_126 = arith.constant 0 : index
    %c13 = arith.constant 13 : index
    %c0_127 = arith.constant 0 : index
    %144 = vector.load %arg7[%c0_126, %c13, %c0_127] : memref<8x16x256xf32, #tpu.memory_space<vmem>>, vector<8x1x256xf32>
    %145 = vector.shape_cast %144 : vector<8x1x256xf32> to vector<8x256xf32>
    %c13_128 = arith.constant 13 : index
    %c0_129 = arith.constant 0 : index
    %c0_130 = arith.constant 0 : index
    %146 = vector.load %arg4[%c13_128, %c0_129, %c0_130] : memref<16x10x256xf32, #tpu.memory_space<vmem>>, vector<1x10x256xf32>
    %147 = vector.shape_cast %146 : vector<1x10x256xf32> to vector<10x256xf32>
    %cst_131 = arith.constant dense<0.000000e+00> : vector<8x10xf32>
    %148 = tpu.matmul %145, %147, %cst_131 {dimension_numbers = #tpu.dot_dimension_numbers<[1], [1], [0], [0], [0, 0, 1, 0], [], []>} : vector<8x256xf32>, vector<10x256xf32>, vector<8x10xf32> -> vector<8x10xf32>
    %149 = arith.addf %143, %148 : vector<8x10xf32>
    %c0_132 = arith.constant 0 : index
    %c14 = arith.constant 14 : index
    %c0_133 = arith.constant 0 : index
    %150 = vector.load %arg7[%c0_132, %c14, %c0_133] : memref<8x16x256xf32, #tpu.memory_space<vmem>>, vector<8x1x256xf32>
    %151 = vector.shape_cast %150 : vector<8x1x256xf32> to vector<8x256xf32>
    %c14_134 = arith.constant 14 : index
    %c0_135 = arith.constant 0 : index
    %c0_136 = arith.constant 0 : index
    %152 = vector.load %arg4[%c14_134, %c0_135, %c0_136] : memref<16x10x256xf32, #tpu.memory_space<vmem>>, vector<1x10x256xf32>
    %153 = vector.shape_cast %152 : vector<1x10x256xf32> to vector<10x256xf32>
    %cst_137 = arith.constant dense<0.000000e+00> : vector<8x10xf32>
    %154 = tpu.matmul %151, %153, %cst_137 {dimension_numbers = #tpu.dot_dimension_numbers<[1], [1], [0], [0], [0, 0, 1, 0], [], []>} : vector<8x256xf32>, vector<10x256xf32>, vector<8x10xf32> -> vector<8x10xf32>
    %155 = arith.addf %149, %154 : vector<8x10xf32>
    %c0_138 = arith.constant 0 : index
    %c15 = arith.constant 15 : index
    %c0_139 = arith.constant 0 : index
    %156 = vector.load %arg7[%c0_138, %c15, %c0_139] : memref<8x16x256xf32, #tpu.memory_space<vmem>>, vector<8x1x256xf32>
    %157 = vector.shape_cast %156 : vector<8x1x256xf32> to vector<8x256xf32>
    %c15_140 = arith.constant 15 : index
    %c0_141 = arith.constant 0 : index
    %c0_142 = arith.constant 0 : index
    %158 = vector.load %arg4[%c15_140, %c0_141, %c0_142] : memref<16x10x256xf32, #tpu.memory_space<vmem>>, vector<1x10x256xf32>
    %159 = vector.shape_cast %158 : vector<1x10x256xf32> to vector<10x256xf32>
    %cst_143 = arith.constant dense<0.000000e+00> : vector<8x10xf32>
    %160 = tpu.matmul %157, %159, %cst_143 {dimension_numbers = #tpu.dot_dimension_numbers<[1], [1], [0], [0], [0, 0, 1, 0], [], []>} : vector<8x256xf32>, vector<10x256xf32>, vector<8x10xf32> -> vector<8x10xf32>
    %161 = arith.addf %155, %160 : vector<8x10xf32>
    %c0_144 = arith.constant 0 : index
    %c0_145 = arith.constant 0 : index
    %162 = vector.load %arg5[%c0_144, %c0_145] : memref<1x10xf32, #tpu.memory_space<vmem>>, vector<1x10xf32>
    %163 = vector.broadcast %162 : vector<1x10xf32> to vector<8x10xf32>
    %164 = arith.addf %161, %163 : vector<8x10xf32>
    %c0_146 = arith.constant 0 : index
    %c0_147 = arith.constant 0 : index
    %165 = vector.load %arg6[%c0_146, %c0_147] : memref<8x10xf32, #tpu.memory_space<vmem>>, vector<8x10xf32>
    tpu.vector_store %arg6[%c0_146, %c0_147], %164 {strides = array<i32>} : memref<8x10xf32, #tpu.memory_space<vmem>>, vector<8x10xf32>,
    return
  }
  func.func @transform_0(%arg0: i32) -> (i32, i32, i32) {
    %c0_i32 = arith.constant 0 : i32
    %c0_i32_0 = arith.constant 0 : i32
    %c0_i32_1 = arith.constant 0 : i32
    return %c0_i32, %c0_i32_0, %arg0 : i32, i32, i32
  }
  func.func @transform_1(%arg0: i32) -> (i32, i32) {
    %c0_i32 = arith.constant 0 : i32
    %c0_i32_0 = arith.constant 0 : i32
    %c0_i32_1 = arith.constant 0 : i32
    return %c0_i32, %c0_i32_0 : i32, i32
  }
  func.func @transform_2(%arg0: i32) -> (i32, i32) {
    %c0_i32 = arith.constant 0 : i32
    %c0_i32_0 = arith.constant 0 : i32
    %c0_i32_1 = arith.constant 0 : i32
    return %c0_i32, %c0_i32_0 : i32, i32
  }
  func.func @transform_3(%arg0: i32) -> (i32, i32, i32) {
    %c0_i32 = arith.constant 0 : i32
    %c0_i32_0 = arith.constant 0 : i32
    %c0_i32_1 = arith.constant 0 : i32
    %c0_i32_2 = arith.constant 0 : i32
    return %c0_i32, %c0_i32_0, %c0_i32_1 : i32, i32, i32
  }
  func.func @transform_4(%arg0: i32) -> (i32, i32) {
    %c0_i32 = arith.constant 0 : i32
    %c0_i32_0 = arith.constant 0 : i32
    %c0_i32_1 = arith.constant 0 : i32
    return %c0_i32, %c0_i32_0 : i32, i32
  }
  func.func @transform_5(%arg0: i32) -> (i32, i32) {
    %c0_i32 = arith.constant 0 : i32
    %c0_i32_0 = arith.constant 0 : i32
    return %arg0, %c0_i32 : i32, i32
  }
}

</mosaic_0001>

<bundles_post_ra>
// kernel: tpu_custom_call.1
= control target key start
LH: loop header
LB: loop body
LE: loop exit
PB: predicated region body
PF: predicated region fallthrough
CT: control target
= control target key end

     0   :  { %vm509_vm0 = vcmask 1044480   ;;  %vm510_vm1 = vcmask 1045504   ;;  %v6704_v5 = vmov 65535   ;;  %vm505_vm2 = vcmask 613376   ;;  %s9520_s0 = inlined_call_operand.vmem [shape: bf16[4,75,2048], index: 0, kind: input, shape index: {}]   ;;  %s9521_s1 = inlined_call_operand.vmem [shape: bf16[16,75], index: 1, kind: input, shape index: {}]   ;;  %s9522_s2 = inlined_call_operand.vmem [shape: f32[16,1], index: 2, kind: input, shape index: {}]   ;;  %s9523_s3 = inlined_call_operand.vmem [shape: f32[16,10,256], index: 3, kind: input, shape index: {}]   ;;  %s9524_s4 = inlined_call_operand.vmem [shape: f32[1,10], index: 4, kind: input, shape index: {}]   ;;  %s9525_s5 = inlined_call_operand.hbm [shape: f32[8,10], index: 5, kind: output, shape index: {}]  }
   0x1   :  { %v4964_v0 = vld [vmem:[%s9520_s0 + $0x200] sm:$0xf]  ;;  %v6415_v3 = vld [vmem:[%s9520_s0 + $0x204] sm:$0xf]  ;;  %v511_v6 = vsel %vm509_vm0, 4294967295, %v6704_v5 }
   0x2   :  { %v6423_v1 = vld [vmem:[%s9520_s0 + $0x23c] sm:$0x30]  ;;  %v4966_v4 = vld [vmem:[%s9520_s0 + $0x240] sm:$0x30]  ;;  %v4972_v8 = vld [vmem:[%s9520_s0 + $0x208] sm:$0xf] }
   0x3   :  { %v4965_v2 = vor.u32 %v6423_v1, %v4964_v0  ;;  %v4969_v7 = vor.u32 %v6415_v3, %v4966_v4  ;;  %v6424_v9 = vld [vmem:[%s9520_s0 + $0x244] sm:$0x30]  ;;  %v6755_v10 = vsel %vm510_vm1, %v511_v6, 0  ;;  %v6416_v12 = vld [vmem:[%s9520_s0 + $0x20c] sm:$0xf] }
   0x4   :  { %v4973_v11 = vor.u32 %v6424_v9, %v4972_v8  ;;  %v4974_v13 = vld [vmem:[%s9520_s0 + $0x248] sm:$0x30]  ;;  %v4900_v17 = vld [vmem:[%s9520_s0 + $0x180] sm:$0xf]  ;;  %v6399_v19 = vld [vmem:[%s9520_s0 + $0x184] sm:$0xf] }
   0x5   :  { %v514_v14 = vand.u32 %v4965_v2, %v6755_v10  ;;  %v517_v15 = vand.u32 %v4969_v7, %v6755_v10  ;;  %v4977_v16 = vor.u32 %v6416_v12, %v4974_v13  ;;  %v6407_v18 = vld [vmem:[%s9520_s0 + $0x1bc] sm:$0xf0]  ;;  %v4902_v21 = vld [vmem:[%s9520_s0 + $0x1c0] sm:$0xf0]  ;;  %v4908_v22 = vld [vmem:[%s9520_s0 + $0x188] sm:$0xf] }
   0x6   :  { %v520_v20 = vand.u32 %v4973_v11, %v6755_v10  ;;  %v6408_v23 = vld [vmem:[%s9520_s0 + $0x1c4] sm:$0xf0]  ;;  %v4901_v25 = vor.u32 %v6407_v18, %v4900_v17  ;;  %v4905_v26 = vor.u32 %v6399_v19, %v4902_v21  ;;  %v6400_v27 = vld [vmem:[%s9520_s0 + $0x18c] sm:$0xf]  ;;  %v4836_v29 = vld [vmem:[%s9520_s0 + $0x100] sm:$0xf] }
   0x7   :  { %564 = vmatpush.bf16.msra.mxu0 %v514_v14  ;;  %578 = vmatpush.bf16.msra.mxu1 %v517_v15  ;;  %v523_v24 = vand.u32 %v4977_v16, %v6755_v10  ;;  %v4910_v28 = vld [vmem:[%s9520_s0 + $0x1c8] sm:$0xf0]  ;;  %v4909_v30 = vor.u32 %v6408_v23, %v4908_v22  ;;  %v6391_v31 = vld [vmem:[%s9520_s0 + $0x13c] sm:$0xf0]  ;;  %v6383_v32 = vld [vmem:[%s9520_s0 + $0x104] sm:$0xf] }
   0x8   :  { %592 = vmatpush.bf16.msra.mxu2 %v520_v20  ;;  %v4838_v33 = vld [vmem:[%s9520_s0 + $0x140] sm:$0xf0]  ;;  %v4913_v34 = vor.u32 %v6400_v27, %v4910_v28  ;;  %v4844_v35 = vld [vmem:[%s9520_s0 + $0x108] sm:$0xf]  ;;  %v6384_v37 = vld [vmem:[%s9520_s0 + $0x10c] sm:$0xf]  ;;  %v4837_v39 = vor.u32 %v6391_v31, %v4836_v29 }
   0x9   :  { %606 = vmatpush.bf16.msra.mxu3 %v523_v24  ;;  %v6392_v36 = vld [vmem:[%s9520_s0 + $0x144] sm:$0xf0]  ;;  %v4846_v38 = vld [vmem:[%s9520_s0 + $0x148] sm:$0xf0]  ;;  %v4841_v40 = vor.u32 %v6383_v32, %v4838_v33  ;;  %v4772_v41 = vld [vmem:[%s9520_s0 + $0x80] sm:$0xf] }
   0xa   :  { %v6375_v42 = vld [vmem:[%s9520_s0 + $0xbc] sm:$0xf0]  ;;  %v4845_v43 = vor.u32 %v6392_v36, %v4844_v35  ;;  %v6367_v44 = vld [vmem:[%s9520_s0 + $0x84] sm:$0xf]  ;;  %v4780_v46 = vld [vmem:[%s9520_s0 + $0x88] sm:$0xf]  ;;  %v4849_v47 = vor.u32 %v6384_v37, %v4846_v38 }
   0xb   :  { %565 = vmatpush.bf16.msra.mxu0 %v4901_v25  ;;  %579 = vmatpush.bf16.msra.mxu1 %v4905_v26  ;;  %v4774_v45 = vld [vmem:[%s9520_s0 + $0xc0] sm:$0xf0]  ;;  %v6376_v48 = vld [vmem:[%s9520_s0 + $0xc4] sm:$0xf0]  ;;  %v6368_v49 = vld [vmem:[%s9520_s0 + $0x8c] sm:$0xf]  ;;  %v4773_v55 = vor.u32 %v6375_v42, %v4772_v41 }
   0xc   :  { %593 = vmatpush.bf16.msra.mxu2 %v4909_v30  ;;  %v4782_v50 = vld [vmem:[%s9520_s0 + $0xc8] sm:$0xf0]  ;;  %v4708_v51 = vld [vmem:[%s9520_s0] sm:$0xf]  ;;  %v6351_v53 = vld [vmem:[%s9520_s0 + $0x4] sm:$0xf]  ;;  %v4777_v56 = vor.u32 %v6367_v44, %v4774_v45  ;;  %v4781_v60 = vor.u32 %v6376_v48, %v4780_v46 }
   0xd   :  { %607 = vmatpush.bf16.msra.mxu3 %v4913_v34  ;;  %v6359_v52 = vld [vmem:[%s9520_s0 + $0x3c] sm:$0xf0]  ;;  %v4710_v54 = vld [vmem:[%s9520_s0 + $0x40] sm:$0xf0]  ;;  %v4716_v57 = vld [vmem:[%s9520_s0 + $0x8] sm:$0xf]  ;;  %v4785_v0 = vor.u32 %v6368_v49, %v4782_v50 }
   0xe   :  { %v6360_v58 = vld [vmem:[%s9520_s0 + $0x44] sm:$0xf0]  ;;  %v4980_v59 = vld [vmem:[%s9520_s0 + $0x210] sm:$0xf]  ;;  %v6417_v62 = vld [vmem:[%s9520_s0 + $0x214] sm:$0xf]  ;;  %v4709_v11 = vor.u32 %v6359_v52, %v4708_v51  ;;  %v4713_v12 = vor.u32 %v6351_v53, %v4710_v54 }
   0xf   :  { %566 = vmatpush.bf16.msra.mxu0 %v4837_v39  ;;  %580 = vmatpush.bf16.msra.mxu1 %v4841_v40  ;;  %v6425_v61 = vld [vmem:[%s9520_s0 + $0x24c] sm:$0x30]  ;;  %v4982_v63 = vld [vmem:[%s9520_s0 + $0x250] sm:$0x30]  ;;  %v4988_v3 = vld [vmem:[%s9520_s0 + $0x218] sm:$0xf]  ;;  %v4717_v14 = vor.u32 %v6360_v58, %v4716_v57 }
  0x10   :  { %594 = vmatpush.bf16.msra.mxu2 %v4845_v43  ;;  %v4981_v1 = vor.u32 %v6425_v61, %v4980_v59  ;;  %v4985_v2 = vor.u32 %v6417_v62, %v4982_v63  ;;  %v6426_v4 = vld [vmem:[%s9520_s0 + $0x254] sm:$0x30]  ;;  %v6418_v5 = vld [vmem:[%s9520_s0 + $0x21c] sm:$0xf]  ;;  %v6352_v6 = vld [vmem:[%s9520_s0 + $0xc] sm:$0xf] }
  0x11   :  { %608 = vmatpush.bf16.msra.mxu3 %v4849_v47  ;;  %v4718_v7 = vld [vmem:[%s9520_s0 + $0x48] sm:$0xf0]  ;;  %v4989_v8 = vor.u32 %v6426_v4, %v4988_v3  ;;  %v4990_v9 = vld [vmem:[%s9520_s0 + $0x258] sm:$0x30]  ;;  %v4916_v18 = vld [vmem:[%s9520_s0 + $0x190] sm:$0xf] }
  0x12   :  { %v4993_v13 = vor.u32 %v6418_v5, %v4990_v9  ;;  %v526_v15 = vand.u32 %v4981_v1, %v6755_v10  ;;  %v4721_v16 = vor.u32 %v6352_v6, %v4718_v7  ;;  %v529_v17 = vand.u32 %v4985_v2, %v6755_v10  ;;  %v6409_v19 = vld [vmem:[%s9520_s0 + $0x1cc] sm:$0xf0]  ;;  %v6898_v20 = vld [vmem:[%s9521_s1] sm:$0xff]  ;;  %v6401_v23 = vld [vmem:[%s9520_s0 + $0x194] sm:$0xf] }
  0x13   :  { %567 = vmatpush.bf16.msra.mxu0 %v4773_v55  ;;  %581 = vmatpush.bf16.msra.mxu1 %v4777_v56  ;;  %v532_v21 = vand.u32 %v4989_v8, %v6755_v10  ;;  %v4918_v24 = vld [vmem:[%s9520_s0 + $0x1d0] sm:$0xf0]  ;;  %v4924_v25 = vld [vmem:[%s9520_s0 + $0x198] sm:$0xf]  ;;  %v6402_v27 = vld [vmem:[%s9520_s0 + $0x19c] sm:$0xf]  ;;  %v4917_v29 = vor.u32 %v6409_v19, %v4916_v18 }
  0x14   :  { %595 = vmatpush.bf16.msra.mxu2 %v4781_v60  ;;  %v535_v22 = vand.u32 %v4993_v13, %v6755_v10  ;;  %v6410_v26 = vld [vmem:[%s9520_s0 + $0x1d4] sm:$0xf0]  ;;  %v4926_v28 = vld [vmem:[%s9520_s0 + $0x1d8] sm:$0xf0]  ;;  %v4921_v30 = vor.u32 %v6401_v23, %v4918_v24  ;;  %v4852_v31 = vld [vmem:[%s9520_s0 + $0x110] sm:$0xf] }
  0x15   :  { %609 = vmatpush.bf16.msra.mxu3 %v4785_v0  ;;  %v6393_v32 = vld [vmem:[%s9520_s0 + $0x14c] sm:$0xf0]  ;;  %v6385_v33 = vld [vmem:[%s9520_s0 + $0x114] sm:$0xf]  ;;  %v4925_v34 = vor.u32 %v6410_v26, %v4924_v25  ;;  %v4929_v35 = vor.u32 %v6402_v27, %v4926_v28  ;;  %v4860_v37 = vld [vmem:[%s9520_s0 + $0x118] sm:$0xf] }
  0x16   :  { %v4854_v36 = vld [vmem:[%s9520_s0 + $0x150] sm:$0xf0]  ;;  %v6394_v38 = vld [vmem:[%s9520_s0 + $0x154] sm:$0xf0]  ;;  %v6386_v39 = vld [vmem:[%s9520_s0 + $0x11c] sm:$0xf]  ;;  %v4853_v42 = vor.u32 %v6393_v32, %v4852_v31 }
  0x17   :  { %568 = vmatpush.bf16.msra.mxu0 %v4709_v11  ;;  %582 = vmatpush.bf16.msra.mxu1 %v4713_v12  ;;  %v4862_v40 = vld [vmem:[%s9520_s0 + $0x158] sm:$0xf0]  ;;  %v4788_v41 = vld [vmem:[%s9520_s0 + $0x90] sm:$0xf]  ;;  %v6369_v44 = vld [vmem:[%s9520_s0 + $0x94] sm:$0xf]  ;;  %v4857_v46 = vor.u32 %v6385_v33, %v4854_v36  ;;  %v4861_v50 = vor.u32 %v6394_v38, %v4860_v37 }
  0x18   :  { %596 = vmatpush.bf16.msra.mxu2 %v4717_v14  ;;  %v6377_v43 = vld [vmem:[%s9520_s0 + $0xcc] sm:$0xf0]  ;;  %v4790_v45 = vld [vmem:[%s9520_s0 + $0xd0] sm:$0xf0]  ;;  %v4796_v47 = vld [vmem:[%s9520_s0 + $0x98] sm:$0xf]  ;;  %v4865_v51 = vor.u32 %v6386_v39, %v4862_v40 }
  0x19   :  { %610 = vmatpush.bf16.msra.mxu3 %v4721_v16  ;;  %v6378_v48 = vld [vmem:[%s9520_s0 + $0xd4] sm:$0xf0]  ;;  %v6370_v49 = vld [vmem:[%s9520_s0 + $0x9c] sm:$0xf]  ;;  %v4996_v53 = vld [vmem:[%s9520_s0 + $0x220] sm:$0xf]  ;;  %v4789_v58 = vor.u32 %v6377_v43, %v4788_v41  ;;  %v4793_v62 = vor.u32 %v6369_v44, %v4790_v45 }
  0x1a   :  { %5026 = vmatmul.msk.bf16.vlgmr.msra.gmra.mxu0 %vm505_vm2, %v6898_v20  ;;  %5027 = vmatmul.msk.bf16.vlgmr.msra.gmra.mxu1 %vm505_vm2, %v6898_v20  ;;  %v4798_v52 = vld [vmem:[%s9520_s0 + $0xd8] sm:$0xf0]  ;;  %v6427_v54 = vld [vmem:[%s9520_s0 + $0x25c] sm:$0x30]  ;;  %v4724_v55 = vld [vmem:[%s9520_s0 + $0x10] sm:$0xf]  ;;  %v4797_v3 = vor.u32 %v6378_v48, %v4796_v47 }
  0x1b   :  { %620 = vmatpush.bf16.msrb.mxu0 %v526_v15  ;;  %634 = vmatpush.bf16.msrb.mxu1 %v529_v17  ;;  %v6361_v56 = vld [vmem:[%s9520_s0 + $0x4c] sm:$0xf0]  ;;  %v6419_v57 = vld [vmem:[%s9520_s0 + $0x224] sm:$0xf]  ;;  %v5004_v60 = vld [vmem:[%s9520_s0 + $0x228] sm:$0xf]  ;;  %v4997_v0 = vor.u32 %v6427_v54, %v4996_v53  ;;  %v4801_v4 = vor.u32 %v6370_v49, %v4798_v52 }
  0x1c   :  { %648 = vmatpush.bf16.msrb.mxu2 %v532_v21  ;;  %5029 = vmatmul.msk.bf16.vlgmr.msra.gmra.mxu3 %vm505_vm2, %v6898_v20  ;;  %v4998_v59 = vld [vmem:[%s9520_s0 + $0x260] sm:$0x30]  ;;  %v6428_v61 = vld [vmem:[%s9520_s0 + $0x264] sm:$0x30]  ;;  %v6353_v63 = vld [vmem:[%s9520_s0 + $0x14] sm:$0xf]  ;;  %v4725_v15 = vor.u32 %v6361_v56, %v4724_v55 }
  0x1d   :  { %662 = vmatpush.bf16.msrb.mxu3 %v535_v22  ;;  %5028 = vmatmul.msk.bf16.vlgmr.msra.gmra.mxu2 %vm505_vm2, %v6898_v20  ;;  %v6420_v1 = vld [vmem:[%s9520_s0 + $0x22c] sm:$0xf]  ;;  %v4726_v5 = vld [vmem:[%s9520_s0 + $0x50] sm:$0xf0]  ;;  %v4732_v6 = vld [vmem:[%s9520_s0 + $0x18] sm:$0xf]  ;;  %v5001_v12 = vor.u32 %v6419_v57, %v4998_v59  ;;  %v5005_v13 = vor.u32 %v6428_v61, %v5004_v60  ;;  %v538_v18 = vand.u32 %v4997_v0, %v6755_v10 }
  0x1e   :  { %v5006_v2 = vld [vmem:[%s9520_s0 + $0x268] sm:$0x30]  ;;  %v24_v7 = vld [vmem:[%s9522_s2] sm:$0xff]  ;;  %v6362_v8 = vld [vmem:[%s9520_s0 + $0x54] sm:$0xf0]  ;;  %v6705_v14 = vmov 0   ;;  %v4729_v17 = vor.u32 %v6353_v63, %v4726_v5 }
  0x1f   :  { %621 = vmatpush.bf16.msrb.mxu0 %v4917_v29  ;;  %635 = vmatpush.bf16.msrb.mxu1 %v4921_v30  ;;  %v6354_v9 = vld [vmem:[%s9520_s0 + $0x1c] sm:$0xf]  ;;  %v5009_v16 = vor.u32 %v6420_v1, %v5006_v2  ;;  %v4733_v19 = vor.u32 %v6362_v8, %v4732_v6  ;;  %v4932_v22 = vld [vmem:[%s9520_s0 + $0x1a0] sm:$0xf]  ;;  %v541_v24 = vand.u32 %v5001_v12, %v6755_v10  ;;  %v6403_v26 = vld [vmem:[%s9520_s0 + $0x1a4] sm:$0xf] }
  0x20   :  { %649 = vmatpush.bf16.msrb.mxu2 %v4925_v34  ;;  %v4734_v11 = vld [vmem:[%s9520_s0 + $0x58] sm:$0xf0]  ;;  %6674 = vset.pattern.permute.xlu0 %v6705_v14  ;;  %v6411_v23 = vld [vmem:[%s9520_s0 + $0x1dc] sm:$0xf0]  ;;  %v544_v25 = vand.u32 %v5005_v13, %v6755_v10  ;;  %v4934_v28 = vld [vmem:[%s9520_s0 + $0x1e0] sm:$0xf0] }
  0x21   :  { %663 = vmatpush.bf16.msrb.mxu3 %v4929_v35  ;;  %108 = vperm.xlu0 %6674, %v24_v7   ;;  %v4737_v21 = vor.u32 %v6354_v9, %v4734_v11  ;;  %v547_v27 = vand.u32 %v5009_v16, %v6755_v10  ;;  %v4940_v29 = vld [vmem:[%s9520_s0 + $0x1a8] sm:$0xf]  ;;  %v4933_v31 = vor.u32 %v6411_v23, %v4932_v22  ;;  %v6404_v32 = vld [vmem:[%s9520_s0 + $0x1ac] sm:$0xf]  ;;  %v4868_v34 = vld [vmem:[%s9520_s0 + $0x120] sm:$0xf] }
  0x22   :  { %v6412_v30 = vld [vmem:[%s9520_s0 + $0x1e4] sm:$0xf0]  ;;  %v4942_v33 = vld [vmem:[%s9520_s0 + $0x1e8] sm:$0xf0]  ;;  %v6395_v35 = vld [vmem:[%s9520_s0 + $0x15c] sm:$0xf0]  ;;  %v4937_v36 = vor.u32 %v6403_v26, %v4934_v28 }
  0x23   :  { %622 = vmatpush.bf16.msrb.mxu0 %v4853_v42  ;;  %636 = vmatpush.bf16.msrb.mxu1 %v4857_v46  ;;  %v4941_v37 = vor.u32 %v6412_v30, %v4940_v29  ;;  %v6387_v38 = vld [vmem:[%s9520_s0 + $0x124] sm:$0xf]  ;;  %v4876_v40 = vld [vmem:[%s9520_s0 + $0x128] sm:$0xf]  ;;  %v4945_v41 = vor.u32 %v6404_v32, %v4942_v33  ;;  %v6388_v43 = vld [vmem:[%s9520_s0 + $0x12c] sm:$0xf]  ;;  %v4869_v45 = vor.u32 %v6395_v35, %v4868_v34 }
  0x24   :  { %650 = vmatpush.bf16.msrb.mxu2 %v4861_v50  ;;  %v4870_v39 = vld [vmem:[%s9520_s0 + $0x160] sm:$0xf0]  ;;  %v6396_v42 = vld [vmem:[%s9520_s0 + $0x164] sm:$0xf0]  ;;  %v4878_v44 = vld [vmem:[%s9520_s0 + $0x168] sm:$0xf0] }
  0x25   :  { %664 = vmatpush.bf16.msrb.mxu3 %v4865_v51  ;;  %v4804_v46 = vld [vmem:[%s9520_s0 + $0xa0] sm:$0xf]  ;;  %v25_v48 = vld [vmem:[%s9522_s2 + $0x8] sm:$0xff]  ;;  %v6371_v49 = vld [vmem:[%s9520_s0 + $0xa4] sm:$0xf]  ;;  %v4873_v53 = vor.u32 %v6387_v38, %v4870_v39  ;;  %v4877_v54 = vor.u32 %v6396_v42, %v4876_v40 }
  0x26   :  { %v6379_v47 = vld [vmem:[%s9520_s0 + $0xdc] sm:$0xf0]  ;;  %v4806_v50 = vld [vmem:[%s9520_s0 + $0xe0] sm:$0xf0]  ;;  %v4812_v51 = vld [vmem:[%s9520_s0 + $0xa8] sm:$0xf] }
  0x27   :  { %623 = vmatpush.bf16.msrb.mxu0 %v4789_v58  ;;  %637 = vmatpush.bf16.msrb.mxu1 %v4793_v62  ;;  %v6380_v52 = vld [vmem:[%s9520_s0 + $0xe4] sm:$0xf0]  ;;  %v6372_v55 = vld [vmem:[%s9520_s0 + $0xac] sm:$0xf]  ;;  %v5012_v56 = vld [vmem:[%s9520_s0 + $0x230] sm:$0xf]  ;;  %v4881_v58 = vor.u32 %v6388_v43, %v4878_v44  ;;  %v4805_v62 = vor.u32 %v6379_v47, %v4804_v46  ;;  %v4809_v6 = vor.u32 %v6371_v49, %v4806_v50 }
  0x28   :  { %651 = vmatpush.bf16.msrb.mxu2 %v4797_v3  ;;  %v6429_v57 = vld [vmem:[%s9520_s0 + $0x26c] sm:$0x30]  ;;  %v4814_v59 = vld [vmem:[%s9520_s0 + $0xe8] sm:$0xf0]  ;;  %v4740_v60 = vld [vmem:[%s9520_s0 + $0x20] sm:$0xf]  ;;  %v4813_v7 = vor.u32 %v6380_v52, %v4812_v51 }
  0x29   :  { %665 = vmatpush.bf16.msrb.mxu3 %v4801_v4  ;;  %v6363_v61 = vld [vmem:[%s9520_s0 + $0x5c] sm:$0xf0]  ;;  %113 = vperm.xlu0 %6674, %v25_v48   ;;  %v6421_v63 = vld [vmem:[%s9520_s0 + $0x234] sm:$0xf]  ;;  %v5020_v1 = vld [vmem:[%s9520_s0 + $0x238] sm:$0xf]  ;;  %v5013_v2 = vor.u32 %v6429_v57, %v5012_v56  ;;  %v4817_v9 = vor.u32 %v6372_v55, %v4814_v59 }
  0x2a   :  { %v5014_v0 = vld [vmem:[%s9520_s0 + $0x270] sm:$0x30]  ;;  %v6430_v3 = vld [vmem:[%s9520_s0 + $0x274] sm:$0x30]  ;;  %v6422_v4 = vld [vmem:[%s9520_s0 + $0x23c] sm:$0xf] }
  0x2b   :  { %624 = vmatpush.bf16.msrb.mxu0 %v4725_v15  ;;  %638 = vmatpush.bf16.msrb.mxu1 %v4729_v17  ;;  %v5022_v5 = vld [vmem:[%s9520_s0 + $0x278] sm:$0x30]  ;;  %v6355_v8 = vld [vmem:[%s9520_s0 + $0x24] sm:$0xf]  ;;  %v4748_v12 = vld [vmem:[%s9520_s0 + $0x28] sm:$0xf]  ;;  %v5017_v14 = vor.u32 %v6421_v63, %v5014_v0  ;;  %v4741_v15 = vor.u32 %v6363_v61, %v4740_v60 }
  0x2c   :  { %652 = vmatpush.bf16.msrb.mxu2 %v4733_v19  ;;  %v4742_v11 = vld [vmem:[%s9520_s0 + $0x60] sm:$0xf0]  ;;  %v6364_v13 = vld [vmem:[%s9520_s0 + $0x64] sm:$0xf0]  ;;  %v6356_v16 = vld [vmem:[%s9520_s0 + $0x2c] sm:$0xf]  ;;  %v5025_v19 = vor.u32 %v6422_v4, %v5022_v5 }
  0x2d   :  { %666 = vmatpush.bf16.msrb.mxu3 %v4737_v21  ;;  %v4750_v17 = vld [vmem:[%s9520_s0 + $0x68] sm:$0xf0]  ;;  %v550_v21 = vand.u32 %v5013_v2, %v6755_v10  ;;  %v4745_v22 = vor.u32 %v6355_v8, %v4742_v11  ;;  %v4749_v23 = vor.u32 %v6364_v13, %v4748_v12  ;;  %v4948_v26 = vld [vmem:[%s9520_s0 + $0x1b0] sm:$0xf]  ;;  %v6405_v30 = vld [vmem:[%s9520_s0 + $0x1b4] sm:$0xf] }
  0x2e   :  { %5030 = vmatmul.msk.bf16.vlgmr.msrb.gmra.mxu0 %vm505_vm2, %v6898_v20  ;;  %5031 = vmatmul.msk.bf16.vlgmr.msrb.gmra.mxu1 %vm505_vm2, %v6898_v20  ;;  %v559_v29 = vand.u32 %v5025_v19, %v6755_v10  ;;  %v4956_v32 = vld [vmem:[%s9520_s0 + $0x1b8] sm:$0xf]  ;;  %v6406_v34 = vld [vmem:[%s9520_s0 + $0x1bc] sm:$0xf]  ;;  %v4884_v38 = vld [vmem:[%s9520_s0 + $0x130] sm:$0xf] }
  0x2f   :  { %676 = vmatpush.bf16.msra.mxu0 %v538_v18  ;;  %690 = vmatpush.bf16.msra.mxu1 %v541_v24  ;;  %v5021_v18 = vor.u32 %v6430_v3, %v5020_v1  ;;  %v4753_v24 = vor.u32 %v6356_v16, %v4750_v17  ;;  %v6414_v33 = vld [vmem:[%s9520_s0 + $0x1f4] sm:$0xf0]  ;;  %v4958_v35 = vld [vmem:[%s9520_s0 + $0x1f8] sm:$0xf0]  ;;  %v6397_v39 = vld [vmem:[%s9520_s0 + $0x16c] sm:$0xf0] }
  0x30   :  { %704 = vmatpush.bf16.msra.mxu2 %v544_v25  ;;  %5033 = vmatmul.msk.bf16.vlgmr.msrb.gmra.mxu3 %vm505_vm2, %v6898_v20  ;;  %v553_v25 = vand.u32 %v5017_v14, %v6755_v10  ;;  %v4957_v40 = vor.u32 %v6414_v33, %v4956_v32  ;;  %v6389_v42 = vld [vmem:[%s9520_s0 + $0x134] sm:$0xf]  ;;  %v4892_v44 = vld [vmem:[%s9520_s0 + $0x138] sm:$0xf]  ;;  %v6390_v46 = vld [vmem:[%s9520_s0 + $0x13c] sm:$0xf]  ;;  %v4885_v49 = vor.u32 %v6397_v39, %v4884_v38 }
  0x31   :  { %718 = vmatpush.bf16.msra.mxu3 %v547_v27  ;;  %5032 = vmatmul.msk.bf16.vlgmr.msrb.gmra.mxu2 %vm505_vm2, %v6898_v20  ;;  %v6413_v27 = vld [vmem:[%s9520_s0 + $0x1ec] sm:$0xf0]  ;;  %v556_v28 = vand.u32 %v5021_v18, %v6755_v10  ;;  %v4886_v43 = vld [vmem:[%s9520_s0 + $0x170] sm:$0xf0]  ;;  %v4894_v47 = vld [vmem:[%s9520_s0 + $0x178] sm:$0xf0] }
  0x32   :  { %v4820_v48 = vld [vmem:[%s9520_s0 + $0xb0] sm:$0xf]  ;;  %v4889_v50 = vor.u32 %v6389_v42, %v4886_v43  ;;  %v6373_v52 = vld [vmem:[%s9520_s0 + $0xb4] sm:$0xf]  ;;  %v4897_v55 = vor.u32 %v6390_v46, %v4894_v47  ;;  %v4828_v56 = vld [vmem:[%s9520_s0 + $0xb8] sm:$0xf] }
  0x33   :  { %677 = vmatpush.bf16.msra.mxu0 %v4933_v31  ;;  %691 = vmatpush.bf16.msra.mxu1 %v4937_v36  ;;  %v4950_v31 = vld [vmem:[%s9520_s0 + $0x1f0] sm:$0xf0]  ;;  %v4949_v36 = vor.u32 %v6413_v27, %v4948_v26  ;;  %v6381_v51 = vld [vmem:[%s9520_s0 + $0xec] sm:$0xf0]  ;;  %v6382_v57 = vld [vmem:[%s9520_s0 + $0xf4] sm:$0xf0] }
  0x34   :  { %705 = vmatpush.bf16.msra.mxu2 %v4941_v37  ;;  %v4953_v37 = vor.u32 %v6405_v30, %v4950_v31  ;;  %v4830_v59 = vld [vmem:[%s9520_s0 + $0xf8] sm:$0xf0]  ;;  %v5380_v60 = vld [vmem:[%s9520_s0 + $0x480] sm:$0xf]  ;;  %v6365_v63 = vld [vmem:[%s9520_s0 + $0x6c] sm:$0xf0]  ;;  %v4821_v3 = vor.u32 %v6381_v51, %v4820_v48  ;;  %v4829_v8 = vor.u32 %v6382_v57, %v4828_v56 }
  0x35   :  { %719 = vmatpush.bf16.msra.mxu3 %v4945_v41  ;;  %v4961_v41 = vor.u32 %v6406_v34, %v4958_v35  ;;  %v6503_v61 = vld [vmem:[%s9520_s0 + $0x4bc] sm:$0x30]  ;;  %v6495_v0 = vld [vmem:[%s9520_s0 + $0x484] sm:$0xf]  ;;  %v5388_v2 = vld [vmem:[%s9520_s0 + $0x488] sm:$0xf] }
  0x36   :  { %v5382_v1 = vld [vmem:[%s9520_s0 + $0x4c0] sm:$0x30]  ;;  %v6504_v5 = vld [vmem:[%s9520_s0 + $0x4c4] sm:$0x30]  ;;  %v6357_v11 = vld [vmem:[%s9520_s0 + $0x34] sm:$0xf]  ;;  %v5381_v17 = vor.u32 %v6503_v61, %v5380_v60 }
  0x37   :  { %678 = vmatpush.bf16.msra.mxu0 %v4869_v45  ;;  %692 = vmatpush.bf16.msra.mxu1 %v4873_v53  ;;  %v6398_v45 = vld [vmem:[%s9520_s0 + $0x174] sm:$0xf0]  ;;  %v4822_v53 = vld [vmem:[%s9520_s0 + $0xf0] sm:$0xf0]  ;;  %v4766_v16 = vld [vmem:[%s9520_s0 + $0x78] sm:$0xf0]  ;;  %v5385_v18 = vor.u32 %v6495_v0, %v5382_v1  ;;  %v5389_v19 = vor.u32 %v6504_v5, %v5388_v2 }
  0x38   :  { %706 = vmatpush.bf16.msra.mxu2 %v4877_v54  ;;  %v4893_v54 = vor.u32 %v6398_v45, %v4892_v44  ;;  %v4825_v4 = vor.u32 %v6373_v52, %v4822_v53  ;;  %v4758_v12 = vld [vmem:[%s9520_s0 + $0x70] sm:$0xf0]  ;;  %v4764_v13 = vld [vmem:[%s9520_s0 + $0x38] sm:$0xf]  ;;  %v1283_v26 = vand.u32 %v5381_v17, %v6755_v10  ;;  %v6479_v32 = vld [vmem:[%s9520_s0 + $0x404] sm:$0xf] }
  0x39   :  { %720 = vmatpush.bf16.msra.mxu3 %v4881_v58  ;;  %v6374_v58 = vld [vmem:[%s9520_s0 + $0xbc] sm:$0xf]  ;;  %v6366_v14 = vld [vmem:[%s9520_s0 + $0x74] sm:$0xf0]  ;;  %v1286_v27 = vand.u32 %v5385_v18, %v6755_v10  ;;  %v1289_v30 = vand.u32 %v5389_v19, %v6755_v10  ;;  %v5318_v33 = vld [vmem:[%s9520_s0 + $0x440] sm:$0xf0] }
  0x3a   :  { %v5324_v34 = vld [vmem:[%s9520_s0 + $0x408] sm:$0xf]  ;;  %v5321_v39 = vor.u32 %v6479_v32, %v5318_v33  ;;  %v6463_v44 = vld [vmem:[%s9520_s0 + $0x384] sm:$0xf]  ;;  %v6464_v48 = vld [vmem:[%s9520_s0 + $0x38c] sm:$0xf] }
  0x3b   :  { %679 = vmatpush.bf16.msra.mxu0 %v4805_v62  ;;  %693 = vmatpush.bf16.msra.mxu1 %v4809_v6  ;;  %v4756_v62 = vld [vmem:[%s9520_s0 + $0x30] sm:$0xf]  ;;  %v6496_v6 = vld [vmem:[%s9520_s0 + $0x48c] sm:$0xf]  ;;  %v6488_v35 = vld [vmem:[%s9520_s0 + $0x444] sm:$0xf0] }
  0x3c   :  { %707 = vmatpush.bf16.msra.mxu2 %v4813_v7  ;;  %v5390_v7 = vld [vmem:[%s9520_s0 + $0x4c8] sm:$0x30]  ;;  %v5325_v42 = vor.u32 %v6488_v35, %v5324_v34  ;;  %v5254_v45 = vld [vmem:[%s9520_s0 + $0x3c0] sm:$0xf0]  ;;  %v5260_v46 = vld [vmem:[%s9520_s0 + $0x388] sm:$0xf] }
  0x3d   :  { %721 = vmatpush.bf16.msra.mxu3 %v4817_v9  ;;  %v4833_v9 = vor.u32 %v6374_v58, %v4830_v59  ;;  %v6472_v47 = vld [vmem:[%s9520_s0 + $0x3c4] sm:$0xf0]  ;;  %v5257_v52 = vor.u32 %v6463_v44, %v5254_v45  ;;  %v6455_v53 = vld [vmem:[%s9520_s0 + $0x33c] sm:$0xf0]  ;;  %v6448_v60 = vld [vmem:[%s9520_s0 + $0x30c] sm:$0xf] }
  0x3e   :  { %v5261_v56 = vor.u32 %v6472_v47, %v5260_v46  ;;  %v5196_v58 = vld [vmem:[%s9520_s0 + $0x308] sm:$0xf]  ;;  %v5198_v61 = vld [vmem:[%s9520_s0 + $0x348] sm:$0xf0]  ;;  %v5124_v0 = vld [vmem:[%s9520_s0 + $0x280] sm:$0xf] }
  0x3f   :  { %680 = vmatpush.bf16.msra.mxu0 %v4741_v15  ;;  %694 = vmatpush.bf16.msra.mxu1 %v4745_v22  ;;  %v6358_v15 = vld [vmem:[%s9520_s0 + $0x3c] sm:$0xf]  ;;  %v4757_v22 = vor.u32 %v6365_v63, %v4756_v62  ;;  %v6456_v59 = vld [vmem:[%s9520_s0 + $0x344] sm:$0xf0]  ;;  %v5396_v62 = vld [vmem:[%s9520_s0 + $0x490] sm:$0xf] }
  0x40   :  { %708 = vmatpush.bf16.msra.mxu2 %v4749_v23  ;;  %v4761_v23 = vor.u32 %v6357_v11, %v4758_v12  ;;  %v6505_v63 = vld [vmem:[%s9520_s0 + $0x4cc] sm:$0x30]  ;;  %v6439_v1 = vld [vmem:[%s9520_s0 + $0x2bc] sm:$0xf0]  ;;  %v6497_v2 = vld [vmem:[%s9520_s0 + $0x494] sm:$0xf]  ;;  %v5197_v11 = vor.u32 %v6456_v59, %v5196_v58  ;;  %v5201_v12 = vor.u32 %v6448_v60, %v5198_v61 }
  0x41   :  { %722 = vmatpush.bf16.msra.mxu3 %v4753_v24  ;;  %v4765_v24 = vor.u32 %v6366_v14, %v4764_v13  ;;  %v6431_v13 = vld [vmem:[%s9520_s0 + $0x284] sm:$0xf]  ;;  %v6432_v17 = vld [vmem:[%s9520_s0 + $0x28c] sm:$0xf]  ;;  %v5397_v19 = vor.u32 %v6505_v63, %v5396_v62  ;;  %v6481_v32 = vld [vmem:[%s9520_s0 + $0x414] sm:$0xf] }
  0x42   :  { %5034 = vmatmul.msk.bf16.vlgmr.msra.gmra.mxu0 %vm505_vm2, %v6898_v20  ;;  %5035 = vmatmul.msk.bf16.vlgmr.msra.gmra.mxu1 %vm505_vm2, %v6898_v20  ;;  %v5126_v14 = vld [vmem:[%s9520_s0 + $0x2c0] sm:$0xf0]  ;;  %v5134_v18 = vld [vmem:[%s9520_s0 + $0x2c8] sm:$0xf0]  ;;  %v5334_v35 = vld [vmem:[%s9520_s0 + $0x450] sm:$0xf0] }
  0x43   :  { %732 = vmatpush.bf16.msrb.mxu0 %v550_v21  ;;  %746 = vmatpush.bf16.msrb.mxu1 %v553_v25  ;;  %v5393_v21 = vor.u32 %v6496_v6, %v5390_v7  ;;  %v4769_v25 = vor.u32 %v6358_v15, %v4766_v16  ;;  %v6506_v7 = vld [vmem:[%s9520_s0 + $0x4d4] sm:$0x30]  ;;  %v5132_v15 = vld [vmem:[%s9520_s0 + $0x288] sm:$0xf] }
  0x44   :  { %760 = vmatpush.bf16.msrb.mxu2 %v556_v28  ;;  %5037 = vmatmul.msk.bf16.vlgmr.msra.gmra.mxu3 %vm505_vm2, %v6898_v20  ;;  %v5316_v28 = vld [vmem:[%s9520_s0 + $0x400] sm:$0xf]  ;;  %v6440_v16 = vld [vmem:[%s9520_s0 + $0x2c4] sm:$0xf0] }
  0x45   :  { %774 = vmatpush.bf16.msrb.mxu3 %v559_v29  ;;  %5036 = vmatmul.msk.bf16.vlgmr.msra.gmra.mxu2 %vm505_vm2, %v6898_v20  ;;  %v6487_v29 = vld [vmem:[%s9520_s0 + $0x43c] sm:$0xf0]  ;;  %v1292_v31 = vand.u32 %v5393_v21, %v6755_v10 }
  0x46   :  { %v5317_v38 = vor.u32 %v6487_v29, %v5316_v28  ;;  %v1295_v28 = vand.u32 %v5397_v19, %v6755_v10 }
  0x47   :  { %733 = vmatpush.bf16.msrb.mxu0 %v4949_v36  ;;  %747 = vmatpush.bf16.msrb.mxu1 %v4953_v37  ;;  %v6480_v36 = vld [vmem:[%s9520_s0 + $0x40c] sm:$0xf] }
  0x48   :  { %761 = vmatpush.bf16.msrb.mxu2 %v4957_v40  ;;  %v5326_v37 = vld [vmem:[%s9520_s0 + $0x448] sm:$0xf0]  ;;  %v5252_v40 = vld [vmem:[%s9520_s0 + $0x380] sm:$0xf] }
  0x49   :  { %775 = vmatpush.bf16.msrb.mxu3 %v4961_v41  ;;  %v6471_v41 = vld [vmem:[%s9520_s0 + $0x3bc] sm:$0xf0]  ;;  %v5329_v43 = vor.u32 %v6480_v36, %v5326_v37  ;;  %v5340_v36 = vld [vmem:[%s9520_s0 + $0x418] sm:$0xf] }
  0x4a   :  { %v5253_v51 = vor.u32 %v6471_v41, %v5252_v40  ;;  %v6490_v37 = vld [vmem:[%s9520_s0 + $0x454] sm:$0xf0] }
  0x4b   :  { %734 = vmatpush.bf16.msrb.mxu0 %v4885_v49  ;;  %748 = vmatpush.bf16.msrb.mxu1 %v4889_v50  ;;  %v5262_v49 = vld [vmem:[%s9520_s0 + $0x3c8] sm:$0xf0]  ;;  %v5188_v50 = vld [vmem:[%s9520_s0 + $0x300] sm:$0xf] }
  0x4c   :  { %762 = vmatpush.bf16.msrb.mxu2 %v4893_v54  ;;  %v6447_v54 = vld [vmem:[%s9520_s0 + $0x304] sm:$0xf]  ;;  %v5265_v57 = vor.u32 %v6464_v48, %v5262_v49  ;;  %v5189_v5 = vor.u32 %v6455_v53, %v5188_v50 }
  0x4d   :  { %776 = vmatpush.bf16.msrb.mxu3 %v4897_v55  ;;  %v5190_v55 = vld [vmem:[%s9520_s0 + $0x340] sm:$0xf0] }
  0x4e   :  { %v5193_v6 = vor.u32 %v6447_v54, %v5190_v55 }
  0x4f   :  { %735 = vmatpush.bf16.msrb.mxu0 %v4821_v3  ;;  %749 = vmatpush.bf16.msrb.mxu1 %v4825_v4  ;;  %v5398_v3 = vld [vmem:[%s9520_s0 + $0x4d0] sm:$0x30]  ;;  %v5404_v4 = vld [vmem:[%s9520_s0 + $0x498] sm:$0xf] }
  0x50   :  { %763 = vmatpush.bf16.msrb.mxu2 %v4829_v8  ;;  %v6498_v8 = vld [vmem:[%s9520_s0 + $0x49c] sm:$0xf]  ;;  %v5401_v21 = vor.u32 %v6497_v2, %v5398_v3 }
  0x51   :  { %777 = vmatpush.bf16.msrb.mxu3 %v4833_v9  ;;  %v5406_v9 = vld [vmem:[%s9520_s0 + $0x4d8] sm:$0x30] }
  0x52   :  { %v1298_v29 = vand.u32 %v5401_v21, %v6755_v10 }
  0x53   :  { %736 = vmatpush.bf16.msrb.mxu0 %v4757_v22  ;;  %750 = vmatpush.bf16.msrb.mxu1 %v4761_v23  ;;  %v5405_v22 = vor.u32 %v6506_v7, %v5404_v4  ;;  %v5409_v23 = vor.u32 %v6498_v8, %v5406_v9 }
  0x54   :  { %764 = vmatpush.bf16.msrb.mxu2 %v4765_v24  ;;  %v5125_v24 = vor.u32 %v6439_v1, %v5124_v0 }
  0x55   :  { %778 = vmatpush.bf16.msrb.mxu3 %v4769_v25  ;;  %v5129_v25 = vor.u32 %v6431_v13, %v5126_v14  ;;  %v1301_v33 = vand.u32 %v5405_v22, %v6755_v10  ;;  %v1304_v34 = vand.u32 %v5409_v23, %v6755_v10 }
  0x56   :  { %5038 = vmatmul.msk.bf16.vlgmr.msrb.gmra.mxu0 %vm505_vm2, %v6898_v20  ;;  %5039 = vmatmul.msk.bf16.vlgmr.msrb.gmra.mxu1 %vm505_vm2, %v6898_v20 }
  0x57   :  { %1333 = vmatpush.bf16.msra.mxu0 %v1283_v26  ;;  %1347 = vmatpush.bf16.msra.mxu1 %v1286_v27  ;;  %v5133_v26 = vor.u32 %v6440_v16, %v5132_v15  ;;  %v5137_v27 = vor.u32 %v6432_v17, %v5134_v18 }
  0x58   :  { %1361 = vmatpush.bf16.msra.mxu2 %v1289_v30  ;;  %5041 = vmatmul.msk.bf16.vlgmr.msrb.gmra.mxu3 %vm505_vm2, %v6898_v20  ;;  %v5332_v30 = vld [vmem:[%s9520_s0 + $0x410] sm:$0xf] }
  0x59   :  { %1375 = vmatpush.bf16.msra.mxu3 %v1292_v31  ;;  %5040 = vmatmul.msk.bf16.vlgmr.msrb.gmra.mxu2 %vm505_vm2, %v6898_v20  ;;  %v6489_v31 = vld [vmem:[%s9520_s0 + $0x44c] sm:$0xf0] }
  0x5b   :  { %1334 = vmatpush.bf16.msra.mxu0 %v5317_v38  ;;  %1348 = vmatpush.bf16.msra.mxu1 %v5321_v39  ;;  %v6482_v38 = vld [vmem:[%s9520_s0 + $0x41c] sm:$0xf] }
  0x5c   :  { %1362 = vmatpush.bf16.msra.mxu2 %v5325_v42  ;;  %v5342_v39 = vld [vmem:[%s9520_s0 + $0x458] sm:$0xf0] }
  0x5d   :  { %1376 = vmatpush.bf16.msra.mxu3 %v5329_v43 }
  0x5f   :  { %1335 = vmatpush.bf16.msra.mxu0 %v5253_v51  ;;  %1349 = vmatpush.bf16.msra.mxu1 %v5257_v52 }
  0x60   :  { %1363 = vmatpush.bf16.msra.mxu2 %v5261_v56 }
  0x61   :  { %1377 = vmatpush.bf16.msra.mxu3 %v5265_v57 }
  0x63   :  { %1336 = vmatpush.bf16.msra.mxu0 %v5189_v5  ;;  %1350 = vmatpush.bf16.msra.mxu1 %v5193_v6 }
  0x64   :  { %1364 = vmatpush.bf16.msra.mxu2 %v5197_v11 }
  0x65   :  { %1378 = vmatpush.bf16.msra.mxu3 %v5201_v12 }
  0x67   :  { %1337 = vmatpush.bf16.msra.mxu0 %v5125_v24  ;;  %1351 = vmatpush.bf16.msra.mxu1 %v5129_v25 }
  0x68   :  { %10 = vsyncpa [#allocation4], 0  ;;  %1365 = vmatpush.bf16.msra.mxu2 %v5133_v26  ;;  %v5333_v40 = vor.u32 %v6489_v31, %v5332_v30  ;;  %v5337_v41 = vor.u32 %v6481_v32, %v5334_v35  ;;  %v5268_v42 = vld [vmem:[%s9520_s0 + $0x390] sm:$0xf]  ;;  %v5341_v44 = vor.u32 %v6490_v37, %v5340_v36  ;;  %v5345_v45 = vor.u32 %v6482_v38, %v5342_v39  ;;  %v6465_v46 = vld [vmem:[%s9520_s0 + $0x394] sm:$0xf] }
  0x69   :  { %1379 = vmatpush.bf16.msra.mxu3 %v5137_v27  ;;  %v6473_v43 = vld [vmem:[%s9520_s0 + $0x3cc] sm:$0xf0]  ;;  %v5270_v47 = vld [vmem:[%s9520_s0 + $0x3d0] sm:$0xf0]  ;;  %v5276_v48 = vld [vmem:[%s9520_s0 + $0x398] sm:$0xf] }
  0x6a   :  { %5442 = vmatmul.msk.bf16.vlgmr.msra.gmra.mxu0 %vm505_vm2, %v6898_v20  ;;  %5443 = vmatmul.msk.bf16.vlgmr.msra.gmra.mxu1 %vm505_vm2, %v6898_v20  ;;  %v6474_v49 = vld [vmem:[%s9520_s0 + $0x3d4] sm:$0xf0]  ;;  %v6466_v50 = vld [vmem:[%s9520_s0 + $0x39c] sm:$0xf]  ;;  %v5204_v52 = vld [vmem:[%s9520_s0 + $0x310] sm:$0xf]  ;;  %v5269_v53 = vor.u32 %v6473_v43, %v5268_v42  ;;  %v5273_v54 = vor.u32 %v6465_v46, %v5270_v47 }
  0x6b   :  { %1389 = vmatpush.bf16.msrb.mxu0 %v1295_v28  ;;  %1403 = vmatpush.bf16.msrb.mxu1 %v1298_v29  ;;  %v5278_v51 = vld [vmem:[%s9520_s0 + $0x3d8] sm:$0xf0]  ;;  %v6457_v55 = vld [vmem:[%s9520_s0 + $0x34c] sm:$0xf0]  ;;  %v6449_v56 = vld [vmem:[%s9520_s0 + $0x314] sm:$0xf]  ;;  %v5277_v58 = vor.u32 %v6474_v49, %v5276_v48 }
  0x6c   :  { %1417 = vmatpush.bf16.msrb.mxu2 %v1301_v33  ;;  %5445 = vmatmul.msk.bf16.vlgmr.msra.gmra.mxu3 %vm505_vm2, %v6898_v20  ;;  %v5206_v57 = vld [vmem:[%s9520_s0 + $0x350] sm:$0xf0]  ;;  %v5281_v59 = vor.u32 %v6466_v50, %v5278_v51  ;;  %v5212_v60 = vld [vmem:[%s9520_s0 + $0x318] sm:$0xf]  ;;  %v6450_v62 = vld [vmem:[%s9520_s0 + $0x31c] sm:$0xf]  ;;  %v5205_v7 = vor.u32 %v6457_v55, %v5204_v52 }
  0x6d   :  { %1431 = vmatpush.bf16.msrb.mxu3 %v1304_v34  ;;  %5444 = vmatmul.msk.bf16.vlgmr.msra.gmra.mxu2 %vm505_vm2, %v6898_v20  ;;  %v6458_v61 = vld [vmem:[%s9520_s0 + $0x354] sm:$0xf0]  ;;  %v5214_v63 = vld [vmem:[%s9520_s0 + $0x358] sm:$0xf0]  ;;  %v5412_v0 = vld [vmem:[%s9520_s0 + $0x4a0] sm:$0xf]  ;;  %v5209_v8 = vor.u32 %v6449_v56, %v5206_v57 }
  0x6e   :  { %v6507_v1 = vld [vmem:[%s9520_s0 + $0x4dc] sm:$0x30]  ;;  %v5140_v2 = vld [vmem:[%s9520_s0 + $0x290] sm:$0xf]  ;;  %v6499_v4 = vld [vmem:[%s9520_s0 + $0x4a4] sm:$0xf]  ;;  %v5213_v13 = vor.u32 %v6458_v61, %v5212_v60  ;;  %v5217_v14 = vor.u32 %v6450_v62, %v5214_v63 }
  0x6f   :  { %1390 = vmatpush.bf16.msrb.mxu0 %v5333_v40  ;;  %1404 = vmatpush.bf16.msrb.mxu1 %v5337_v41  ;;  %v6441_v3 = vld [vmem:[%s9520_s0 + $0x2cc] sm:$0xf0]  ;;  %v5414_v5 = vld [vmem:[%s9520_s0 + $0x4e0] sm:$0x30]  ;;  %v5420_v6 = vld [vmem:[%s9520_s0 + $0x4a8] sm:$0xf]  ;;  %v5413_v22 = vor.u32 %v6507_v1, %v5412_v0 }
  0x70   :  { %1418 = vmatpush.bf16.msrb.mxu2 %v5341_v44  ;;  %v6508_v9 = vld [vmem:[%s9520_s0 + $0x4e4] sm:$0x30]  ;;  %v6500_v11 = vld [vmem:[%s9520_s0 + $0x4ac] sm:$0xf]  ;;  %v6433_v15 = vld [vmem:[%s9520_s0 + $0x294] sm:$0xf]  ;;  %v5417_v23 = vor.u32 %v6499_v4, %v5414_v5  ;;  %v5141_v26 = vor.u32 %v6441_v3, %v5140_v2 }
  0x71   :  { %1432 = vmatpush.bf16.msrb.mxu3 %v5345_v45  ;;  %v5422_v12 = vld [vmem:[%s9520_s0 + $0x4e8] sm:$0x30]  ;;  %v5142_v16 = vld [vmem:[%s9520_s0 + $0x2d0] sm:$0xf0]  ;;  %v5148_v17 = vld [vmem:[%s9520_s0 + $0x298] sm:$0xf]  ;;  %v5421_v24 = vor.u32 %v6508_v9, %v5420_v6  ;;  %v1307_v30 = vand.u32 %v5413_v22, %v6755_v10 }
  0x72   :  { %v6442_v18 = vld [vmem:[%s9520_s0 + $0x2d4] sm:$0xf0]  ;;  %v6434_v19 = vld [vmem:[%s9520_s0 + $0x29c] sm:$0xf]  ;;  %v5425_v25 = vor.u32 %v6500_v11, %v5422_v12  ;;  %v5145_v27 = vor.u32 %v6433_v15, %v5142_v16  ;;  %v1310_v31 = vand.u32 %v5417_v23, %v6755_v10  ;;  %v5348_v32 = vld [vmem:[%s9520_s0 + $0x420] sm:$0xf] }
  0x73   :  { %1391 = vmatpush.bf16.msrb.mxu0 %v5269_v53  ;;  %1405 = vmatpush.bf16.msrb.mxu1 %v5273_v54  ;;  %v5150_v21 = vld [vmem:[%s9520_s0 + $0x2d8] sm:$0xf0]  ;;  %v5149_v28 = vor.u32 %v6442_v18, %v5148_v17  ;;  %v6491_v33 = vld [vmem:[%s9520_s0 + $0x45c] sm:$0xf0]  ;;  %v1313_v34 = vand.u32 %v5421_v24, %v6755_v10  ;;  %v6483_v36 = vld [vmem:[%s9520_s0 + $0x424] sm:$0xf] }
  0x74   :  { %1419 = vmatpush.bf16.msrb.mxu2 %v5277_v58  ;;  %v5153_v29 = vor.u32 %v6434_v19, %v5150_v21  ;;  %v1316_v35 = vand.u32 %v5425_v25, %v6755_v10  ;;  %v5350_v37 = vld [vmem:[%s9520_s0 + $0x460] sm:$0xf0]  ;;  %v5356_v38 = vld [vmem:[%s9520_s0 + $0x428] sm:$0xf]  ;;  %v6484_v40 = vld [vmem:[%s9520_s0 + $0x42c] sm:$0xf]  ;;  %v5349_v42 = vor.u32 %v6491_v33, %v5348_v32 }
  0x75   :  { %1433 = vmatpush.bf16.msrb.mxu3 %v5281_v59  ;;  %v6492_v39 = vld [vmem:[%s9520_s0 + $0x464] sm:$0xf0]  ;;  %v5358_v41 = vld [vmem:[%s9520_s0 + $0x468] sm:$0xf0]  ;;  %v5353_v43 = vor.u32 %v6483_v36, %v5350_v37  ;;  %v5284_v44 = vld [vmem:[%s9520_s0 + $0x3a0] sm:$0xf] }
  0x76   :  { %v6475_v45 = vld [vmem:[%s9520_s0 + $0x3dc] sm:$0xf0]  ;;  %v5357_v46 = vor.u32 %v6492_v39, %v5356_v38  ;;  %v5361_v47 = vor.u32 %v6484_v40, %v5358_v41  ;;  %v6467_v48 = vld [vmem:[%s9520_s0 + $0x3a4] sm:$0xf]  ;;  %v5292_v50 = vld [vmem:[%s9520_s0 + $0x3a8] sm:$0xf] }
  0x77   :  { %1392 = vmatpush.bf16.msrb.mxu0 %v5205_v7  ;;  %1406 = vmatpush.bf16.msrb.mxu1 %v5209_v8  ;;  %v5286_v49 = vld [vmem:[%s9520_s0 + $0x3e0] sm:$0xf0]  ;;  %v6476_v51 = vld [vmem:[%s9520_s0 + $0x3e4] sm:$0xf0]  ;;  %v6468_v52 = vld [vmem:[%s9520_s0 + $0x3ac] sm:$0xf]  ;;  %v5285_v55 = vor.u32 %v6475_v45, %v5284_v44 }
  0x78   :  { %1420 = vmatpush.bf16.msrb.mxu2 %v5213_v13  ;;  %v5294_v53 = vld [vmem:[%s9520_s0 + $0x3e8] sm:$0xf0]  ;;  %v5220_v54 = vld [vmem:[%s9520_s0 + $0x320] sm:$0xf]  ;;  %v5289_v56 = vor.u32 %v6467_v48, %v5286_v49  ;;  %v6451_v58 = vld [vmem:[%s9520_s0 + $0x324] sm:$0xf]  ;;  %v5293_v59 = vor.u32 %v6476_v51, %v5292_v50 }
  0x79   :  { %1434 = vmatpush.bf16.msrb.mxu3 %v5217_v14  ;;  %v6459_v57 = vld [vmem:[%s9520_s0 + $0x35c] sm:$0xf0]  ;;  %v5297_v60 = vor.u32 %v6468_v52, %v5294_v53  ;;  %v5228_v61 = vld [vmem:[%s9520_s0 + $0x328] sm:$0xf]  ;;  %v6452_v63 = vld [vmem:[%s9520_s0 + $0x32c] sm:$0xf] }
  0x7a   :  { %v6460_v62 = vld [vmem:[%s9520_s0 + $0x364] sm:$0xf0]  ;;  %v5230_v0 = vld [vmem:[%s9520_s0 + $0x368] sm:$0xf0]  ;;  %v5428_v1 = vld [vmem:[%s9520_s0 + $0x4b0] sm:$0xf]  ;;  %v5221_v8 = vor.u32 %v6459_v57, %v5220_v54 }
  0x7b   :  { %1393 = vmatpush.bf16.msrb.mxu0 %v5141_v26  ;;  %1407 = vmatpush.bf16.msrb.mxu1 %v5145_v27  ;;  %v6509_v2 = vld [vmem:[%s9520_s0 + $0x4ec] sm:$0x30]  ;;  %v5156_v3 = vld [vmem:[%s9520_s0 + $0x2a0] sm:$0xf]  ;;  %v6501_v5 = vld [vmem:[%s9520_s0 + $0x4b4] sm:$0xf]  ;;  %v5229_v14 = vor.u32 %v6460_v62, %v5228_v61  ;;  %v5233_v15 = vor.u32 %v6452_v63, %v5230_v0 }
  0x7c   :  { %1421 = vmatpush.bf16.msrb.mxu2 %v5149_v28  ;;  %v6443_v4 = vld [vmem:[%s9520_s0 + $0x2dc] sm:$0xf0]  ;;  %v5430_v6 = vld [vmem:[%s9520_s0 + $0x4f0] sm:$0x30]  ;;  %v5436_v7 = vld [vmem:[%s9520_s0 + $0x4b8] sm:$0xf]  ;;  %v5429_v23 = vor.u32 %v6509_v2, %v5428_v1 }
  0x7d   :  { %1435 = vmatpush.bf16.msrb.mxu3 %v5153_v29  ;;  %v6510_v11 = vld [vmem:[%s9520_s0 + $0x4f4] sm:$0x30]  ;;  %v6502_v12 = vld [vmem:[%s9520_s0 + $0x4bc] sm:$0xf]  ;;  %v6435_v16 = vld [vmem:[%s9520_s0 + $0x2a4] sm:$0xf]  ;;  %v5433_v24 = vor.u32 %v6501_v5, %v5430_v6  ;;  %v5157_v27 = vor.u32 %v6443_v4, %v5156_v3 }
  0x7e   :  { %5446 = vmatmul.msk.bf16.vlgmr.msrb.gmra.mxu0 %vm505_vm2, %v6898_v20  ;;  %5447 = vmatmul.msk.bf16.vlgmr.msrb.gmra.mxu1 %vm505_vm2, %v6898_v20  ;;  %v5438_v13 = vld [vmem:[%s9520_s0 + $0x4f8] sm:$0x30]  ;;  %v5158_v17 = vld [vmem:[%s9520_s0 + $0x2e0] sm:$0xf0]  ;;  %v5164_v18 = vld [vmem:[%s9520_s0 + $0x2a8] sm:$0xf]  ;;  %v5437_v25 = vor.u32 %v6510_v11, %v5436_v7 }
  0x7f   :  { %1445 = vmatpush.bf16.msra.mxu0 %v1307_v30  ;;  %1459 = vmatpush.bf16.msra.mxu1 %v1310_v31  ;;  %v6444_v19 = vld [vmem:[%s9520_s0 + $0x2e4] sm:$0xf0]  ;;  %v6436_v21 = vld [vmem:[%s9520_s0 + $0x2ac] sm:$0xf]  ;;  %v5441_v26 = vor.u32 %v6502_v12, %v5438_v13  ;;  %v5161_v28 = vor.u32 %v6435_v16, %v5158_v17  ;;  %v1319_v31 = vand.u32 %v5429_v23, %v6755_v10  ;;  %v5364_v33 = vld [vmem:[%s9520_s0 + $0x430] sm:$0xf] }
  0x80   :  { %1473 = vmatpush.bf16.msra.mxu2 %v1313_v34  ;;  %5449 = vmatmul.msk.bf16.vlgmr.msrb.gmra.mxu3 %vm505_vm2, %v6898_v20  ;;  %v5166_v22 = vld [vmem:[%s9520_s0 + $0x2e8] sm:$0xf0]  ;;  %v5165_v29 = vor.u32 %v6444_v19, %v5164_v18  ;;  %v1322_v32 = vand.u32 %v5433_v24, %v6755_v10  ;;  %v6493_v34 = vld [vmem:[%s9520_s0 + $0x46c] sm:$0xf0]  ;;  %v6485_v37 = vld [vmem:[%s9520_s0 + $0x434] sm:$0xf] }
  0x81   :  { %1487 = vmatpush.bf16.msra.mxu3 %v1316_v35  ;;  %5448 = vmatmul.msk.bf16.vlgmr.msrb.gmra.mxu2 %vm505_vm2, %v6898_v20  ;;  %v5222_v20 = vld [vmem:[%s9520_s0 + $0x360] sm:$0xf0]  ;;  %v5169_v30 = vor.u32 %v6436_v21, %v5166_v22  ;;  %v1325_v35 = vand.u32 %v5437_v25, %v6755_v10  ;;  %v1328_v36 = vand.u32 %v5441_v26, %v6755_v10  ;;  %v5366_v38 = vld [vmem:[%s9520_s0 + $0x470] sm:$0xf0]  ;;  %v5372_v39 = vld [vmem:[%s9520_s0 + $0x438] sm:$0xf] }
  0x82   :  { %v5225_v9 = vor.u32 %v6451_v58, %v5222_v20  ;;  %v6494_v40 = vld [vmem:[%s9520_s0 + $0x474] sm:$0xf0]  ;;  %v6486_v41 = vld [vmem:[%s9520_s0 + $0x43c] sm:$0xf]  ;;  %v5369_v44 = vor.u32 %v6485_v37, %v5366_v38  ;;  %v5300_v45 = vld [vmem:[%s9520_s0 + $0x3b0] sm:$0xf] }
  0x83   :  { %1446 = vmatpush.bf16.msra.mxu0 %v5349_v42  ;;  %1460 = vmatpush.bf16.msra.mxu1 %v5353_v43  ;;  %v5374_v42 = vld [vmem:[%s9520_s0 + $0x478] sm:$0xf0]  ;;  %v5365_v43 = vor.u32 %v6493_v34, %v5364_v33  ;;  %v6469_v49 = vld [vmem:[%s9520_s0 + $0x3b4] sm:$0xf]  ;;  %v5308_v51 = vld [vmem:[%s9520_s0 + $0x3b8] sm:$0xf] }
  0x84   :  { %1474 = vmatpush.bf16.msra.mxu2 %v5357_v46  ;;  %v6477_v46 = vld [vmem:[%s9520_s0 + $0x3ec] sm:$0xf0]  ;;  %v5377_v48 = vor.u32 %v6486_v41, %v5374_v42  ;;  %v5302_v50 = vld [vmem:[%s9520_s0 + $0x3f0] sm:$0xf0]  ;;  %v7736_v52 = vld [vmem:[%s9521_s1] sm:$0xff]  ;;  %s6706_s24 = smov [#allocation3]  }
  0x85   :  { %1488 = vmatpush.bf16.msra.mxu3 %v5361_v47  ;;  %v5373_v47 = vor.u32 %v6494_v40, %v5372_v39  ;;  %v6478_v53 = vld [vmem:[%s9520_s0 + $0x3f4] sm:$0xf0]  ;;  %v6470_v54 = vld [vmem:[%s9520_s0 + $0x3bc] sm:$0xf]  ;;  %v5301_v57 = vor.u32 %v6477_v46, %v5300_v45  ;;  %v5305_v58 = vor.u32 %v6469_v49, %v5302_v50  ;;  %v6461_v20 = vld [vmem:[%s9520_s0 + $0x36c] sm:$0xf0] }
  0x86   :  { %v5309_v61 = vor.u32 %v6478_v53, %v5308_v51  ;;  %v5244_v63 = vld [vmem:[%s9520_s0 + $0x338] sm:$0xf]  ;;  %v6454_v1 = vld [vmem:[%s9520_s0 + $0x33c] sm:$0xf]  ;;  %v5796_v3 = vld [vmem:[%s9520_s0 + $0x700] sm:$0xf] }
  0x87   :  { %1447 = vmatpush.bf16.msra.mxu0 %v5285_v55  ;;  %1461 = vmatpush.bf16.msra.mxu1 %v5289_v56  ;;  %v5310_v55 = vld [vmem:[%s9520_s0 + $0x3f8] sm:$0xf0]  ;;  %v5236_v56 = vld [vmem:[%s9520_s0 + $0x330] sm:$0xf]  ;;  %v6462_v0 = vld [vmem:[%s9520_s0 + $0x374] sm:$0xf0] }
  0x88   :  { %1475 = vmatpush.bf16.msra.mxu2 %v5293_v59  ;;  %v6453_v59 = vld [vmem:[%s9520_s0 + $0x334] sm:$0xf]  ;;  %v5313_v62 = vor.u32 %v6470_v54, %v5310_v55  ;;  %v5246_v2 = vld [vmem:[%s9520_s0 + $0x378] sm:$0xf0]  ;;  %v6583_v4 = vld [vmem:[%s9520_s0 + $0x73c] sm:$0x30]  ;;  %v5237_v11 = vor.u32 %v6461_v20, %v5236_v56  ;;  %v5245_v16 = vor.u32 %v6462_v0, %v5244_v63 }
  0x89   :  { %1489 = vmatpush.bf16.msra.mxu3 %v5297_v60  ;;  %v5238_v60 = vld [vmem:[%s9520_s0 + $0x370] sm:$0xf0]  ;;  %v5172_v5 = vld [vmem:[%s9520_s0 + $0x2b0] sm:$0xf]  ;;  %v6575_v7 = vld [vmem:[%s9520_s0 + $0x704] sm:$0xf]  ;;  %v5249_v17 = vor.u32 %v6454_v1, %v5246_v2  ;;  %v5797_v25 = vor.u32 %v6583_v4, %v5796_v3 }
  0x8a   :  { %v6445_v6 = vld [vmem:[%s9520_s0 + $0x2ec] sm:$0xf0]  ;;  %v5241_v12 = vor.u32 %v6453_v59, %v5238_v60  ;;  %v6584_v13 = vld [vmem:[%s9520_s0 + $0x744] sm:$0x30]  ;;  %v6437_v18 = vld [vmem:[%s9520_s0 + $0x2b4] sm:$0xf] }
  0x8b   :  { %1448 = vmatpush.bf16.msra.mxu0 %v5221_v8  ;;  %1462 = vmatpush.bf16.msra.mxu1 %v5225_v9  ;;  %v5798_v8 = vld [vmem:[%s9520_s0 + $0x740] sm:$0x30]  ;;  %v5804_v9 = vld [vmem:[%s9520_s0 + $0x708] sm:$0xf]  ;;  %v5174_v19 = vld [vmem:[%s9520_s0 + $0x2f0] sm:$0xf0]  ;;  %v2084_v33 = vand.u32 %v5797_v25, %v6755_v10 }
  0x8c   :  { %1476 = vmatpush.bf16.msra.mxu2 %v5229_v14  ;;  %v6576_v14 = vld [vmem:[%s9520_s0 + $0x70c] sm:$0xf]  ;;  %v5180_v21 = vld [vmem:[%s9520_s0 + $0x2b8] sm:$0xf]  ;;  %v6438_v23 = vld [vmem:[%s9520_s0 + $0x2bc] sm:$0xf]  ;;  %v5801_v26 = vor.u32 %v6575_v7, %v5798_v8 }
  0x8d   :  { %1490 = vmatpush.bf16.msra.mxu3 %v5233_v15  ;;  %v5806_v15 = vld [vmem:[%s9520_s0 + $0x748] sm:$0x30]  ;;  %v6446_v22 = vld [vmem:[%s9520_s0 + $0x2f4] sm:$0xf0]  ;;  %v5182_v24 = vld [vmem:[%s9520_s0 + $0x2f8] sm:$0xf0] }
  0x8e   :  { %v2087_v34 = vand.u32 %v5801_v26, %v6755_v10  ;;  %v6559_v39 = vld [vmem:[%s9520_s0 + $0x684] sm:$0xf]  ;;  %v5740_v41 = vld [vmem:[%s9520_s0 + $0x688] sm:$0xf]  ;;  %v6544_v56 = vld [vmem:[%s9520_s0 + $0x60c] sm:$0xf] }
  0x8f   :  { %1449 = vmatpush.bf16.msra.mxu0 %v5157_v27  ;;  %1463 = vmatpush.bf16.msra.mxu1 %v5161_v28  ;;  %v5805_v27 = vor.u32 %v6584_v13, %v5804_v9  ;;  %v5809_v28 = vor.u32 %v6576_v14, %v5806_v15  ;;  %v5734_v40 = vld [vmem:[%s9520_s0 + $0x6c0] sm:$0xf0]  ;;  %v6568_v42 = vld [vmem:[%s9520_s0 + $0x6c4] sm:$0xf0]  ;;  %v5604_v59 = vld [vmem:[%s9520_s0 + $0x580] sm:$0xf] }
  0x90   :  { %1477 = vmatpush.bf16.msra.mxu2 %v5165_v29  ;;  %v5173_v29 = vor.u32 %v6445_v6, %v5172_v5  ;;  %v5737_v46 = vor.u32 %v6559_v39, %v5734_v40  ;;  %v5741_v49 = vor.u32 %v6568_v42, %v5740_v41  ;;  %v6543_v51 = vld [vmem:[%s9520_s0 + $0x604] sm:$0xf]  ;;  %v5676_v54 = vld [vmem:[%s9520_s0 + $0x608] sm:$0xf]  ;;  %v6528_v5 = vld [vmem:[%s9520_s0 + $0x58c] sm:$0xf] }
  0x91   :  { %1491 = vmatpush.bf16.msra.mxu3 %v5169_v30  ;;  %v5177_v30 = vor.u32 %v6437_v18, %v5174_v19  ;;  %v2090_v37 = vand.u32 %v5805_v27, %v6755_v10  ;;  %v2093_v38 = vand.u32 %v5809_v28, %v6755_v10  ;;  %v5670_v53 = vld [vmem:[%s9520_s0 + $0x640] sm:$0xf0]  ;;  %v6552_v55 = vld [vmem:[%s9520_s0 + $0x644] sm:$0xf0]  ;;  %v5614_v6 = vld [vmem:[%s9520_s0 + $0x5c8] sm:$0xf0] }
  0x92   :  { %5450 = vmatmul.msk.bf16.vlgmr.msra.gmra.mxu0 %vm505_vm2, %v7736_v52  ;;  %5451 = vmatmul.msk.bf16.vlgmr.msra.gmra.mxu1 %vm505_vm2, %v7736_v52  ;;  %v6527_v63 = vld [vmem:[%s9520_s0 + $0x584] sm:$0xf]  ;;  %v5677_v1 = vor.u32 %v6552_v55, %v5676_v54  ;;  %v5612_v3 = vld [vmem:[%s9520_s0 + $0x588] sm:$0xf]  ;;  %v5812_v7 = vld [vmem:[%s9520_s0 + $0x710] sm:$0xf] }
  0x93   :  { %1501 = vmatpush.bf16.msrb.mxu0 %v1319_v31  ;;  %1515 = vmatpush.bf16.msrb.mxu1 %v1322_v32  ;;  %v5181_v31 = vor.u32 %v6446_v22, %v5180_v21  ;;  %v5185_v32 = vor.u32 %v6438_v23, %v5182_v24  ;;  %v5606_v0 = vld [vmem:[%s9520_s0 + $0x5c0] sm:$0xf0]  ;;  %v6536_v4 = vld [vmem:[%s9520_s0 + $0x5c4] sm:$0xf0]  ;;  %v6585_v8 = vld [vmem:[%s9520_s0 + $0x74c] sm:$0x30]  ;;  %v5617_v22 = vor.u32 %v6528_v5, %v5614_v6 }
  0x94   :  { %1529 = vmatpush.bf16.msrb.mxu2 %v1325_v35  ;;  %5453 = vmatmul.msk.bf16.vlgmr.msra.gmra.mxu3 %vm505_vm2, %v7736_v52  ;;  %v5732_v35 = vld [vmem:[%s9520_s0 + $0x680] sm:$0xf]  ;;  %v5814_v13 = vld [vmem:[%s9520_s0 + $0x750] sm:$0x30]  ;;  %v5820_v14 = vld [vmem:[%s9520_s0 + $0x718] sm:$0xf]  ;;  %v5613_v21 = vor.u32 %v6536_v4, %v5612_v3 }
  0x95   :  { %1543 = vmatpush.bf16.msrb.mxu3 %v1328_v36  ;;  %5452 = vmatmul.msk.bf16.vlgmr.msra.gmra.mxu2 %vm505_vm2, %v7736_v52  ;;  %v6567_v36 = vld [vmem:[%s9520_s0 + $0x6bc] sm:$0xf0]  ;;  %v6578_v18 = vld [vmem:[%s9520_s0 + $0x71c] sm:$0xf]  ;;  %v6511_v23 = vld [vmem:[%s9520_s0 + $0x504] sm:$0xf] }
  0x96   :  { %v5733_v45 = vor.u32 %v6567_v36, %v5732_v35  ;;  %v5540_v9 = vld [vmem:[%s9520_s0 + $0x500] sm:$0xf]  ;;  %v5822_v19 = vld [vmem:[%s9520_s0 + $0x758] sm:$0x30]  ;;  %v5542_v24 = vld [vmem:[%s9520_s0 + $0x540] sm:$0xf0] }
  0x97   :  { %1502 = vmatpush.bf16.msrb.mxu0 %v5365_v43  ;;  %1516 = vmatpush.bf16.msrb.mxu1 %v5369_v44  ;;  %v6560_v43 = vld [vmem:[%s9520_s0 + $0x68c] sm:$0xf]  ;;  %v7885_v20 = vpop.f32.mrf.mxu1  ;;  %v5548_v25 = vld [vmem:[%s9520_s0 + $0x508] sm:$0xf]  ;;  %v5825_v35 = vor.u32 %v6578_v18, %v5822_v19  ;;  %v6554_v3 = vld [vmem:[%s9520_s0 + $0x654] sm:$0xf0] }
  0x98   :  { %1530 = vmatpush.bf16.msrb.mxu2 %v5373_v47  ;;  %v5742_v44 = vld [vmem:[%s9520_s0 + $0x6c8] sm:$0xf0]  ;;  %v5668_v47 = vld [vmem:[%s9520_s0 + $0x600] sm:$0xf]  ;;  %v6520_v27 = vld [vmem:[%s9520_s0 + $0x544] sm:$0xf0] }
  0x99   :  { %1544 = vmatpush.bf16.msrb.mxu3 %v5377_v48  ;;  %v6551_v48 = vld [vmem:[%s9520_s0 + $0x63c] sm:$0xf0]  ;;  %v5745_v50 = vor.u32 %v6560_v43, %v5742_v44  ;;  %v6512_v28 = vld [vmem:[%s9520_s0 + $0x50c] sm:$0xf]  ;;  %v5549_v39 = vor.u32 %v6520_v27, %v5548_v25  ;;  %v5748_v43 = vld [vmem:[%s9520_s0 + $0x690] sm:$0xf] }
  0x9a   :  { %v5669_v60 = vor.u32 %v6551_v48, %v5668_v47  ;;  %v6569_v44 = vld [vmem:[%s9520_s0 + $0x6cc] sm:$0xf0]  ;;  %v6561_v47 = vld [vmem:[%s9520_s0 + $0x694] sm:$0xf]  ;;  %v6546_v4 = vld [vmem:[%s9520_s0 + $0x61c] sm:$0xf] }
  0x9b   :  { %1503 = vmatpush.bf16.msrb.mxu0 %v5301_v57  ;;  %1517 = vmatpush.bf16.msrb.mxu1 %v5305_v58  ;;  %v5678_v57 = vld [vmem:[%s9520_s0 + $0x648] sm:$0xf0]  ;;  %v7883_v58 = vpop.f32.mrf.mxu0  ;;  %v5750_v48 = vld [vmem:[%s9520_s0 + $0x6d0] sm:$0xf0]  ;;  %v5749_v55 = vor.u32 %v6569_v44, %v5748_v43  ;;  %v5694_v5 = vld [vmem:[%s9520_s0 + $0x658] sm:$0xf0] }
  0x9c   :  { %1531 = vmatpush.bf16.msrb.mxu2 %v5309_v61  ;;  %v5673_v61 = vor.u32 %v6543_v51, %v5670_v53  ;;  %v5681_v2 = vor.u32 %v6544_v56, %v5678_v57  ;;  %v6562_v51 = vld [vmem:[%s9520_s0 + $0x69c] sm:$0xf]  ;;  %v5753_v56 = vor.u32 %v6561_v47, %v5750_v48  ;;  %v5684_v57 = vld [vmem:[%s9520_s0 + $0x610] sm:$0xf]  ;;  %v6579_v25 = vld [vmem:[%s9520_s0 + $0x724] sm:$0xf] }
  0x9d   :  { %1545 = vmatpush.bf16.msrb.mxu3 %v5313_v62  ;;  %v6535_v62 = vld [vmem:[%s9520_s0 + $0x5bc] sm:$0xf0]  ;;  %v5758_v53 = vld [vmem:[%s9520_s0 + $0x6d8] sm:$0xf0]  ;;  %v5830_v27 = vld [vmem:[%s9520_s0 + $0x760] sm:$0x30] }
  0x9e   :  { %v5605_v15 = vor.u32 %v6535_v62, %v5604_v59  ;;  %v6553_v59 = vld [vmem:[%s9520_s0 + $0x64c] sm:$0xf0]  ;;  %v5761_v62 = vor.u32 %v6562_v51, %v5758_v53  ;;  %v6530_v18 = vld [vmem:[%s9520_s0 + $0x59c] sm:$0xf]  ;;  %v6522_v44 = vld [vmem:[%s9520_s0 + $0x554] sm:$0xf0]  ;;  %v5833_v48 = vor.u32 %v6579_v25, %v5830_v27 }
  0x9f   :  { %1504 = vmatpush.bf16.msrb.mxu0 %v5237_v11  ;;  %1518 = vmatpush.bf16.msrb.mxu1 %v5241_v12  ;;  %v6519_v11 = vld [vmem:[%s9520_s0 + $0x53c] sm:$0xf0]  ;;  %v6577_v12 = vld [vmem:[%s9520_s0 + $0x714] sm:$0xf]  ;;  %v7969_v36 = vpop.f32.mrf.mxu1  ;;  %v5630_v19 = vld [vmem:[%s9520_s0 + $0x5d8] sm:$0xf0] }
  0xa0   :  { %1532 = vmatpush.bf16.msrb.mxu2 %v5245_v16  ;;  %v5609_v16 = vor.u32 %v6527_v63, %v5606_v0  ;;  %v7954_v26 = vpop.f32.mrf.mxu2  ;;  %v6545_v63 = vld [vmem:[%s9520_s0 + $0x614] sm:$0xf]  ;;  %v6556_v27 = vld [vmem:[%s9520_s0 + $0x664] sm:$0xf0]  ;;  %s4691_s25 = sshll.u32 %s6706_s24, 4  ;;  %s4693_s28 = sshll.u32 %s9525_s5, 4  ;;  %s4692_s25 = int_to_ptr.vmem [resolvable:$true] %s4691_s25  ;;  %s4694_s28 = int_to_ptr.hbm [resolvable:$true] %s4693_s28 }
  0xa1   :  { %1546 = vmatpush.bf16.msrb.mxu3 %v5249_v17  ;;  %v6586_v17 = vld [vmem:[%s9520_s0 + $0x754] sm:$0x30]  ;;  %v5686_v0 = vld [vmem:[%s9520_s0 + $0x650] sm:$0xf0]  ;;  %vm4684_vm3 = vcmask 80896  }
  0xa3   :  { %1505 = vmatpush.bf16.msrb.mxu0 %v5173_v29  ;;  %1519 = vmatpush.bf16.msrb.mxu1 %v5177_v30  ;;  %v5550_v29 = vld [vmem:[%s9520_s0 + $0x548] sm:$0xf0]  ;;  %v5813_v30 = vor.u32 %v6585_v8, %v5812_v7  ;;  %v5620_v7 = vld [vmem:[%s9520_s0 + $0x590] sm:$0xf]  ;;  %v5685_v8 = vor.u32 %v6553_v59, %v5684_v57 }
  0xa4   :  { %1533 = vmatpush.bf16.msrb.mxu2 %v5181_v31  ;;  %v5817_v31 = vor.u32 %v6577_v12, %v5814_v13  ;;  %v5553_v40 = vor.u32 %v6512_v28, %v5550_v29  ;;  %v6529_v12 = vld [vmem:[%s9520_s0 + $0x594] sm:$0xf]  ;;  %v5836_v28 = vld [vmem:[%s9520_s0 + $0x728] sm:$0xf] }
  0xa5   :  { %1547 = vmatpush.bf16.msrb.mxu3 %v5185_v32  ;;  %v7965_v32 = vpop.f32.mrf.mxu3  ;;  %v2096_v41 = vand.u32 %v5813_v30, %v6755_v10  ;;  %v5622_v13 = vld [vmem:[%s9520_s0 + $0x5d0] sm:$0xf0] }
  0xa6   :  { %5454 = vmatmul.msk.bf16.vlgmr.msrb.gmra.mxu0 %vm505_vm2, %v7736_v52  ;;  %5455 = vmatmul.msk.bf16.vlgmr.msrb.gmra.mxu1 %vm505_vm2, %v7736_v52  ;;  %v2099_v42 = vand.u32 %v5817_v31, %v6755_v10  ;;  %v5625_v30 = vor.u32 %v6529_v12, %v5622_v13  ;;  %v6588_v31 = vld [vmem:[%s9520_s0 + $0x764] sm:$0x30] }
  0xa7   :  { %2134 = vmatpush.bf16.msra.mxu0 %v2084_v33  ;;  %2148 = vmatpush.bf16.msra.mxu1 %v2087_v34  ;;  %v7967_v33 = vpop.f32.mrf.mxu0  ;;  %v5821_v34 = vor.u32 %v6586_v17, %v5820_v14  ;;  %v6538_v17 = vld [vmem:[%s9520_s0 + $0x5d4] sm:$0xf0]  ;;  %v5837_v51 = vor.u32 %v6588_v31, %v5836_v28  ;;  %v6548_v28 = vld [vmem:[%s9520_s0 + $0x62c] sm:$0xf] }
  0xa8   :  { %2162 = vmatpush.bf16.msra.mxu2 %v2090_v37  ;;  %5457 = vmatmul.msk.bf16.vlgmr.msrb.gmra.mxu3 %vm505_vm2, %v7736_v52  ;;  %v5541_v37 = vor.u32 %v6519_v11, %v5540_v9  ;;  %v7999_v54 = vpop.f32.mrf.mxu2  ;;  %v5689_v9 = vor.u32 %v6545_v63, %v5686_v0  ;;  %v6537_v11 = vld [vmem:[%s9520_s0 + $0x5cc] sm:$0xf0]  ;;  %v5764_v63 = vld [vmem:[%s9520_s0 + $0x6a0] sm:$0xf] }
  0xa9   :  { %2176 = vmatpush.bf16.msra.mxu3 %v2093_v38  ;;  %5456 = vmatmul.msk.bf16.vlgmr.msrb.gmra.mxu2 %vm505_vm2, %v7736_v52  ;;  %v5545_v38 = vor.u32 %v6511_v23, %v5542_v24  ;;  %9526 = vst [vmem:[#allocation6_spill] sm:$0xff] %v7999_v54  ;;  %v5556_v23 = vld [vmem:[%s9520_s0 + $0x510] sm:$0xf]  ;;  %v5621_v29 = vor.u32 %v6537_v11, %v5620_v7  ;;  %v6571_v0 = vld [vmem:[%s9520_s0 + $0x6dc] sm:$0xf0] }
  0xaa   :  { %v6521_v24 = vld [vmem:[%s9520_s0 + $0x54c] sm:$0xf0]  ;;  %v5772_v7 = vld [vmem:[%s9520_s0 + $0x6a8] sm:$0xf]  ;;  %v5774_v11 = vld [vmem:[%s9520_s0 + $0x6e8] sm:$0xf0] }
  0xab   :  { %2135 = vmatpush.bf16.msra.mxu0 %v5733_v45  ;;  %2149 = vmatpush.bf16.msra.mxu1 %v5737_v46  ;;  %v2102_v45 = vand.u32 %v5821_v34, %v6755_v10  ;;  %v2105_v46 = vand.u32 %v5825_v35, %v6755_v10  ;;  %v8033_v6 = vpop.f32.mrf.mxu1  ;;  %v6580_v34 = vld [vmem:[%s9520_s0 + $0x72c] sm:$0xf] }
  0xac   :  { %2163 = vmatpush.bf16.msra.mxu2 %v5741_v49  ;;  %v5756_v49 = vld [vmem:[%s9520_s0 + $0x698] sm:$0xf]  ;;  %v5838_v35 = vld [vmem:[%s9520_s0 + $0x768] sm:$0x30] }
  0xad   :  { %2177 = vmatpush.bf16.msra.mxu3 %v5745_v50  ;;  %v6570_v50 = vld [vmem:[%s9520_s0 + $0x6d4] sm:$0xf0]  ;;  %v5841_v53 = vor.u32 %v6580_v34, %v5838_v35  ;;  %v6539_v35 = vld [vmem:[%s9520_s0 + $0x5dc] sm:$0xf0] }
  0xaf   :  { %2136 = vmatpush.bf16.msra.mxu0 %v5669_v60  ;;  %2150 = vmatpush.bf16.msra.mxu1 %v5673_v61  ;;  %v8007_v60 = vpop.f32.mrf.mxu3  ;;  %v5757_v61 = vor.u32 %v6570_v50, %v5756_v49 }
  0xb0   :  { %2164 = vmatpush.bf16.msra.mxu2 %v5677_v1  ;;  %9527 = vst [vmem:[#allocation7_spill] sm:$0xff] %v8007_v60  ;;  %v5692_v1 = vld [vmem:[%s9520_s0 + $0x618] sm:$0xf]  ;;  %v6180_v60 = vld [vmem:[%s9520_s0 + $0x920] sm:$0xf] }
  0xb1   :  { %2178 = vmatpush.bf16.msra.mxu3 %v5681_v2  ;;  %v8018_v2 = vpop.f32.mrf.mxu0  ;;  %v5693_v14 = vor.u32 %v6554_v3, %v5692_v1  ;;  %v2114_v1 = vand.u32 %v5837_v51, %v6755_v10  ;;  %v2117_v3 = vand.u32 %v5841_v53, %v6755_v10  ;;  %v5572_v51 = vld [vmem:[%s9520_s0 + $0x520] sm:$0xf] }
  0xb2   :  { %v6523_v53 = vld [vmem:[%s9520_s0 + $0x55c] sm:$0xf0] }
  0xb3   :  { %2137 = vmatpush.bf16.msra.mxu0 %v5605_v15  ;;  %2151 = vmatpush.bf16.msra.mxu1 %v5609_v16  ;;  %v5697_v15 = vor.u32 %v6546_v4, %v5694_v5  ;;  %v5628_v16 = vld [vmem:[%s9520_s0 + $0x598] sm:$0xf]  ;;  %v8117_v50 = vpop.f32.mrf.mxu1  ;;  %v6563_v4 = vld [vmem:[%s9520_s0 + $0x6a4] sm:$0xf] }
  0xb4   :  { %2165 = vmatpush.bf16.msra.mxu2 %v5613_v21  ;;  %v5828_v21 = vld [vmem:[%s9520_s0 + $0x720] sm:$0xf]  ;;  %9529 = vst [vmem:[#allocation9_spill] sm:$0xff] %v8117_v50  ;;  %v5766_v5 = vld [vmem:[%s9520_s0 + $0x6e0] sm:$0xf0] }
  0xb5   :  { %2179 = vmatpush.bf16.msra.mxu3 %v5617_v22  ;;  %v6587_v22 = vld [vmem:[%s9520_s0 + $0x75c] sm:$0x30] }
  0xb6   :  { %v5829_v47 = vor.u32 %v6587_v22, %v5828_v21  ;;  %v6547_v21 = vld [vmem:[%s9520_s0 + $0x624] sm:$0xf] }
  0xb7   :  { %2138 = vmatpush.bf16.msra.mxu0 %v5541_v37  ;;  %2152 = vmatpush.bf16.msra.mxu1 %v5545_v38  ;;  %v5629_v37 = vor.u32 %v6538_v17, %v5628_v16  ;;  %v5633_v38 = vor.u32 %v6530_v18, %v5630_v19  ;;  %v8104_v43 = vpop.f32.mrf.mxu3  ;;  %v5700_v16 = vld [vmem:[%s9520_s0 + $0x620] sm:$0xf]  ;;  %v5702_v22 = vld [vmem:[%s9520_s0 + $0x660] sm:$0xf0] }
  0xb8   :  { %2166 = vmatpush.bf16.msra.mxu2 %v5549_v39  ;;  %v6513_v39 = vld [vmem:[%s9520_s0 + $0x514] sm:$0xf]  ;;  %v6555_v17 = vld [vmem:[%s9520_s0 + $0x65c] sm:$0xf0]  ;;  %v5705_v34 = vor.u32 %v6547_v21, %v5702_v22 }
  0xb9   :  { %2180 = vmatpush.bf16.msra.mxu3 %v5553_v40  ;;  %v5558_v40 = vld [vmem:[%s9520_s0 + $0x550] sm:$0xf0]  ;;  %v8115_v49 = vpop.f32.mrf.mxu0  ;;  %v5701_v31 = vor.u32 %v6555_v17, %v5700_v16  ;;  %v6516_v16 = vld [vmem:[%s9520_s0 + $0x52c] sm:$0xf] }
  0xba   :  { %5858 = vmatmul.msk.bf16.vlgmr.msra.gmra.mxu0 %vm505_vm2, %v7736_v52  ;;  %5859 = vmatmul.msk.bf16.vlgmr.msra.gmra.mxu1 %vm505_vm2, %v7736_v52  ;;  %9528 = vst [vmem:[#allocation8_spill] sm:$0xff] %v8115_v49  ;;  %v5582_v17 = vld [vmem:[%s9520_s0 + $0x568] sm:$0xf0] }
  0xbb   :  { %2190 = vmatpush.bf16.msrb.mxu0 %v2096_v41  ;;  %2204 = vmatpush.bf16.msrb.mxu1 %v2099_v42  ;;  %v5564_v41 = vld [vmem:[%s9520_s0 + $0x518] sm:$0xf]  ;;  %v8102_v42 = vpop.f32.mrf.mxu2 }
  0xbc   :  { %2218 = vmatpush.bf16.msrb.mxu2 %v2102_v45  ;;  %5861 = vmatmul.msk.bf16.vlgmr.msra.gmra.mxu3 %vm505_vm2, %v7736_v52  ;;  %v6514_v45 = vld [vmem:[%s9520_s0 + $0x51c] sm:$0xf]  ;;  %v5565_v57 = vor.u32 %v6522_v44, %v5564_v41  ;;  %v5644_v41 = vld [vmem:[%s9520_s0 + $0x5a8] sm:$0xf] }
  0xbd   :  { %2232 = vmatpush.bf16.msrb.mxu3 %v2105_v46  ;;  %5860 = vmatmul.msk.bf16.vlgmr.msra.gmra.mxu2 %vm505_vm2, %v7736_v52  ;;  %v5566_v46 = vld [vmem:[%s9520_s0 + $0x558] sm:$0xf0]  ;;  %v6540_v44 = vld [vmem:[%s9520_s0 + $0x5e4] sm:$0xf0] }
  0xbe   :  { %v5569_v59 = vor.u32 %v6514_v45, %v5566_v46  ;;  %v6532_v45 = vld [vmem:[%s9520_s0 + $0x5ac] sm:$0xf] }
  0xbf   :  { %2191 = vmatpush.bf16.msrb.mxu0 %v5749_v55  ;;  %2205 = vmatpush.bf16.msrb.mxu1 %v5753_v56  ;;  %v5557_v55 = vor.u32 %v6521_v24, %v5556_v23  ;;  %v5561_v56 = vor.u32 %v6513_v39, %v5558_v40  ;;  %v8149_v13 = vpop.f32.mrf.mxu3  ;;  %v5708_v23 = vld [vmem:[%s9520_s0 + $0x628] sm:$0xf]  ;;  %v8168_v25 = vpop.f32.mrf.mxu1  ;;  %v5646_v46 = vld [vmem:[%s9520_s0 + $0x5e8] sm:$0xf0] }
  0xc0   :  { %2219 = vmatpush.bf16.msrb.mxu2 %v5757_v61  ;;  %v2108_v61 = vand.u32 %v5829_v47, %v6755_v10  ;;  %9531 = vst [vmem:[#allocation11_spill] sm:$0xff] %v8149_v13  ;;  %v5709_v39 = vor.u32 %v6556_v27, %v5708_v23  ;;  %v5844_v47 = vld [vmem:[%s9520_s0 + $0x730] sm:$0xf]  ;;  %v5573_v23 = vor.u32 %v6523_v53, %v5572_v51 }
  0xc1   :  { %2233 = vmatpush.bf16.msrb.mxu3 %v5761_v62  ;;  %v2111_v62 = vand.u32 %v5833_v48, %v6755_v10  ;;  %v8166_v24 = vpop.f32.mrf.mxu0  ;;  %v6589_v48 = vld [vmem:[%s9520_s0 + $0x76c] sm:$0x30] }
  0xc3   :  { %2192 = vmatpush.bf16.msrb.mxu0 %v5685_v8  ;;  %2206 = vmatpush.bf16.msrb.mxu1 %v5689_v9  ;;  %v6572_v8 = vld [vmem:[%s9520_s0 + $0x6e4] sm:$0xf0]  ;;  %v6564_v9 = vld [vmem:[%s9520_s0 + $0x6ac] sm:$0xf]  ;;  %v8147_v12 = vpop.f32.mrf.mxu2 }
  0xc4   :  { %2220 = vmatpush.bf16.msrb.mxu2 %v5693_v14  ;;  %9530 = vst [vmem:[#allocation10_spill] sm:$0xff] %v8147_v12  ;;  %v5765_v14 = vor.u32 %v6571_v0, %v5764_v63  ;;  %v5773_v18 = vor.u32 %v6572_v8, %v5772_v7  ;;  %v5777_v19 = vor.u32 %v6564_v9, %v5774_v11  ;;  %v6590_v0 = vld [vmem:[%s9520_s0 + $0x774] sm:$0x30]  ;;  %v6515_v7 = vld [vmem:[%s9520_s0 + $0x524] sm:$0xf] }
  0xc5   :  { %2234 = vmatpush.bf16.msrb.mxu3 %v5697_v15  ;;  %v5769_v15 = vor.u32 %v6563_v4, %v5766_v5  ;;  %v5645_v4 = vor.u32 %v6540_v44, %v5644_v41  ;;  %v5649_v5 = vor.u32 %v6532_v45, %v5646_v46  ;;  %v5574_v8 = vld [vmem:[%s9520_s0 + $0x560] sm:$0xf0]  ;;  %v5580_v9 = vld [vmem:[%s9520_s0 + $0x528] sm:$0xf]  ;;  %v5788_v41 = vld [vmem:[%s9520_s0 + $0x6b8] sm:$0xf] }
  0xc6   :  { %v5577_v27 = vor.u32 %v6515_v7, %v5574_v8  ;;  %v6574_v44 = vld [vmem:[%s9520_s0 + $0x6f4] sm:$0xf0]  ;;  %v6566_v45 = vld [vmem:[%s9520_s0 + $0x6bc] sm:$0xf] }
  0xc7   :  { %2193 = vmatpush.bf16.msrb.mxu0 %v5621_v29  ;;  %2207 = vmatpush.bf16.msrb.mxu1 %v5625_v30  ;;  %v5710_v29 = vld [vmem:[%s9520_s0 + $0x668] sm:$0xf0]  ;;  %v5636_v30 = vld [vmem:[%s9520_s0 + $0x5a0] sm:$0xf]  ;;  %v8234_v63 = vpop.f32.mrf.mxu3  ;;  %v5790_v46 = vld [vmem:[%s9520_s0 + $0x6f8] sm:$0xf0] }
  0xc8   :  { %2221 = vmatpush.bf16.msrb.mxu2 %v5629_v37  ;;  %v6531_v37 = vld [vmem:[%s9520_s0 + $0x5a4] sm:$0xf]  ;;  %v5713_v40 = vor.u32 %v6548_v28, %v5710_v29  ;;  %v5585_v29 = vor.u32 %v6516_v16, %v5582_v17  ;;  %v6550_v7 = vld [vmem:[%s9520_s0 + $0x63c] sm:$0xf]  ;;  %v6541_v17 = vld [vmem:[%s9520_s0 + $0x5ec] sm:$0xf0] }
  0xc9   :  { %2235 = vmatpush.bf16.msrb.mxu3 %v5633_v38  ;;  %v5638_v38 = vld [vmem:[%s9520_s0 + $0x5e0] sm:$0xf0]  ;;  %v8254_v11 = vpop.f32.mrf.mxu0  ;;  %v5726_v8 = vld [vmem:[%s9520_s0 + $0x678] sm:$0xf0] }
  0xca   :  { %9532 = vst [vmem:[#allocation12_spill] sm:$0xff] %v8254_v11 }
  0xcb   :  { %2194 = vmatpush.bf16.msrb.mxu0 %v5557_v55  ;;  %2208 = vmatpush.bf16.msrb.mxu1 %v5561_v56  ;;  %v6581_v55 = vld [vmem:[%s9520_s0 + $0x734] sm:$0xf] }
  0xcc   :  { %2222 = vmatpush.bf16.msrb.mxu2 %v5565_v57  ;;  %v5846_v56 = vld [vmem:[%s9520_s0 + $0x770] sm:$0x30]  ;;  %v5852_v57 = vld [vmem:[%s9520_s0 + $0x738] sm:$0xf] }
  0xcd   :  { %2236 = vmatpush.bf16.msrb.mxu3 %v5569_v59  ;;  %v5637_v59 = vor.u32 %v6539_v35, %v5636_v30  ;;  %v5853_v21 = vor.u32 %v6590_v0, %v5852_v57  ;;  %v6573_v35 = vld [vmem:[%s9520_s0 + $0x6ec] sm:$0xf0]  ;;  %v5789_v57 = vor.u32 %v6574_v44, %v5788_v41  ;;  %v5718_v0 = vld [vmem:[%s9520_s0 + $0x670] sm:$0xf0] }
  0xce   :  { %5862 = vmatmul.msk.bf16.vlgmr.msrb.gmra.mxu0 %vm505_vm2, %v7736_v52  ;;  %5863 = vmatmul.msk.bf16.vlgmr.msrb.gmra.mxu1 %vm505_vm2, %v7736_v52 }
  0xcf   :  { %2246 = vmatpush.bf16.msra.mxu0 %v2108_v61  ;;  %2260 = vmatpush.bf16.msra.mxu1 %v2111_v62  ;;  %v5641_v61 = vor.u32 %v6531_v37, %v5638_v38  ;;  %v8232_v62 = vpop.f32.mrf.mxu2  ;;  %v2126_v37 = vand.u32 %v5853_v21, %v6755_v10 }
  0xd0   :  { %2274 = vmatpush.bf16.msra.mxu2 %v2114_v1  ;;  %5865 = vmatmul.msk.bf16.vlgmr.msrb.gmra.mxu3 %vm505_vm2, %v7736_v52  ;;  %v6582_v1 = vld [vmem:[%s9520_s0 + $0x73c] sm:$0xf] }
  0xd1   :  { %2288 = vmatpush.bf16.msra.mxu3 %v2117_v3  ;;  %5864 = vmatmul.msk.bf16.vlgmr.msrb.gmra.mxu2 %vm505_vm2, %v7736_v52  ;;  %v5854_v3 = vld [vmem:[%s9520_s0 + $0x778] sm:$0x30] }
  0xd2   :  { %v5857_v22 = vor.u32 %v6582_v1, %v5854_v3  ;;  %v5724_v1 = vld [vmem:[%s9520_s0 + $0x638] sm:$0xf] }
  0xd3   :  { %2247 = vmatpush.bf16.msra.mxu0 %v5765_v14  ;;  %2261 = vmatpush.bf16.msra.mxu1 %v5769_v15  ;;  %v8256_v14 = vpop.f32.mrf.mxu1  ;;  %v6524_v15 = vld [vmem:[%s9520_s0 + $0x564] sm:$0xf0]  ;;  %v8314_v3 = vpop.f32.mrf.mxu0 }
  0xd4   :  { %2275 = vmatpush.bf16.msra.mxu2 %v5773_v18  ;;  %9533 = vst [vmem:[#allocation13_spill] sm:$0xff] %v8256_v14  ;;  %v5845_v18 = vor.u32 %v6589_v48, %v5844_v47  ;;  %v5581_v28 = vor.u32 %v6524_v15, %v5580_v9  ;;  %v2129_v38 = vand.u32 %v5857_v22, %v6755_v10  ;;  %v8297_v48 = vpop.f32.mrf.mxu3  ;;  %v5652_v9 = vld [vmem:[%s9520_s0 + $0x5b0] sm:$0xf]  ;;  %v5980_v14 = vld [vmem:[%s9520_s0 + $0x798] sm:$0xf] }
  0xd5   :  { %2289 = vmatpush.bf16.msra.mxu3 %v5777_v19  ;;  %v5849_v19 = vor.u32 %v6581_v55, %v5846_v56  ;;  %9535 = vst [vmem:[#allocation15_spill] sm:$0xff] %v8297_v48  ;;  %v5716_v55 = vld [vmem:[%s9520_s0 + $0x630] sm:$0xf]  ;;  %v5729_v22 = vor.u32 %v6550_v7, %v5726_v8  ;;  %v6518_v7 = vld [vmem:[%s9520_s0 + $0x53c] sm:$0xf] }
  0xd6   :  { %v2120_v30 = vand.u32 %v5845_v18, %v6755_v10  ;;  %v6557_v56 = vld [vmem:[%s9520_s0 + $0x66c] sm:$0xf0]  ;;  %v6533_v18 = vld [vmem:[%s9520_s0 + $0x5b4] sm:$0xf]  ;;  %v5598_v8 = vld [vmem:[%s9520_s0 + $0x578] sm:$0xf0] }
  0xd7   :  { %2248 = vmatpush.bf16.msra.mxu0 %v5701_v31  ;;  %2262 = vmatpush.bf16.msra.mxu1 %v5705_v34  ;;  %v2123_v31 = vand.u32 %v5849_v19, %v6755_v10  ;;  %v5780_v34 = vld [vmem:[%s9520_s0 + $0x6b0] sm:$0xf]  ;;  %v8295_v47 = vpop.f32.mrf.mxu2  ;;  %v5717_v15 = vor.u32 %v6557_v56, %v5716_v55  ;;  %v5654_v19 = vld [vmem:[%s9520_s0 + $0x5f0] sm:$0xf0] }
  0xd8   :  { %2276 = vmatpush.bf16.msra.mxu2 %v5709_v39  ;;  %v6565_v39 = vld [vmem:[%s9520_s0 + $0x6b4] sm:$0xf]  ;;  %9534 = vst [vmem:[#allocation14_spill] sm:$0xff] %v8295_v47  ;;  %v5781_v51 = vor.u32 %v6573_v35, %v5780_v34  ;;  %v5588_v34 = vld [vmem:[%s9520_s0 + $0x530] sm:$0xf]  ;;  %v5657_v41 = vor.u32 %v6533_v18, %v5654_v19 }
  0xd9   :  { %2290 = vmatpush.bf16.msra.mxu3 %v5713_v40  ;;  %v5782_v40 = vld [vmem:[%s9520_s0 + $0x6f0] sm:$0xf0]  ;;  %v6525_v35 = vld [vmem:[%s9520_s0 + $0x56c] sm:$0xf0] }
  0xda   :  { %v5785_v53 = vor.u32 %v6565_v39, %v5782_v40  ;;  %v6220_v39 = vld [vmem:[%s9520_s0 + $0x988] sm:$0xf]  ;;  %v5653_v40 = vor.u32 %v6541_v17, %v5652_v9  ;;  %v5589_v18 = vor.u32 %v6525_v35, %v5588_v34  ;;  %v6639_v34 = vld [vmem:[%s9520_s0 + $0x904] sm:$0xf]  ;;  %v6164_v47 = vld [vmem:[%s9520_s0 + $0x910] sm:$0xf] }
  0xdb   :  { %2249 = vmatpush.bf16.msra.mxu0 %v5637_v59  ;;  %2263 = vmatpush.bf16.msra.mxu1 %v5641_v61  ;;  %v5793_v59 = vor.u32 %v6566_v45, %v5790_v46  ;;  %v6549_v61 = vld [vmem:[%s9520_s0 + $0x634] sm:$0xf]  ;;  %v6664_v46 = vld [vmem:[%s9520_s0 + $0x9c4] sm:$0x30]  ;;  %v6150_v35 = vld [vmem:[%s9520_s0 + $0x940] sm:$0xf0] }
  0xdc   :  { %2277 = vmatpush.bf16.msra.mxu2 %v5645_v4  ;;  %v8316_v4 = vpop.f32.mrf.mxu1  ;;  %v5721_v16 = vor.u32 %v6549_v61, %v5718_v0  ;;  %v8382_v45 = vpop.f32.mrf.mxu3  ;;  %v5596_v61 = vld [vmem:[%s9520_s0 + $0x538] sm:$0xf] }
  0xdd   :  { %2291 = vmatpush.bf16.msra.mxu3 %v5649_v5  ;;  %v6558_v5 = vld [vmem:[%s9520_s0 + $0x674] sm:$0xf0]  ;;  %v8402_v0 = vpop.f32.mrf.mxu0 }
  0xde   :  { %v5725_v21 = vor.u32 %v6558_v5, %v5724_v1  ;;  %9536 = vst [vmem:[#allocation16_spill] sm:$0xff] %v8402_v0  ;;  %v6526_v5 = vld [vmem:[%s9520_s0 + $0x574] sm:$0xf0] }
  0xdf   :  { %2250 = vmatpush.bf16.msra.mxu0 %v5573_v23  ;;  %2264 = vmatpush.bf16.msra.mxu1 %v5577_v27  ;;  %v5660_v23 = vld [vmem:[%s9520_s0 + $0x5b8] sm:$0xf]  ;;  %v8380_v44 = vpop.f32.mrf.mxu2 }
  0xe0   :  { %2278 = vmatpush.bf16.msra.mxu2 %v5581_v28  ;;  %v6542_v27 = vld [vmem:[%s9520_s0 + $0x5f4] sm:$0xf0]  ;;  %v6534_v28 = vld [vmem:[%s9520_s0 + $0x5bc] sm:$0xf] }
  0xe1   :  { %2292 = vmatpush.bf16.msra.mxu3 %v5585_v29  ;;  %v5662_v29 = vld [vmem:[%s9520_s0 + $0x5f8] sm:$0xf0]  ;;  %v5661_v55 = vor.u32 %v6542_v27, %v5660_v23 }
  0xe2   :  { %5866 = vmatmul.msk.bf16.vlgmr.msra.gmra.mxu0 %vm505_vm2, %v7736_v52  ;;  %5867 = vmatmul.msk.bf16.vlgmr.msra.gmra.mxu1 %vm505_vm2, %v7736_v52  ;;  %v5665_v56 = vor.u32 %v6534_v28, %v5662_v29  ;;  %v6148_v28 = vld [vmem:[%s9520_s0 + $0x900] sm:$0xf] }
  0xe3   :  { %2302 = vmatpush.bf16.msrb.mxu0 %v2120_v30  ;;  %2316 = vmatpush.bf16.msrb.mxu1 %v2123_v31  ;;  %v6212_v30 = vld [vmem:[%s9520_s0 + $0x980] sm:$0xf] }
  0xe4   :  { %2330 = vmatpush.bf16.msrb.mxu2 %v2126_v37  ;;  %5869 = vmatmul.msk.bf16.vlgmr.msra.gmra.mxu3 %vm505_vm2, %v7736_v52  ;;  %v6663_v31 = vld [vmem:[%s9520_s0 + $0x9bc] sm:$0x30]  ;;  %v6655_v37 = vld [vmem:[%s9520_s0 + $0x984] sm:$0xf]  ;;  %v8404_v1 = vpop.f32.mrf.mxu1 }
  0xe5   :  { %2344 = vmatpush.bf16.msrb.mxu3 %v2129_v38  ;;  %5868 = vmatmul.msk.bf16.vlgmr.msra.gmra.mxu2 %vm505_vm2, %v7736_v52  ;;  %v6214_v38 = vld [vmem:[%s9520_s0 + $0x9c0] sm:$0x30]  ;;  %9537 = vst [vmem:[#allocation17_spill] sm:$0xff] %v8404_v1  ;;  %v6213_v9 = vor.u32 %v6663_v31, %v6212_v30  ;;  %v6647_v29 = vld [vmem:[%s9520_s0 + $0x93c] sm:$0xf0] }
  0xe7   :  { %2303 = vmatpush.bf16.msrb.mxu0 %v5781_v51  ;;  %2317 = vmatpush.bf16.msrb.mxu1 %v5785_v53  ;;  %v6656_v51 = vld [vmem:[%s9520_s0 + $0x98c] sm:$0xf]  ;;  %v2885_v23 = vand.u32 %v6213_v9, %v6755_v10  ;;  %v6092_v9 = vld [vmem:[%s9520_s0 + $0x888] sm:$0xf] }
  0xe8   :  { %2331 = vmatpush.bf16.msrb.mxu2 %v5789_v57  ;;  %v6222_v53 = vld [vmem:[%s9520_s0 + $0x9c8] sm:$0x30]  ;;  %v6517_v57 = vld [vmem:[%s9520_s0 + $0x534] sm:$0xf] }
  0xe9   :  { %2345 = vmatpush.bf16.msrb.mxu3 %v5793_v59  ;;  %v5590_v59 = vld [vmem:[%s9520_s0 + $0x570] sm:$0xf0]  ;;  %v6225_v17 = vor.u32 %v6656_v51, %v6222_v53  ;;  %v6149_v51 = vor.u32 %v6647_v29, %v6148_v28  ;;  %v6153_v53 = vor.u32 %v6639_v34, %v6150_v35  ;;  %v6030_v34 = vld [vmem:[%s9520_s0 + $0x848] sm:$0xf0]  ;;  %v6228_v35 = vld [vmem:[%s9520_s0 + $0x990] sm:$0xf] }
  0xea   :  { %v5593_v19 = vor.u32 %v6517_v57, %v5590_v59 }
  0xeb   :  { %2304 = vmatpush.bf16.msrb.mxu0 %v5717_v15  ;;  %2318 = vmatpush.bf16.msrb.mxu1 %v5721_v16  ;;  %v6217_v15 = vor.u32 %v6655_v37, %v6214_v38  ;;  %v6221_v16 = vor.u32 %v6664_v46, %v6220_v39  ;;  %v2894_v31 = vand.u32 %v6225_v17, %v6755_v10  ;;  %v6156_v37 = vld [vmem:[%s9520_s0 + $0x908] sm:$0xf]  ;;  %v6640_v39 = vld [vmem:[%s9520_s0 + $0x90c] sm:$0xf]  ;;  %v8445_v46 = vpop.f32.mrf.mxu3 }
  0xec   :  { %2332 = vmatpush.bf16.msrb.mxu2 %v5725_v21  ;;  %v5597_v21 = vor.u32 %v6526_v5, %v5596_v61  ;;  %v6648_v38 = vld [vmem:[%s9520_s0 + $0x944] sm:$0xf0]  ;;  %9539 = vst [vmem:[#allocation19_spill] sm:$0xff] %v8445_v46  ;;  %v8453_v61 = vpop.f32.mrf.mxu0  ;;  %v8455_v5 = vpop.f32.mrf.mxu1  ;;  %v6094_v17 = vld [vmem:[%s9520_s0 + $0x8c8] sm:$0xf0] }
  0xed   :  { %2346 = vmatpush.bf16.msrb.mxu3 %v5729_v22  ;;  %v5601_v22 = vor.u32 %v6518_v7, %v5598_v8  ;;  %v2888_v27 = vand.u32 %v6217_v15, %v6755_v10  ;;  %v2891_v30 = vand.u32 %v6221_v16, %v6755_v10  ;;  %v6157_v57 = vor.u32 %v6648_v38, %v6156_v37  ;;  %v6623_v7 = vld [vmem:[%s9520_s0 + $0x884] sm:$0xf]  ;;  %v6632_v15 = vld [vmem:[%s9520_s0 + $0x8c4] sm:$0xf0]  ;;  %v6624_v16 = vld [vmem:[%s9520_s0 + $0x88c] sm:$0xf] }
  0xee   :  { %v6086_v8 = vld [vmem:[%s9520_s0 + $0x8c0] sm:$0xf0]  ;;  %v6093_v28 = vor.u32 %v6632_v15, %v6092_v9  ;;  %v6097_v29 = vor.u32 %v6624_v16, %v6094_v17  ;;  %v6665_v37 = vld [vmem:[%s9520_s0 + $0x9cc] sm:$0x30]  ;;  %v6657_v38 = vld [vmem:[%s9520_s0 + $0x994] sm:$0xf] }
  0xef   :  { %2305 = vmatpush.bf16.msrb.mxu0 %v5653_v40  ;;  %2319 = vmatpush.bf16.msrb.mxu1 %v5657_v41  ;;  %v6158_v40 = vld [vmem:[%s9520_s0 + $0x948] sm:$0xf0]  ;;  %v8443_v41 = vpop.f32.mrf.mxu2  ;;  %v6238_v9 = vld [vmem:[%s9520_s0 + $0x9d8] sm:$0x30] }
  0xf0   :  { %2333 = vmatpush.bf16.msrb.mxu2 %v5661_v55  ;;  %9538 = vst [vmem:[#allocation18_spill] sm:$0xff] %v8443_v41  ;;  %v6084_v55 = vld [vmem:[%s9520_s0 + $0x880] sm:$0xf]  ;;  %v6161_v59 = vor.u32 %v6640_v39, %v6158_v40 }
  0xf1   :  { %2347 = vmatpush.bf16.msrb.mxu3 %v5665_v56  ;;  %v6631_v56 = vld [vmem:[%s9520_s0 + $0x8bc] sm:$0xf0] }
  0xf2   :  { %v5956_v39 = vld [vmem:[%s9520_s0 + $0x780] sm:$0xf] }
  0xf3   :  { %2306 = vmatpush.bf16.msrb.mxu0 %v5589_v18  ;;  %2320 = vmatpush.bf16.msrb.mxu1 %v5593_v19  ;;  %v6020_v18 = vld [vmem:[%s9520_s0 + $0x800] sm:$0xf] }
  0xf4   :  { %2334 = vmatpush.bf16.msrb.mxu2 %v5597_v21  ;;  %v6615_v19 = vld [vmem:[%s9520_s0 + $0x83c] sm:$0xf0]  ;;  %v6085_v21 = vor.u32 %v6631_v56, %v6084_v55  ;;  %v8541_v17 = vpop.f32.mrf.mxu0 }
  0xf5   :  { %2348 = vmatpush.bf16.msrb.mxu3 %v5601_v22  ;;  %v6089_v22 = vor.u32 %v6623_v7, %v6086_v8  ;;  %v6599_v40 = vld [vmem:[%s9520_s0 + $0x7bc] sm:$0xf0]  ;;  %v6021_v55 = vor.u32 %v6615_v19, %v6020_v18  ;;  %v6666_v7 = vld [vmem:[%s9520_s0 + $0x9d4] sm:$0x30]  ;;  %v6658_v8 = vld [vmem:[%s9520_s0 + $0x99c] sm:$0xf]  ;;  %v8543_v18 = vpop.f32.mrf.mxu1 }
  0xf6   :  { %5870 = vmatmul.msk.bf16.vlgmr.msrb.gmra.mxu0 %vm505_vm2, %v7736_v52  ;;  %5871 = vmatmul.msk.bf16.vlgmr.msrb.gmra.mxu1 %vm505_vm2, %v7736_v52  ;;  %9540 = vst [vmem:[#allocation20_spill] sm:$0xff] %v8543_v18  ;;  %v6591_v19 = vld [vmem:[%s9520_s0 + $0x784] sm:$0xf]  ;;  %v6196_v18 = vld [vmem:[%s9520_s0 + $0x930] sm:$0xf] }
  0xf7   :  { %2935 = vmatpush.bf16.msra.mxu0 %v2885_v23  ;;  %2949 = vmatpush.bf16.msra.mxu1 %v2888_v27  ;;  %v6607_v23 = vld [vmem:[%s9520_s0 + $0x804] sm:$0xf]  ;;  %v6028_v27 = vld [vmem:[%s9520_s0 + $0x808] sm:$0xf] }
  0xf8   :  { %2963 = vmatpush.bf16.msra.mxu2 %v2891_v30  ;;  %5873 = vmatmul.msk.bf16.vlgmr.msrb.gmra.mxu3 %vm505_vm2, %v7736_v52  ;;  %v6616_v30 = vld [vmem:[%s9520_s0 + $0x844] sm:$0xf0] }
  0xf9   :  { %2977 = vmatpush.bf16.msra.mxu3 %v2894_v31  ;;  %5872 = vmatmul.msk.bf16.vlgmr.msrb.gmra.mxu2 %vm505_vm2, %v7736_v52  ;;  %v6022_v52 = vld [vmem:[%s9520_s0 + $0x840] sm:$0xf0]  ;;  %v6608_v31 = vld [vmem:[%s9520_s0 + $0x80c] sm:$0xf]  ;;  %v6029_v15 = vor.u32 %v6616_v30, %v6028_v27 }
  0xfa   :  { %v6025_v56 = vor.u32 %v6607_v23, %v6022_v52  ;;  %v6033_v16 = vor.u32 %v6608_v31, %v6030_v34  ;;  %v6600_v23 = vld [vmem:[%s9520_s0 + $0x7c4] sm:$0xf0]  ;;  %v6592_v52 = vld [vmem:[%s9520_s0 + $0x78c] sm:$0xf]  ;;  %v6241_v31 = vor.u32 %v6658_v8, %v6238_v9  ;;  %v5957_v34 = vor.u32 %v6599_v40, %v5956_v39  ;;  %v6641_v39 = vld [vmem:[%s9520_s0 + $0x914] sm:$0xf] }
  0xfb   :  { %2936 = vmatpush.bf16.msra.mxu0 %v6149_v51  ;;  %2950 = vmatpush.bf16.msra.mxu1 %v6153_v53  ;;  %v6230_v51 = vld [vmem:[%s9520_s0 + $0x9d0] sm:$0x30]  ;;  %v6236_v53 = vld [vmem:[%s9520_s0 + $0x998] sm:$0xf]  ;;  %v5966_v27 = vld [vmem:[%s9520_s0 + $0x7c8] sm:$0xf0] }
  0xfc   :  { %2964 = vmatpush.bf16.msra.mxu2 %v6157_v57  ;;  %v8528_v57 = vpop.f32.mrf.mxu2  ;;  %v6237_v30 = vor.u32 %v6666_v7, %v6236_v53  ;;  %v5969_v1 = vor.u32 %v6592_v52, %v5966_v27  ;;  %v6166_v40 = vld [vmem:[%s9520_s0 + $0x950] sm:$0xf0]  ;;  %v6650_v53 = vld [vmem:[%s9520_s0 + $0x954] sm:$0xf0]  ;;  %v6626_v52 = vld [vmem:[%s9520_s0 + $0x89c] sm:$0xf] }
  0xfd   :  { %2978 = vmatpush.bf16.msra.mxu3 %v6161_v59  ;;  %v8530_v59 = vpop.f32.mrf.mxu3  ;;  %v6169_v9 = vor.u32 %v6641_v39, %v6166_v40  ;;  %v6110_v27 = vld [vmem:[%s9520_s0 + $0x8d8] sm:$0xf0]  ;;  %v6618_v40 = vld [vmem:[%s9520_s0 + $0x854] sm:$0xf0] }
  0xfe   :  { %v6113_v39 = vor.u32 %v6626_v52, %v6110_v27  ;;  %v6660_v52 = vld [vmem:[%s9520_s0 + $0x9ac] sm:$0xf] }
  0xff   :  { %2937 = vmatpush.bf16.msra.mxu0 %v6085_v21  ;;  %2951 = vmatpush.bf16.msra.mxu1 %v6089_v22  ;;  %v5958_v21 = vld [vmem:[%s9520_s0 + $0x7c0] sm:$0xf0]  ;;  %v5964_v22 = vld [vmem:[%s9520_s0 + $0x788] sm:$0xf]  ;;  %v6254_v27 = vld [vmem:[%s9520_s0 + $0x9e8] sm:$0x30] }
 0x100   :  { %2965 = vmatpush.bf16.msra.mxu2 %v6093_v28  ;;  %v6229_v28 = vor.u32 %v6665_v37, %v6228_v35  ;;  %v5961_v46 = vor.u32 %v6591_v19, %v5958_v21  ;;  %v5965_v41 = vor.u32 %v6600_v23, %v5964_v22  ;;  %v6649_v35 = vld [vmem:[%s9520_s0 + $0x94c] sm:$0xf0]  ;;  %v2903_v37 = vand.u32 %v6237_v30, %v6755_v10  ;;  %v8601_v22 = vpop.f32.mrf.mxu0  ;;  %v6634_v23 = vld [vmem:[%s9520_s0 + $0x8d4] sm:$0xf0] }
 0x101   :  { %2979 = vmatpush.bf16.msra.mxu3 %v6097_v29  ;;  %v6233_v29 = vor.u32 %v6657_v38, %v6230_v51  ;;  %v2906_v38 = vand.u32 %v6241_v31, %v6755_v10  ;;  %v6172_v51 = vld [vmem:[%s9520_s0 + $0x918] sm:$0xf]  ;;  %v6257_v11 = vor.u32 %v6660_v52, %v6254_v27  ;;  %v6635_v52 = vld [vmem:[%s9520_s0 + $0x8dc] sm:$0xf0] }
 0x102   :  { %v2897_v0 = vand.u32 %v6229_v28, %v6755_v10  ;;  %v6173_v19 = vor.u32 %v6650_v53, %v6172_v51  ;;  %v6036_v28 = vld [vmem:[%s9520_s0 + $0x810] sm:$0xf]  ;;  %v6610_v51 = vld [vmem:[%s9520_s0 + $0x81c] sm:$0xf] }
 0x103   :  { %2938 = vmatpush.bf16.msra.mxu0 %v6021_v55  ;;  %2952 = vmatpush.bf16.msra.mxu1 %v6025_v56  ;;  %v2900_v48 = vand.u32 %v6233_v29, %v6755_v10  ;;  %v6642_v55 = vld [vmem:[%s9520_s0 + $0x91c] sm:$0xf]  ;;  %v6617_v29 = vld [vmem:[%s9520_s0 + $0x84c] sm:$0xf0] }
 0x104   :  { %2966 = vmatpush.bf16.msra.mxu2 %v6029_v15  ;;  %v6174_v56 = vld [vmem:[%s9520_s0 + $0x958] sm:$0xf0]  ;;  %v8591_v7 = vpop.f32.mrf.mxu2  ;;  %v6100_v15 = vld [vmem:[%s9520_s0 + $0x890] sm:$0xf] }
 0x105   :  { %2980 = vmatpush.bf16.msra.mxu3 %v6033_v16  ;;  %9541 = vst [vmem:[#allocation21_spill] sm:$0xff] %v8591_v7  ;;  %v8593_v8 = vpop.f32.mrf.mxu3  ;;  %v6633_v16 = vld [vmem:[%s9520_s0 + $0x8cc] sm:$0xf0]  ;;  %v6177_v21 = vor.u32 %v6642_v55, %v6174_v56  ;;  %v6046_v53 = vld [vmem:[%s9520_s0 + $0x858] sm:$0xf0] }
 0x106   :  { %9542 = vst [vmem:[#allocation22_spill] sm:$0xff] %v8593_v8  ;;  %v6101_v30 = vor.u32 %v6633_v16, %v6100_v15  ;;  %v6244_v55 = vld [vmem:[%s9520_s0 + $0x9a0] sm:$0xf]  ;;  %v6601_v15 = vld [vmem:[%s9520_s0 + $0x7cc] sm:$0xf0] }
 0x107   :  { %2939 = vmatpush.bf16.msra.mxu0 %v5957_v34  ;;  %2953 = vmatpush.bf16.msra.mxu1 %v5961_v46  ;;  %v6165_v46 = vor.u32 %v6649_v35, %v6164_v47  ;;  %v6625_v47 = vld [vmem:[%s9520_s0 + $0x894] sm:$0xf]  ;;  %v6667_v56 = vld [vmem:[%s9520_s0 + $0x9dc] sm:$0x30]  ;;  %v6246_v16 = vld [vmem:[%s9520_s0 + $0x9e0] sm:$0x30] }
 0x108   :  { %2967 = vmatpush.bf16.msra.mxu2 %v5965_v41  ;;  %v8603_v41 = vpop.f32.mrf.mxu1  ;;  %v6609_v34 = vld [vmem:[%s9520_s0 + $0x814] sm:$0xf] }
 0x109   :  { %2981 = vmatpush.bf16.msra.mxu3 %v5969_v1  ;;  %v8617_v1 = vld [vmem:[%s9521_s1] sm:$0xff]  ;;  %v6038_v35 = vld [vmem:[%s9520_s0 + $0x850] sm:$0xf0] }
 0x10a   :  { %6274 = vmatmul.msk.bf16.vlgmr.msra.gmra.mxu0 %vm505_vm2, %v8617_v1  ;;  %6275 = vmatmul.msk.bf16.vlgmr.msra.gmra.mxu1 %vm505_vm2, %v8617_v1 }
 0x10b   :  { %2991 = vmatpush.bf16.msrb.mxu0 %v2897_v0  ;;  %3005 = vmatpush.bf16.msrb.mxu1 %v2900_v48  ;;  %v6102_v48 = vld [vmem:[%s9520_s0 + $0x8d0] sm:$0xf0]  ;;  %v6108_v0 = vld [vmem:[%s9520_s0 + $0x898] sm:$0xf] }
 0x10c   :  { %3019 = vmatpush.bf16.msrb.mxu2 %v2903_v37  ;;  %6277 = vmatmul.msk.bf16.vlgmr.msra.gmra.mxu3 %vm505_vm2, %v8617_v1  ;;  %v6105_v31 = vor.u32 %v6625_v47, %v6102_v48  ;;  %v6044_v37 = vld [vmem:[%s9520_s0 + $0x818] sm:$0xf]  ;;  %v6041_v47 = vor.u32 %v6609_v34, %v6038_v35  ;;  %v8681_v48 = vpop.f32.mrf.mxu2  ;;  %v6593_v34 = vld [vmem:[%s9520_s0 + $0x794] sm:$0xf] }
 0x10d   :  { %3033 = vmatpush.bf16.msrb.mxu3 %v2906_v38  ;;  %6276 = vmatmul.msk.bf16.vlgmr.msra.gmra.mxu2 %vm505_vm2, %v8617_v1  ;;  %v6109_v38 = vor.u32 %v6634_v23, %v6108_v0  ;;  %v8683_v0 = vpop.f32.mrf.mxu3  ;;  %v6668_v23 = vld [vmem:[%s9520_s0 + $0x9e4] sm:$0x30]  ;;  %v5974_v35 = vld [vmem:[%s9520_s0 + $0x7d0] sm:$0xf0] }
 0x10e   :  { %v5977_v12 = vor.u32 %v6593_v34, %v5974_v35  ;;  %v6628_v34 = vld [vmem:[%s9520_s0 + $0x8ac] sm:$0xf] }
 0x10f   :  { %2992 = vmatpush.bf16.msrb.mxu0 %v6165_v46  ;;  %3006 = vmatpush.bf16.msrb.mxu1 %v6169_v9  ;;  %v6659_v46 = vld [vmem:[%s9520_s0 + $0x9a4] sm:$0xf]  ;;  %v5972_v9 = vld [vmem:[%s9520_s0 + $0x790] sm:$0xf]  ;;  %v6126_v35 = vld [vmem:[%s9520_s0 + $0x8e8] sm:$0xf0] }
 0x110   :  { %3020 = vmatpush.bf16.msrb.mxu2 %v6173_v19  ;;  %v6252_v19 = vld [vmem:[%s9520_s0 + $0x9a8] sm:$0xf]  ;;  %v5973_v13 = vor.u32 %v6601_v15, %v5972_v9  ;;  %v6182_v9 = vld [vmem:[%s9520_s0 + $0x960] sm:$0xf0] }
 0x111   :  { %3034 = vmatpush.bf16.msrb.mxu3 %v6177_v21  ;;  %v6037_v21 = vor.u32 %v6617_v29, %v6036_v28  ;;  %v6045_v28 = vor.u32 %v6618_v40, %v6044_v37  ;;  %v6049_v29 = vor.u32 %v6610_v51, %v6046_v53  ;;  %v6602_v37 = vld [vmem:[%s9520_s0 + $0x7d4] sm:$0xf0]  ;;  %v6245_v40 = vor.u32 %v6667_v56, %v6244_v55  ;;  %v6651_v55 = vld [vmem:[%s9520_s0 + $0x95c] sm:$0xf0]  ;;  %v6188_v15 = vld [vmem:[%s9520_s0 + $0x928] sm:$0xf] }
 0x112   :  { %v6249_v51 = vor.u32 %v6659_v46, %v6246_v16  ;;  %v6253_v53 = vor.u32 %v6668_v23, %v6252_v19  ;;  %v2918_v46 = vand.u32 %v6257_v11, %v6755_v10  ;;  %v6652_v16 = vld [vmem:[%s9520_s0 + $0x964] sm:$0xf0]  ;;  %v6644_v11 = vld [vmem:[%s9520_s0 + $0x92c] sm:$0xf]  ;;  %v6116_v23 = vld [vmem:[%s9520_s0 + $0x8a0] sm:$0xf] }
 0x113   :  { %2993 = vmatpush.bf16.msrb.mxu0 %v6101_v30  ;;  %3007 = vmatpush.bf16.msrb.mxu1 %v6105_v31  ;;  %v8694_v30 = vpop.f32.mrf.mxu0  ;;  %v8696_v31 = vpop.f32.mrf.mxu1  ;;  %v2909_v49 = vand.u32 %v6245_v40, %v6755_v10  ;;  %v6190_v19 = vld [vmem:[%s9520_s0 + $0x968] sm:$0xf0]  ;;  %v6189_v27 = vor.u32 %v6652_v16, %v6188_v15  ;;  %v6260_v16 = vld [vmem:[%s9520_s0 + $0x9b0] sm:$0xf] }
 0x114   :  { %3021 = vmatpush.bf16.msrb.mxu2 %v6109_v38  ;;  %9543 = vst [vmem:[#allocation23_spill] sm:$0xff] %v8694_v30  ;;  %v6594_v38 = vld [vmem:[%s9520_s0 + $0x79c] sm:$0xf]  ;;  %v2912_v30 = vand.u32 %v6249_v51, %v6755_v10  ;;  %v2915_v56 = vand.u32 %v6253_v53, %v6755_v10  ;;  %v6611_v51 = vld [vmem:[%s9520_s0 + $0x824] sm:$0xf] }
 0x115   :  { %3035 = vmatpush.bf16.msrb.mxu3 %v6113_v39  ;;  %9544 = vst [vmem:[#allocation24_spill] sm:$0xff] %v8696_v31  ;;  %v5982_v39 = vld [vmem:[%s9520_s0 + $0x7d8] sm:$0xf0]  ;;  %v5981_v31 = vor.u32 %v6602_v37, %v5980_v14  ;;  %v6643_v14 = vld [vmem:[%s9520_s0 + $0x924] sm:$0xf] }
 0x116   :  { %v5985_v50 = vor.u32 %v6594_v38, %v5982_v39  ;;  %v6052_v37 = vld [vmem:[%s9520_s0 + $0x820] sm:$0xf]  ;;  %v6117_v39 = vor.u32 %v6635_v52, %v6116_v23  ;;  %v6054_v53 = vld [vmem:[%s9520_s0 + $0x860] sm:$0xf0]  ;;  %v6062_v15 = vld [vmem:[%s9520_s0 + $0x868] sm:$0xf0] }
 0x117   :  { %2994 = vmatpush.bf16.msrb.mxu0 %v6037_v21  ;;  %3008 = vmatpush.bf16.msrb.mxu1 %v6041_v47  ;;  %v8744_v21 = vpop.f32.mrf.mxu2  ;;  %v8746_v47 = vpop.f32.mrf.mxu3  ;;  %v6619_v38 = vld [vmem:[%s9520_s0 + $0x85c] sm:$0xf0]  ;;  %v6262_v23 = vld [vmem:[%s9520_s0 + $0x9f0] sm:$0x30]  ;;  %v6268_v52 = vld [vmem:[%s9520_s0 + $0x9b8] sm:$0xf] }
 0x118   :  { %3022 = vmatpush.bf16.msrb.mxu2 %v6045_v28  ;;  %9545 = vst [vmem:[#allocation25_spill] sm:$0xff] %v8744_v21  ;;  %v6193_v28 = vor.u32 %v6644_v11, %v6190_v19  ;;  %v6669_v11 = vld [vmem:[%s9520_s0 + $0x9ec] sm:$0x30]  ;;  %v6661_v19 = vld [vmem:[%s9520_s0 + $0x9b4] sm:$0xf] }
 0x119   :  { %3036 = vmatpush.bf16.msrb.mxu3 %v6049_v29  ;;  %9546 = vst [vmem:[#allocation26_spill] sm:$0xff] %v8746_v47 }
 0x11b   :  { %2995 = vmatpush.bf16.msrb.mxu0 %v5973_v13  ;;  %3009 = vmatpush.bf16.msrb.mxu1 %v5977_v12  ;;  %v6181_v12 = vor.u32 %v6651_v55, %v6180_v60  ;;  %v6185_v13 = vor.u32 %v6643_v14, %v6182_v9  ;;  %v8754_v29 = vpop.f32.mrf.mxu0  ;;  %v6627_v60 = vld [vmem:[%s9520_s0 + $0x8a4] sm:$0xf]  ;;  %v6060_v55 = vld [vmem:[%s9520_s0 + $0x828] sm:$0xf]  ;;  %v6612_v9 = vld [vmem:[%s9520_s0 + $0x82c] sm:$0xf] }
 0x11c   :  { %3023 = vmatpush.bf16.msrb.mxu2 %v5981_v31  ;;  %v8756_v31 = vpop.f32.mrf.mxu1  ;;  %v6620_v14 = vld [vmem:[%s9520_s0 + $0x864] sm:$0xf0] }
 0x11d   :  { %3037 = vmatpush.bf16.msrb.mxu3 %v5985_v50  ;;  %v6124_v50 = vld [vmem:[%s9520_s0 + $0x8a8] sm:$0xf] }
 0x11e   :  { %6278 = vmatmul.msk.bf16.vlgmr.msrb.gmra.mxu0 %vm505_vm2, %v8617_v1  ;;  %6279 = vmatmul.msk.bf16.vlgmr.msrb.gmra.mxu1 %vm505_vm2, %v8617_v1 }
 0x11f   :  { %3047 = vmatpush.bf16.msra.mxu0 %v2909_v49  ;;  %3061 = vmatpush.bf16.msra.mxu1 %v2912_v30  ;;  %v6118_v49 = vld [vmem:[%s9520_s0 + $0x8e0] sm:$0xf0]  ;;  %v6636_v30 = vld [vmem:[%s9520_s0 + $0x8e4] sm:$0xf0] }
 0x120   :  { %3075 = vmatpush.bf16.msra.mxu2 %v2915_v56  ;;  %6281 = vmatmul.msk.bf16.vlgmr.msrb.gmra.mxu3 %vm505_vm2, %v8617_v1  ;;  %v6121_v40 = vor.u32 %v6627_v60, %v6118_v49  ;;  %v6125_v56 = vor.u32 %v6636_v30, %v6124_v50  ;;  %v8829_v60 = vpop.f32.mrf.mxu2  ;;  %v8831_v49 = vpop.f32.mrf.mxu3  ;;  %v6670_v50 = vld [vmem:[%s9520_s0 + $0x9f4] sm:$0x30]  ;;  %v6662_v30 = vld [vmem:[%s9520_s0 + $0x9bc] sm:$0xf] }
 0x121   :  { %3089 = vmatpush.bf16.msra.mxu3 %v2918_v46  ;;  %6280 = vmatmul.msk.bf16.vlgmr.msrb.gmra.mxu2 %vm505_vm2, %v8617_v1  ;;  %v6129_v46 = vor.u32 %v6628_v34, %v6126_v35  ;;  %v6270_v34 = vld [vmem:[%s9520_s0 + $0x9f8] sm:$0x30]  ;;  %v6061_v35 = vor.u32 %v6620_v14, %v6060_v55  ;;  %v6604_v55 = vld [vmem:[%s9520_s0 + $0x7e4] sm:$0xf0]  ;;  %v6261_v14 = vor.u32 %v6669_v11, %v6260_v16  ;;  %v6653_v16 = vld [vmem:[%s9520_s0 + $0x96c] sm:$0xf0] }
 0x123   :  { %3048 = vmatpush.bf16.msra.mxu0 %v6181_v12  ;;  %3062 = vmatpush.bf16.msra.mxu1 %v6185_v13  ;;  %v5988_v12 = vld [vmem:[%s9520_s0 + $0x7a0] sm:$0xf]  ;;  %v2921_v7 = vand.u32 %v6261_v14, %v6755_v10 }
 0x124   :  { %3076 = vmatpush.bf16.msra.mxu2 %v6189_v27  ;;  %v6603_v13 = vld [vmem:[%s9520_s0 + $0x7dc] sm:$0xf0]  ;;  %v6053_v27 = vor.u32 %v6619_v38, %v6052_v37  ;;  %v6065_v37 = vor.u32 %v6612_v9, %v6062_v15  ;;  %v8842_v38 = vpop.f32.mrf.mxu0  ;;  %v6265_v9 = vor.u32 %v6661_v19, %v6262_v23  ;;  %v6269_v15 = vor.u32 %v6670_v50, %v6268_v52  ;;  %v6204_v23 = vld [vmem:[%s9520_s0 + $0x938] sm:$0xf] }
 0x125   :  { %3090 = vmatpush.bf16.msra.mxu3 %v6193_v28  ;;  %v6057_v28 = vor.u32 %v6611_v51, %v6054_v53  ;;  %9547 = vst [vmem:[#allocation27_spill] sm:$0xff] %v8842_v38  ;;  %v5990_v51 = vld [vmem:[%s9520_s0 + $0x7e0] sm:$0xf0]  ;;  %v5996_v53 = vld [vmem:[%s9520_s0 + $0x7a8] sm:$0xf]  ;;  %v5989_v38 = vor.u32 %v6603_v13, %v5988_v12 }
 0x126   :  { %v5997_v21 = vor.u32 %v6604_v55, %v5996_v53  ;;  %v2924_v54 = vand.u32 %v6265_v9, %v6755_v10  ;;  %v2927_v11 = vand.u32 %v6269_v15, %v6755_v10  ;;  %v6645_v12 = vld [vmem:[%s9520_s0 + $0x934] sm:$0xf]  ;;  %v6654_v52 = vld [vmem:[%s9520_s0 + $0x974] sm:$0xf0] }
 0x127   :  { %3049 = vmatpush.bf16.msra.mxu0 %v6117_v39  ;;  %3063 = vmatpush.bf16.msra.mxu1 %v6121_v40  ;;  %v8844_v39 = vpop.f32.mrf.mxu1  ;;  %v6595_v40 = vld [vmem:[%s9520_s0 + $0x7a4] sm:$0xf]  ;;  %v6198_v13 = vld [vmem:[%s9520_s0 + $0x970] sm:$0xf0] }
 0x128   :  { %3077 = vmatpush.bf16.msra.mxu2 %v6125_v56  ;;  %9548 = vst [vmem:[#allocation28_spill] sm:$0xff] %v8844_v39  ;;  %v6596_v56 = vld [vmem:[%s9520_s0 + $0x7ac] sm:$0xf]  ;;  %v6273_v39 = vor.u32 %v6662_v30, %v6270_v34  ;;  %v5993_v47 = vor.u32 %v6595_v40, %v5990_v51  ;;  %v8894_v50 = vpop.f32.mrf.mxu3  ;;  %v6201_v30 = vor.u32 %v6645_v12, %v6198_v13  ;;  %v6132_v34 = vld [vmem:[%s9520_s0 + $0x8b0] sm:$0xf] }
 0x129   :  { %3091 = vmatpush.bf16.msra.mxu3 %v6129_v46  ;;  %v5998_v46 = vld [vmem:[%s9520_s0 + $0x7e8] sm:$0xf0]  ;;  %v6630_v40 = vld [vmem:[%s9520_s0 + $0x8bc] sm:$0xf]  ;;  %v6613_v15 = vld [vmem:[%s9520_s0 + $0x834] sm:$0xf] }
 0x12a   :  { %v6001_v8 = vor.u32 %v6596_v56, %v5998_v46  ;;  %v2930_v19 = vand.u32 %v6273_v39, %v6755_v10  ;;  %v6646_v10 = vld [vmem:[%s9520_s0 + $0x93c] sm:$0xf]  ;;  %v6068_v56 = vld [vmem:[%s9520_s0 + $0x830] sm:$0xf] }
 0x12b   :  { %3050 = vmatpush.bf16.msra.mxu0 %v6053_v27  ;;  %3064 = vmatpush.bf16.msra.mxu1 %v6057_v28  ;;  %v6206_v27 = vld [vmem:[%s9520_s0 + $0x978] sm:$0xf0]  ;;  %v8892_v28 = vpop.f32.mrf.mxu2  ;;  %v6621_v46 = vld [vmem:[%s9520_s0 + $0x86c] sm:$0xf0] }
 0x12c   :  { %3078 = vmatpush.bf16.msra.mxu2 %v6061_v35  ;;  %v6637_v35 = vld [vmem:[%s9520_s0 + $0x8ec] sm:$0xf0]  ;;  %v8902_v39 = vpop.f32.mrf.mxu0  ;;  %v6142_v51 = vld [vmem:[%s9520_s0 + $0x8f8] sm:$0xf0] }
 0x12d   :  { %3092 = vmatpush.bf16.msra.mxu3 %v6065_v37  ;;  %v6205_v37 = vor.u32 %v6654_v52, %v6204_v23  ;;  %v6133_v53 = vor.u32 %v6637_v35, %v6132_v34  ;;  %v6145_v9 = vor.u32 %v6630_v40, %v6142_v51  ;;  %v6614_v12 = vld [vmem:[%s9520_s0 + $0x83c] sm:$0xf]  ;;  %v6069_v23 = vor.u32 %v6621_v46, %v6068_v56 }
 0x12e   :  { %v6078_v13 = vld [vmem:[%s9520_s0 + $0x878] sm:$0xf0] }
 0x12f   :  { %3051 = vmatpush.bf16.msra.mxu0 %v5989_v38  ;;  %3065 = vmatpush.bf16.msra.mxu1 %v5993_v47  ;;  %v6197_v47 = vor.u32 %v6653_v16, %v6196_v18  ;;  %v6209_v38 = vor.u32 %v6646_v10, %v6206_v27  ;;  %v6134_v18 = vld [vmem:[%s9520_s0 + $0x8f0] sm:$0xf0]  ;;  %v6081_v35 = vor.u32 %v6614_v12, %v6078_v13  ;;  %v6598_v40 = vld [vmem:[%s9520_s0 + $0x7bc] sm:$0xf] }
 0x130   :  { %3079 = vmatpush.bf16.msra.mxu2 %v5997_v21  ;;  %v8904_v21 = vpop.f32.mrf.mxu1  ;;  %v6070_v16 = vld [vmem:[%s9520_s0 + $0x870] sm:$0xf0]  ;;  %v8958_v27 = vpop.f32.mrf.mxu3  ;;  %v6014_v51 = vld [vmem:[%s9520_s0 + $0x7f8] sm:$0xf0] }
 0x131   :  { %3093 = vmatpush.bf16.msra.mxu3 %v6001_v8  ;;  %v6638_v8 = vld [vmem:[%s9520_s0 + $0x8f4] sm:$0xf0]  ;;  %v6073_v52 = vor.u32 %v6613_v15, %v6070_v16  ;;  %v6017_v46 = vor.u32 %v6598_v40, %v6014_v51 }
 0x132   :  { %6282 = vmatmul.msk.bf16.vlgmr.msra.gmra.mxu0 %vm505_vm2, %v8617_v1  ;;  %6283 = vmatmul.msk.bf16.vlgmr.msra.gmra.mxu1 %vm505_vm2, %v8617_v1 }
 0x133   :  { %3103 = vmatpush.bf16.msrb.mxu0 %v2921_v7  ;;  %3117 = vmatpush.bf16.msrb.mxu1 %v2924_v54  ;;  %v6629_v54 = vld [vmem:[%s9520_s0 + $0x8b4] sm:$0xf]  ;;  %v6140_v7 = vld [vmem:[%s9520_s0 + $0x8b8] sm:$0xf]  ;;  %v8956_v10 = vpop.f32.mrf.mxu2 }
 0x134   :  { %3131 = vmatpush.bf16.msrb.mxu2 %v2927_v11  ;;  %6285 = vmatmul.msk.bf16.vlgmr.msra.gmra.mxu3 %vm505_vm2, %v8617_v1  ;;  %v6137_v55 = vor.u32 %v6629_v54, %v6134_v18  ;;  %v6141_v14 = vor.u32 %v6638_v8, %v6140_v7  ;;  %v6076_v11 = vld [vmem:[%s9520_s0 + $0x838] sm:$0xf]  ;;  %v6597_v54 = vld [vmem:[%s9520_s0 + $0x7b4] sm:$0xf] }
 0x135   :  { %3145 = vmatpush.bf16.msrb.mxu3 %v2930_v19  ;;  %6284 = vmatmul.msk.bf16.vlgmr.msra.gmra.mxu2 %vm505_vm2, %v8617_v1  ;;  %v6622_v19 = vld [vmem:[%s9520_s0 + $0x874] sm:$0xf0]  ;;  %v6006_v18 = vld [vmem:[%s9520_s0 + $0x7f0] sm:$0xf0] }
 0x136   :  { %v6077_v34 = vor.u32 %v6622_v19, %v6076_v11  ;;  %v6012_v7 = vld [vmem:[%s9520_s0 + $0x7b8] sm:$0xf]  ;;  %v9000_v11 = vpop.permute.xlu0 %108 }
 0x137   :  { %3104 = vmatpush.bf16.msrb.mxu0 %v6197_v47  ;;  %3118 = vmatpush.bf16.msrb.mxu1 %v6201_v30  ;;  %v6004_v47 = vld [vmem:[%s9520_s0 + $0x7b0] sm:$0xf]  ;;  %v6606_v8 = vld [vmem:[%s9520_s0 + $0x7f4] sm:$0xf0]  ;;  %v1382_v19 = vadd.f32 %v8530_v59, %v9000_v11  ;;  %v613_v12 = vadd.f32 %v7965_v32, %v9000_v11  ;;  %v1396_v59 = vadd.f32 %v8601_v22, %v9000_v11 }
 0x138   :  { %3132 = vmatpush.bf16.msrb.mxu2 %v6205_v37  ;;  %v6605_v30 = vld [vmem:[%s9520_s0 + $0x7ec] sm:$0xf0]  ;;  %v8966_v37 = vpop.f32.mrf.mxu0  ;;  %v6013_v56 = vor.u32 %v6606_v8, %v6012_v7  ;;  %v1410_v32 = vadd.f32 %v8603_v41, %v9000_v11  ;;  %v627_v7 = vadd.f32 %v8018_v2, %v9000_v11  ;;  %v641_v8 = vadd.f32 %v8033_v6, %v9000_v11 }
 0x139   :  { %3146 = vmatpush.bf16.msrb.mxu3 %v6209_v38  ;;  %v8968_v38 = vpop.f32.mrf.mxu1  ;;  %v1557_v13 = vmax.f32 %v1382_v19, 0.0  ;;  %v1424_v2 = vadd.f32 %v8681_v48, %v9000_v11  ;;  %v1438_v6 = vadd.f32 %v8683_v0, %v9000_v11 }
 0x13a   :  { %v789_v19 = vmax.f32 %v627_v7, 0.0 }
 0x13b   :  { %3105 = vmatpush.bf16.msrb.mxu0 %v6133_v53  ;;  %3119 = vmatpush.bf16.msrb.mxu1 %v6137_v55  ;;  %v6005_v53 = vor.u32 %v6605_v30, %v6004_v47  ;;  %v6009_v55 = vor.u32 %v6597_v54, %v6006_v18  ;;  %v788_v47 = vmax.f32 %v613_v12, 0.0  ;;  %v790_v12 = vmax.f32 %v641_v8, 0.0 }
 0x13c   :  { %3133 = vmatpush.bf16.msrb.mxu2 %v6141_v14  ;;  %v8988_v14 = vpop.f32.mrf.mxu2  ;;  %v1560_v7 = vmax.f32 %v1424_v2, 0.0  ;;  %v1561_v8 = vmax.f32 %v1438_v6, 0.0  ;;  %v1452_v6 = vadd.f32 %v8754_v29, %v9000_v11 }
 0x13d   :  { %3147 = vmatpush.bf16.msrb.mxu3 %v6145_v9  ;;  %9549 = vst [vmem:[#allocation29_spill] sm:$0xff] %v8988_v14  ;;  %v8990_v9 = vpop.f32.mrf.mxu3  ;;  %v1589_v54 = vmax.f32 %v788_v47, %v1557_v13 }
 0x13e   :  { %9550 = vst [vmem:[#allocation30_spill] sm:$0xff] %v8990_v9 }
 0x13f   :  { %3106 = vmatpush.bf16.msrb.mxu0 %v6069_v23  ;;  %3120 = vmatpush.bf16.msrb.mxu1 %v6073_v52 }
 0x140   :  { %3134 = vmatpush.bf16.msrb.mxu2 %v6077_v34  ;;  %v8996_v15 = vpop.f32.mrf.mxu0 }
 0x141   :  { %3148 = vmatpush.bf16.msrb.mxu3 %v6081_v35  ;;  %v8998_v16 = vpop.f32.mrf.mxu1 }
 0x143   :  { %3107 = vmatpush.bf16.msrb.mxu0 %v6005_v53  ;;  %3121 = vmatpush.bf16.msrb.mxu1 %v6009_v55  ;;  %v1558_v53 = vmax.f32 %v1396_v59, 0.0  ;;  %v1559_v55 = vmax.f32 %v1410_v32, 0.0 }
 0x144   :  { %3135 = vmatpush.bf16.msrb.mxu2 %v6013_v56  ;;  %v9010_v23 = vpop.f32.mrf.mxu2 }
 0x145   :  { %3149 = vmatpush.bf16.msrb.mxu3 %v6017_v46  ;;  %v2182_v52 = vpop.f32.mrf.mxu3  ;;  %v1590_v13 = vmax.f32 %v789_v19, %v1558_v53 }
 0x146   :  { %6286 = vmatmul.msk.bf16.vlgmr.msrb.gmra.mxu0 %vm505_vm2, %v8617_v1  ;;  %6287 = vmatmul.msk.bf16.vlgmr.msrb.gmra.mxu1 %vm505_vm2, %v8617_v1  ;;  %v2183_v30 = vadd.f32 %v2182_v52, %v9000_v11  ;;  %v1591_v52 = vmax.f32 %v790_v12, %v1559_v55 }
 0x147   :  { %6288 = vmatmul.msk.bf16.vlgmr.msrb.gmra.mxu2 %vm505_vm2, %v8617_v1 }
 0x148   :  { %6289 = vmatmul.msk.bf16.vlgmr.msrb.gmra.mxu3 %vm505_vm2, %v8617_v1  ;;  %v9013_v34 = vpop.f32.mrf.mxu0  ;;  %v2358_v18 = vmax.f32 %v2183_v30, 0.0 }
 0x149   :  { %v9015_v35 = vpop.f32.mrf.mxu1 }
 0x14a   :  { %v9017_v1 = vmax.f32 %v1589_v54, %v2358_v18  ;;  %v655_v54 = vadd.f32 %v8102_v42, %v9000_v11  ;;  %v669_v18 = vadd.f32 %v8104_v43, %v9000_v11 }
 0x14c   :  { %v9027_v40 = vpop.f32.mrf.mxu2  ;;  %v792_v0 = vmax.f32 %v669_v18, 0.0 }
 0x14d   :  { %v9029_v51 = vpop.f32.mrf.mxu3 }
 0x14e   :  { %v1593_v43 = vmax.f32 %v792_v0, %v1561_v8 }
 0x150   :  { %v2196_v56 = vpop.f32.mrf.mxu0 }
 0x151   :  { %v2210_v46 = vpop.f32.mrf.mxu1  ;;  %v2197_v22 = vadd.f32 %v2196_v56, %v9000_v11 }
 0x152   :  { %v2211_v41 = vadd.f32 %v2210_v46, %v9000_v11  ;;  %v791_v46 = vmax.f32 %v655_v54, 0.0 }
 0x153   :  { %v2359_v47 = vmax.f32 %v2197_v22, 0.0 }
 0x154   :  { %v2360_v30 = vmax.f32 %v2211_v41, 0.0  ;;  %v2224_v48 = vpop.f32.mrf.mxu2  ;;  %v1592_v12 = vmax.f32 %v791_v46, %v1560_v7  ;;  %v1562_v7 = vmax.f32 %v1452_v6, 0.0 }
 0x155   :  { %v9041_v59 = vmax.f32 %v1590_v13, %v2359_v47  ;;  %v2238_v56 = vpop.f32.mrf.mxu3  ;;  %v2225_v53 = vadd.f32 %v2224_v48, %v9000_v11  ;;  %v683_v47 = vadd.f32 %v8166_v24, %v9000_v11  ;;  %v1480_v24 = vadd.f32 %v8829_v60, %v9000_v11 }
 0x156   :  { %v9043_v32 = vmax.f32 %v1591_v52, %v2360_v30  ;;  %v2239_v55 = vadd.f32 %v2238_v56, %v9000_v11  ;;  %v1466_v52 = vadd.f32 %v8756_v31, %v9000_v11  ;;  %v697_v30 = vadd.f32 %v8168_v25, %v9000_v11 }
 0x157   :  { %v2361_v22 = vmax.f32 %v2225_v53, 0.0  ;;  %v793_v46 = vmax.f32 %v683_v47, 0.0  ;;  %v1494_v25 = vadd.f32 %v8831_v49, %v9000_v11  ;;  %v1564_v47 = vmax.f32 %v1480_v24, 0.0 }
 0x158   :  { %v9047_v19 = vpop.f32.mrf.mxu0  ;;  %v2362_v41 = vmax.f32 %v2239_v55, 0.0  ;;  %v1563_v8 = vmax.f32 %v1466_v52, 0.0  ;;  %v794_v0 = vmax.f32 %v697_v30, 0.0 }
 0x159   :  { %v9049_v42 = vpop.f32.mrf.mxu1  ;;  %v9051_v13 = vmax.f32 %v1592_v12, %v2361_v22  ;;  %v1594_v53 = vmax.f32 %v793_v46, %v1562_v7  ;;  %v711_v22 = vadd.f32 %v8232_v62, %v9000_v11  ;;  %v1565_v30 = vmax.f32 %v1494_v25, 0.0 }
 0x15a   :  { %v9053_v2 = vmax.f32 %v1593_v43, %v2362_v41  ;;  %v1595_v55 = vmax.f32 %v794_v0, %v1563_v8  ;;  %v725_v41 = vadd.f32 %v8234_v63, %v9000_v11  ;;  %v1508_v25 = vadd.f32 %v8902_v39, %v9000_v11 }
 0x15c   :  { %v9063_v54 = vpop.f32.mrf.mxu2  ;;  %v796_v49 = vmax.f32 %v725_v41, 0.0 }
 0x15d   :  { %v9065_v18 = vpop.f32.mrf.mxu3 }
 0x15e   :  { %v1597_v63 = vmax.f32 %v796_v49, %v1565_v30 }
 0x160   :  { %v2252_v48 = vpop.f32.mrf.mxu0 }
 0x161   :  { %v2266_v56 = vpop.f32.mrf.mxu1  ;;  %v2253_v29 = vadd.f32 %v2252_v48, %v9000_v11 }
 0x162   :  { %v2267_v31 = vadd.f32 %v2266_v56, %v9000_v11  ;;  %v795_v56 = vmax.f32 %v711_v22, 0.0 }
 0x163   :  { %v2363_v12 = vmax.f32 %v2253_v29, 0.0 }
 0x164   :  { %v2364_v43 = vmax.f32 %v2267_v31, 0.0  ;;  %v1596_v0 = vmax.f32 %v795_v56, %v1564_v47  ;;  %v1566_v47 = vmax.f32 %v1508_v25, 0.0 }
 0x165   :  { %v9077_v6 = vmax.f32 %v1594_v53, %v2363_v12  ;;  %v739_v12 = vadd.f32 %v8314_v3, %v9000_v11  ;;  %v1536_v3 = vadd.f32 %v8956_v10, %v9000_v11 }
 0x166   :  { %v9079_v52 = vmax.f32 %v1595_v55, %v2364_v43  ;;  %v1522_v55 = vadd.f32 %v8904_v21, %v9000_v11  ;;  %v753_v43 = vadd.f32 %v8316_v4, %v9000_v11  ;;  %v1550_v4 = vadd.f32 %v8958_v27, %v9000_v11 }
 0x167   :  { %v2294_v48 = vpop.f32.mrf.mxu3  ;;  %v797_v56 = vmax.f32 %v739_v12, 0.0  ;;  %v1568_v12 = vmax.f32 %v1536_v3, 0.0  ;;  %v1340_v3 = vadd.f32 %v8453_v61, %v9000_v11 }
 0x168   :  { %v2280_v60 = vpop.f32.mrf.mxu2  ;;  %v2295_v8 = vadd.f32 %v2294_v48, %v9000_v11  ;;  %v9083_v46 = vpop.f32.mrf.mxu0  ;;  %v1567_v30 = vmax.f32 %v1522_v55, 0.0  ;;  %v798_v49 = vmax.f32 %v753_v43, 0.0  ;;  %v1569_v43 = vmax.f32 %v1550_v4, 0.0 }
 0x169   :  { %v2281_v7 = vadd.f32 %v2280_v60, %v9000_v11  ;;  %v9085_v62 = vpop.f32.mrf.mxu1  ;;  %v1354_v4 = vadd.f32 %v8455_v5, %v9000_v11  ;;  %v1554_v61 = vmax.f32 %v1340_v3, 0.0 }
 0x16a   :  { %v2366_v31 = vmax.f32 %v2295_v8, 0.0  ;;  %v1599_v8 = vmax.f32 %v798_v49, %v1567_v30 }
 0x16b   :  { %v2365_v29 = vmax.f32 %v2281_v7, 0.0  ;;  %v1598_v7 = vmax.f32 %v797_v56, %v1566_v47 }
 0x16c   :  { %v9089_v24 = vmax.f32 %v1597_v63, %v2366_v31  ;;  %v781_v31 = vadd.f32 %v8382_v45, %v9000_v11 }
 0x16d   :  { %v9087_v53 = vmax.f32 %v1596_v0, %v2365_v29  ;;  %v767_v29 = vadd.f32 %v8380_v44, %v9000_v11 }
 0x16e   :  { %v800_v27 = vmax.f32 %v781_v31, 0.0  ;;  %v2155_v31 = vadd.f32 %v8998_v16, %v9000_v11 }
 0x16f   :  { %v9101_v41 = vpop.f32.mrf.mxu3 }
 0x170   :  { %v9099_v22 = vpop.f32.mrf.mxu2  ;;  %v1601_v45 = vmax.f32 %v800_v27, %v1569_v43  ;;  %v2356_v27 = vmax.f32 %v2155_v31, 0.0 }
 0x173   :  { %v2308_v60 = vpop.f32.mrf.mxu0  ;;  %v2322_v48 = vpop.f32.mrf.mxu1 }
 0x174   :  { %v2309_v39 = vadd.f32 %v2308_v60, %v9000_v11  ;;  %v2323_v21 = vadd.f32 %v2322_v48, %v9000_v11  ;;  %v799_v48 = vmax.f32 %v767_v29, 0.0  ;;  %v2141_v29 = vadd.f32 %v8996_v15, %v9000_v11 }
 0x175   :  { %v1368_v15 = vadd.f32 %v8528_v57, %v9000_v11  ;;  %v2169_v57 = vadd.f32 %v9010_v23, %v9000_v11  ;;  %v9554_v23 = vld [vmem:[#allocation6_spill] sm:$0xff] }
 0x176   :  { %v2367_v0 = vmax.f32 %v2309_v39, 0.0  ;;  %v2368_v63 = vmax.f32 %v2323_v21, 0.0  ;;  %v1600_v49 = vmax.f32 %v799_v48, %v1568_v12  ;;  %v1555_v12 = vmax.f32 %v1354_v4, 0.0 }
 0x177   :  { %v1556_v31 = vmax.f32 %v1368_v15, 0.0 }
 0x178   :  { %v9113_v25 = vmax.f32 %v1598_v7, %v2367_v0  ;;  %v9115_v55 = vmax.f32 %v1599_v8, %v2368_v63  ;;  %v571_v0 = vadd.f32 %v7883_v58, %v9000_v11  ;;  %v585_v63 = vadd.f32 %v7885_v20, %v9000_v11 }
 0x179   :  { %v2355_v58 = vmax.f32 %v2141_v29, 0.0  ;;  %v599_v20 = vadd.f32 %v7954_v26, %v9000_v11 }
 0x17a   :  { %v786_v48 = vmax.f32 %v585_v63, 0.0 }
 0x17b   :  { %v2350_v60 = vpop.f32.mrf.mxu3  ;;  %v9119_v56 = vpop.f32.mrf.mxu0 }
 0x17c   :  { %v2336_v10 = vpop.f32.mrf.mxu2  ;;  %v2351_v30 = vadd.f32 %v2350_v60, %v9000_v11  ;;  %v9121_v44 = vpop.f32.mrf.mxu1  ;;  %v785_v60 = vmax.f32 %v571_v0, 0.0 }
 0x17d   :  { %v2337_v47 = vadd.f32 %v2336_v10, %v9000_v11  ;;  %v9143_v10 = vpop.permute.xlu0 %113 }
 0x17e   :  { %v2370_v21 = vmax.f32 %v2351_v30, 0.0  ;;  %v1586_v30 = vmax.f32 %v785_v60, %v1554_v61  ;;  %v1342_v3 = vadd.f32 %v8541_v17, %v9143_v10  ;;  %v587_v26 = vadd.f32 %v7969_v36, %v9143_v10  ;;  %v9553_v61 = vld [vmem:[#allocation20_spill] sm:$0xff] }
 0x17f   :  { %v2369_v39 = vmax.f32 %v2337_v47, 0.0  ;;  %v2143_v17 = vadd.f32 %v9013_v34, %v9143_v10 }
 0x180   :  { %v9129_v8 = vmax.f32 %v1601_v45, %v2370_v21  ;;  %v573_v21 = vadd.f32 %v7967_v33, %v9143_v10  ;;  %v2387_v4 = vmax.f32 %v1586_v30, %v2355_v58  ;;  %v787_v33 = vmax.f32 %v599_v20, 0.0 }
 0x181   :  { %v9127_v7 = vmax.f32 %v1600_v49, %v2369_v39  ;;  %v1587_v49 = vmax.f32 %v786_v48, %v1555_v12  ;;  %v1356_v12 = vadd.f32 %v9553_v61, %v9143_v10  ;;  %v1570_v36 = vmax.f32 %v1342_v3, 0.0 }
 0x182   :  { %v601_v58 = vadd.f32 %v9554_v23, %v9143_v10 }
 0x183   :  { %v9141_v5 = vpop.f32.mrf.mxu3  ;;  %v2388_v0 = vmax.f32 %v1587_v49, %v2356_v27  ;;  %v2157_v27 = vadd.f32 %v9015_v35, %v9143_v10  ;;  %v1588_v49 = vmax.f32 %v787_v33, %v1556_v31  ;;  %v2171_v31 = vadd.f32 %v9027_v40, %v9143_v10 }
 0x184   :  { %v9139_v43 = vpop.f32.mrf.mxu2  ;;  %9552 = vst [vmem:[#allocation32_spill] sm:$0xff] %v9141_v5  ;;  %v802_v5 = vmax.f32 %v587_v26, 0.0  ;;  %v1571_v26 = vmax.f32 %v1356_v12, 0.0  ;;  %v2185_v12 = vadd.f32 %v9029_v51, %v9143_v10 }
 0x185   :  { %9551 = vst [vmem:[#allocation31_spill] sm:$0xff] %v9139_v43  ;;  %v2372_v33 = vmax.f32 %v2157_v27, 0.0  ;;  %v2373_v43 = vmax.f32 %v2171_v31, 0.0 }
 0x186   :  { %v2374_v9 = vmax.f32 %v2185_v12, 0.0 }
 0x187   :  { %v2941_v47 = vpop.f32.mrf.mxu0  ;;  %v2955_v16 = vpop.f32.mrf.mxu1 }
 0x188   :  { %v2942_v45 = vadd.f32 %v2941_v47, %v9000_v11  ;;  %v2956_v39 = vadd.f32 %v2955_v16, %v9000_v11  ;;  %v801_v47 = vmax.f32 %v573_v21, 0.0  ;;  %v2357_v16 = vmax.f32 %v2169_v57, 0.0  ;;  %v9556_v57 = vld [vmem:[#allocation22_spill] sm:$0xff] }
 0x18a   :  { %v3156_v63 = vmax.f32 %v2942_v45, 0.0  ;;  %v3157_v29 = vmax.f32 %v2956_v39, 0.0  ;;  %v9555_v45 = vld [vmem:[#allocation21_spill] sm:$0xff] }
 0x18b   :  { %v1370_v20 = vadd.f32 %v9555_v45, %v9143_v10 }
 0x18c   :  { %v3188_v60 = vmax.f32 %v2387_v4, %v3156_v63  ;;  %v3189_v48 = vmax.f32 %v2388_v0, %v3157_v29  ;;  %v1384_v4 = vadd.f32 %v9556_v57, %v9143_v10  ;;  %v2389_v63 = vmax.f32 %v1588_v49, %v2357_v16 }
 0x18d   :  { %v2371_v29 = vmax.f32 %v2143_v17, 0.0  ;;  %v1603_v57 = vmax.f32 %v802_v5, %v1571_v26  ;;  %v803_v17 = vmax.f32 %v601_v58, 0.0 }
 0x18e   :  { %3220 = vst [vmem:[#allocation2] sm:$0xff] %v3188_v60  ;;  %v9557_v60 = vld [vmem:[#allocation7_spill] sm:$0xff] }
 0x18f   :  { %v2983_v30 = vpop.f32.mrf.mxu3  ;;  %3221 = vst [vmem:[#allocation2 + $0x8] sm:$0xff] %v3189_v48  ;;  %v2943_v21 = vpop.f32.mrf.mxu0  ;;  %v615_v48 = vadd.f32 %v9557_v60, %v9143_v10 }
 0x190   :  { %v2969_v15 = vpop.f32.mrf.mxu2  ;;  %v2984_v34 = vadd.f32 %v2983_v30, %v9000_v11  ;;  %v2957_v3 = vpop.f32.mrf.mxu1  ;;  %v2944_v35 = vadd.f32 %v2943_v21, %v9143_v10  ;;  %v1572_v30 = vmax.f32 %v1370_v20, 0.0 }
 0x191   :  { %v2970_v39 = vadd.f32 %v2969_v15, %v9000_v11  ;;  %v2958_v0 = vadd.f32 %v2957_v3, %v9143_v10  ;;  %v1602_v15 = vmax.f32 %v801_v47, %v1570_v36  ;;  %v1573_v3 = vmax.f32 %v1384_v4, 0.0 }
 0x192   :  { %v3159_v23 = vmax.f32 %v2984_v34, 0.0  ;;  %v3172_v21 = vmax.f32 %v2944_v35, 0.0  ;;  %v804_v40 = vmax.f32 %v615_v48, 0.0  ;;  %v1604_v34 = vmax.f32 %v803_v17, %v1572_v30 }
 0x193   :  { %v3158_v61 = vmax.f32 %v2970_v39, 0.0  ;;  %v3173_v16 = vmax.f32 %v2958_v0, 0.0  ;;  %v2403_v49 = vmax.f32 %v1602_v15, %v2371_v29  ;;  %v2404_v39 = vmax.f32 %v1603_v57, %v2372_v33 }
 0x194   :  { %v3191_v27 = vmax.f32 %v9017_v1, %v3159_v23  ;;  %v1605_v20 = vmax.f32 %v804_v40, %v1573_v3  ;;  %v2405_v26 = vmax.f32 %v1604_v34, %v2373_v43  ;;  %v2199_v57 = vadd.f32 %v9047_v19, %v9143_v10  ;;  %v9560_v3 = vld [vmem:[#allocation9_spill] sm:$0xff] }
 0x195   :  { %v3190_v45 = vmax.f32 %v2389_v63, %v3158_v61  ;;  %v3204_v47 = vmax.f32 %v2403_v49, %v3172_v21  ;;  %v3205_v58 = vmax.f32 %v2404_v39, %v3173_v16  ;;  %v643_v16 = vadd.f32 %v9560_v3, %v9143_v10  ;;  %v9561_v49 = vld [vmem:[#allocation24_spill] sm:$0xff] }
 0x196   :  { %v3279_v60 = vld [vmem:[#allocation2 + $0x1] ss:$8 sm:$0x3]  ;;  %v2406_v35 = vmax.f32 %v1605_v20, %v2374_v9  ;;  %3226 = vst [vmem:[#allocation2 + $0x28] sm:$0xff] %v3191_v27  ;;  %v9558_v9 = vld [vmem:[#allocation23_spill] sm:$0xff]  ;;  %v1412_v40 = vadd.f32 %v9561_v49, %v9143_v10  ;;  %v2213_v19 = vadd.f32 %v9049_v42, %v9143_v10 }
 0x197   :  { %3225 = vst [vmem:[#allocation2 + $0x20] sm:$0xff] %v3190_v45  ;;  %v2985_v51 = vpop.f32.mrf.mxu3  ;;  %v1398_v12 = vadd.f32 %v9558_v9, %v9143_v10  ;;  %v9559_v45 = vld [vmem:[#allocation8_spill] sm:$0xff]  ;;  %v2227_v9 = vadd.f32 %v9063_v54, %v9143_v10 }
 0x198   :  { %v2971_v14 = vpop.f32.mrf.mxu2  ;;  %3307 = vst [vmem:[#allocation1] ss:$9 sm:$0xff] %v3279_v60  ;;  %v2986_v5 = vadd.f32 %v2985_v51, %v9143_v10  ;;  %v629_v21 = vadd.f32 %v9559_v45, %v9143_v10  ;;  %v2241_v45 = vadd.f32 %v9065_v18, %v9143_v10 }
 0x199   :  { %v2972_v36 = vadd.f32 %v2971_v14, %v9143_v10  ;;  %3222 = vst [vmem:[#allocation2 + $0x10] sm:$0xff] %v3204_v47  ;;  %v1574_v17 = vmax.f32 %v1398_v12, 0.0  ;;  %v2375_v47 = vmax.f32 %v2199_v57, 0.0 }
 0x19a   :  { %v3175_v63 = vmax.f32 %v2986_v5, 0.0  ;;  %3223 = vst [vmem:[#allocation2 + $0x18] sm:$0xff] %v3205_v58  ;;  %v805_v34 = vmax.f32 %v629_v21, 0.0  ;;  %v806_v5 = vmax.f32 %v643_v16, 0.0  ;;  %v1575_v58 = vmax.f32 %v1412_v40, 0.0 }
 0x19b   :  { %v2997_v4 = vpop.f32.mrf.mxu0  ;;  %v3174_v0 = vmax.f32 %v2972_v36, 0.0  ;;  %v3011_v48 = vpop.f32.mrf.mxu1  ;;  %v2378_v40 = vmax.f32 %v2241_v45, 0.0 }
 0x19c   :  { %v2998_v29 = vadd.f32 %v2997_v4, %v9000_v11  ;;  %v3207_v31 = vmax.f32 %v2406_v35, %v3175_v63  ;;  %v3012_v43 = vadd.f32 %v3011_v48, %v9000_v11  ;;  %v1606_v20 = vmax.f32 %v805_v34, %v1574_v17  ;;  %v9562_v4 = vld [vmem:[#allocation10_spill] sm:$0xff]  ;;  %v9563_v35 = vld [vmem:[#allocation25_spill] sm:$0xff] }
 0x19d   :  { %v3206_v1 = vmax.f32 %v2405_v26, %v3174_v0  ;;  %v1426_v0 = vadd.f32 %v9563_v35, %v9143_v10 }
 0x19e   :  { %v3160_v61 = vmax.f32 %v2998_v29, 0.0  ;;  %3228 = vst [vmem:[#allocation2 + $0x38] sm:$0xff] %v3207_v31  ;;  %v3281_v33 = vld [vmem:[#allocation2 + $0x21] ss:$8 sm:$0x3]  ;;  %v3161_v15 = vmax.f32 %v3012_v43, 0.0  ;;  %v2407_v42 = vmax.f32 %v1606_v20, %v2375_v47 }
 0x19f   :  { %3227 = vst [vmem:[#allocation2 + $0x30] sm:$0xff] %v3206_v1  ;;  %v9564_v1 = vld [vmem:[#allocation26_spill] sm:$0xff] }
 0x1a0   :  { %v3192_v14 = vmax.f32 %v9041_v59, %v3160_v61  ;;  %3309 = vst [vmem:[#allocation1 + $0x1] ss:$9 sm:$0xff] %v3281_v33  ;;  %v3193_v39 = vmax.f32 %v9043_v32, %v3161_v15  ;;  %v657_v32 = vadd.f32 %v9562_v4, %v9143_v10  ;;  %v1440_v31 = vadd.f32 %v9564_v1, %v9143_v10  ;;  %v9565_v33 = vld [vmem:[#allocation11_spill] sm:$0xff] }
 0x1a1   :  { %v2376_v61 = vmax.f32 %v2213_v19, 0.0  ;;  %v671_v43 = vadd.f32 %v9565_v33, %v9143_v10 }
 0x1a2   :  { %3230 = vst [vmem:[#allocation2 + $0x40] sm:$0xff] %v3192_v14  ;;  %v1577_v16 = vmax.f32 %v1440_v31, 0.0  ;;  %v807_v49 = vmax.f32 %v657_v32, 0.0 }
 0x1a3   :  { %v3039_v30 = vpop.f32.mrf.mxu3  ;;  %v2999_v59 = vpop.f32.mrf.mxu0  ;;  %3231 = vst [vmem:[#allocation2 + $0x48] sm:$0xff] %v3193_v39 }
 0x1a4   :  { %v3025_v23 = vpop.f32.mrf.mxu2  ;;  %v3040_v27 = vadd.f32 %v3039_v30, %v9000_v11  ;;  %v3013_v51 = vpop.f32.mrf.mxu1  ;;  %v3000_v36 = vadd.f32 %v2999_v59, %v9143_v10  ;;  %v1607_v30 = vmax.f32 %v806_v5, %v1575_v58  ;;  %v1576_v59 = vmax.f32 %v1426_v0, 0.0 }
 0x1a5   :  { %v3026_v60 = vadd.f32 %v3025_v23, %v9000_v11  ;;  %v3014_v26 = vadd.f32 %v3013_v51, %v9143_v10 }
 0x1a6   :  { %v3163_v29 = vmax.f32 %v3040_v27, 0.0  ;;  %v3176_v14 = vmax.f32 %v3000_v36, 0.0  ;;  %v2408_v17 = vmax.f32 %v1607_v30, %v2376_v61  ;;  %v1608_v18 = vmax.f32 %v807_v49, %v1576_v59 }
 0x1a7   :  { %v3162_v63 = vmax.f32 %v3026_v60, 0.0  ;;  %v3177_v57 = vmax.f32 %v3014_v26, 0.0 }
 0x1a8   :  { %v3195_v23 = vmax.f32 %v9053_v2, %v3163_v29  ;;  %v3208_v21 = vmax.f32 %v2407_v42, %v3176_v14  ;;  %v808_v2 = vmax.f32 %v671_v43, 0.0  ;;  %v9566_v42 = vld [vmem:[#allocation27_spill] sm:$0xff] }
 0x1a9   :  { %v3194_v12 = vmax.f32 %v9051_v13, %v3162_v63  ;;  %v2377_v13 = vmax.f32 %v2227_v9, 0.0  ;;  %v3209_v60 = vmax.f32 %v2408_v17, %v3177_v57  ;;  %v1454_v61 = vadd.f32 %v9566_v42, %v9143_v10 }
 0x1aa   :  { %3236 = vst [vmem:[#allocation2 + $0x68] sm:$0xff] %v3195_v23  ;;  %v3283_v39 = vld [vmem:[#allocation2 + $0x41] ss:$8 sm:$0x3]  ;;  %v1609_v47 = vmax.f32 %v808_v2, %v1577_v16 }
 0x1ab   :  { %v3041_v15 = vpop.f32.mrf.mxu3  ;;  %3235 = vst [vmem:[#allocation2 + $0x60] sm:$0xff] %v3194_v12  ;;  %v2409_v36 = vmax.f32 %v1608_v18, %v2377_v13  ;;  %v9568_v12 = vld [vmem:[#allocation12_spill] sm:$0xff] }
 0x1ac   :  { %v3027_v48 = vpop.f32.mrf.mxu2  ;;  %v3042_v54 = vadd.f32 %v3041_v15, %v9143_v10  ;;  %3232 = vst [vmem:[#allocation2 + $0x50] sm:$0xff] %v3208_v21  ;;  %v2410_v20 = vmax.f32 %v1609_v47, %v2378_v40  ;;  %v685_v23 = vadd.f32 %v9568_v12, %v9143_v10  ;;  %v2255_v15 = vadd.f32 %v9083_v46, %v9143_v10  ;;  %v9569_v21 = vld [vmem:[#allocation13_spill] sm:$0xff] }
 0x1ad   :  { %v3028_v3 = vadd.f32 %v3027_v48, %v9143_v10  ;;  %3311 = vst [vmem:[#allocation1 + $0x2] ss:$9 sm:$0xff] %v3283_v39  ;;  %v9567_v48 = vld [vmem:[#allocation28_spill] sm:$0xff]  ;;  %v699_v57 = vadd.f32 %v9569_v21, %v9143_v10  ;;  %v1482_v46 = vadd.f32 %v8892_v28, %v9143_v10 }
 0x1ae   :  { %v3179_v19 = vmax.f32 %v3042_v54, 0.0  ;;  %3233 = vst [vmem:[#allocation2 + $0x58] sm:$0xff] %v3209_v60  ;;  %v1468_v33 = vadd.f32 %v9567_v48, %v9143_v10  ;;  %v809_v54 = vmax.f32 %v685_v23, 0.0  ;;  %v2379_v49 = vmax.f32 %v2255_v15, 0.0 }
 0x1af   :  { %v3053_v27 = vpop.f32.mrf.mxu0  ;;  %v3178_v51 = vmax.f32 %v3028_v3, 0.0  ;;  %v3067_v34 = vpop.f32.mrf.mxu1  ;;  %v1578_v3 = vmax.f32 %v1454_v61, 0.0  ;;  %v810_v2 = vmax.f32 %v699_v57, 0.0 }
 0x1b0   :  { %v3054_v5 = vadd.f32 %v3053_v27, %v9000_v11  ;;  %v3068_v58 = vadd.f32 %v3067_v34, %v9000_v11  ;;  %v3211_v32 = vmax.f32 %v2410_v20, %v3179_v19  ;;  %v1579_v16 = vmax.f32 %v1468_v33, 0.0  ;;  %v9570_v27 = vld [vmem:[#allocation14_spill] sm:$0xff]  ;;  %v9571_v19 = vld [vmem:[#allocation15_spill] sm:$0xff] }
 0x1b1   :  { %v3210_v4 = vmax.f32 %v2409_v36, %v3178_v51  ;;  %v713_v18 = vadd.f32 %v9570_v27, %v9143_v10  ;;  %v1610_v51 = vmax.f32 %v809_v54, %v1578_v3  ;;  %v2283_v34 = vadd.f32 %v9099_v22, %v9143_v10 }
 0x1b2   :  { %v3285_v26 = vld [vmem:[#allocation2 + $0x61] ss:$8 sm:$0x3]  ;;  %v3164_v0 = vmax.f32 %v3054_v5, 0.0  ;;  %v3165_v29 = vmax.f32 %v3068_v58, 0.0  ;;  %3238 = vst [vmem:[#allocation2 + $0x78] sm:$0xff] %v3211_v32  ;;  %v1611_v36 = vmax.f32 %v810_v2, %v1579_v16 }
 0x1b3   :  { %3313 = vst [vmem:[#allocation1 + $0x3] ss:$9 sm:$0xff] %v3285_v26  ;;  %v1580_v20 = vmax.f32 %v1482_v46, 0.0  ;;  %v811_v32 = vmax.f32 %v713_v18, 0.0 }
 0x1b4   :  { %3237 = vst [vmem:[#allocation2 + $0x70] sm:$0xff] %v3210_v4  ;;  %v3196_v14 = vmax.f32 %v9077_v6, %v3164_v0  ;;  %v3197_v43 = vmax.f32 %v9079_v52, %v3165_v29  ;;  %v2269_v6 = vadd.f32 %v9085_v62, %v9143_v10  ;;  %v1496_v62 = vadd.f32 %v8894_v50, %v9143_v10 }
 0x1b5   :  { %v2297_v50 = vadd.f32 %v9101_v41, %v9143_v10  ;;  %v1612_v42 = vmax.f32 %v811_v32, %v1580_v20 }
 0x1b6   :  { %3240 = vst [vmem:[#allocation2 + $0x80] sm:$0xff] %v3196_v14  ;;  %v2380_v40 = vmax.f32 %v2269_v6, 0.0  ;;  %v1581_v26 = vmax.f32 %v1496_v62, 0.0 }
 0x1b7   :  { %v3095_v63 = vpop.f32.mrf.mxu3  ;;  %v3055_v9 = vpop.f32.mrf.mxu0  ;;  %3241 = vst [vmem:[#allocation2 + $0x88] sm:$0xff] %v3197_v43 }
 0x1b8   :  { %v3081_v35 = vpop.f32.mrf.mxu2  ;;  %v3096_v31 = vadd.f32 %v3095_v63, %v9000_v11  ;;  %v3069_v45 = vpop.f32.mrf.mxu1  ;;  %v3056_v52 = vadd.f32 %v3055_v9, %v9143_v10  ;;  %v2412_v4 = vmax.f32 %v1611_v36, %v2380_v40 }
 0x1b9   :  { %v3082_v1 = vadd.f32 %v3081_v35, %v9000_v11  ;;  %v3070_v17 = vadd.f32 %v3069_v45, %v9143_v10  ;;  %v2381_v35 = vmax.f32 %v2283_v34, 0.0 }
 0x1ba   :  { %v3167_v59 = vmax.f32 %v3096_v31, 0.0  ;;  %v3180_v47 = vmax.f32 %v3056_v52, 0.0 }
 0x1bb   :  { %v3166_v30 = vmax.f32 %v3082_v1, 0.0  ;;  %v3181_v5 = vmax.f32 %v3070_v17, 0.0  ;;  %v2382_v1 = vmax.f32 %v2297_v50, 0.0  ;;  %v2413_v43 = vmax.f32 %v1612_v42, %v2381_v35  ;;  %v3263_v50 = vld [vmem:[#allocation2 + $0x40] ss:$8 sm:$0x3] }
 0x1bc   :  { %v3199_v39 = vmax.f32 %v9089_v24, %v3167_v59  ;;  %v2411_v24 = vmax.f32 %v1610_v51, %v2379_v49 }
 0x1bd   :  { %v3198_v13 = vmax.f32 %v9087_v53, %v3166_v30  ;;  %v727_v53 = vadd.f32 %v9571_v19, %v9143_v10  ;;  %v3213_v31 = vmax.f32 %v2412_v4, %v3181_v5  ;;  %v3261_v19 = vld [vmem:[#allocation2 + $0x20] ss:$8 sm:$0x3] }
 0x1be   :  { %3246 = vst [vmem:[#allocation2 + $0xa8] sm:$0xff] %v3199_v39  ;;  %v3287_v0 = vld [vmem:[#allocation2 + $0x81] ss:$8 sm:$0x3]  ;;  %v3212_v63 = vmax.f32 %v2411_v24, %v3180_v47  ;;  %v1510_v39 = vadd.f32 %v8966_v37, %v9143_v10 }
 0x1bf   :  { %v3097_v28 = vpop.f32.mrf.mxu3  ;;  %3245 = vst [vmem:[#allocation2 + $0xa0] sm:$0xff] %v3198_v13  ;;  %v812_v29 = vmax.f32 %v727_v53, 0.0  ;;  %v3259_v47 = vld [vmem:[#allocation2] ss:$8 sm:$0x3] }
 0x1c0   :  { %v3083_v60 = vpop.f32.mrf.mxu2  ;;  %v3098_v22 = vadd.f32 %v3097_v28, %v9143_v10  ;;  %3315 = vst [vmem:[#allocation1 + $0x4] ss:$9 sm:$0xff] %v3287_v0  ;;  %v1582_v51 = vmax.f32 %v1510_v39, 0.0  ;;  %v3267_v24 = vld [vmem:[#allocation2 + $0x80] ss:$8 sm:$0x3] }
 0x1c1   :  { %v3084_v58 = vadd.f32 %v3083_v60, %v9143_v10  ;;  %v1613_v48 = vmax.f32 %v812_v29, %v1581_v26  ;;  %3242 = vst [vmem:[#allocation2 + $0x90] sm:$0xff] %v3212_v63  ;;  %v2325_v60 = vadd.f32 %v9121_v44, %v9143_v10 }
 0x1c2   :  { %v3183_v33 = vmax.f32 %v3098_v22, 0.0  ;;  %3243 = vst [vmem:[#allocation2 + $0x98] sm:$0xff] %v3213_v31 }
 0x1c3   :  { %v3109_v41 = vpop.f32.mrf.mxu0  ;;  %v3182_v61 = vmax.f32 %v3084_v58, 0.0  ;;  %v3123_v14 = vpop.f32.mrf.mxu1  ;;  %v2414_v12 = vmax.f32 %v1613_v48, %v2382_v1  ;;  %v2384_v37 = vmax.f32 %v2325_v60, 0.0 }
 0x1c4   :  { %v3110_v9 = vadd.f32 %v3109_v41, %v9000_v11  ;;  %v3124_v23 = vadd.f32 %v3123_v14, %v9000_v11  ;;  %v9574_v41 = vld [vmem:[#allocation29_spill] sm:$0xff] }
 0x1c5   :  { %v3214_v30 = vmax.f32 %v2413_v43, %v3182_v61  ;;  %v3215_v45 = vmax.f32 %v2414_v12, %v3183_v33  ;;  %v1538_v42 = vadd.f32 %v9574_v41, %v9143_v10  ;;  %v9575_v61 = vld [vmem:[#allocation30_spill] sm:$0xff]  ;;  %v6291_v41 = vld [vmem:[%s9523_s3 + $0x28] sm:$0xff] }
 0x1c6   :  { %v3289_v15 = vld [vmem:[#allocation2 + $0xa1] ss:$8 sm:$0x3]  ;;  %v3168_v57 = vmax.f32 %v3110_v9, 0.0  ;;  %v3169_v59 = vmax.f32 %v3124_v23, 0.0  ;;  %v1552_v14 = vadd.f32 %v9575_v61, %v9143_v10  ;;  %v9577_v9 = vld [vmem:[#allocation19_spill] sm:$0xff] }
 0x1c7   :  { %3317 = vst [vmem:[#allocation1 + $0x5] ss:$9 sm:$0xff] %v3289_v15  ;;  %v3269_v4 = vld [vmem:[#allocation2 + $0xa0] ss:$8 sm:$0x3]  ;;  %v783_v12 = vadd.f32 %v9577_v9, %v9143_v10  ;;  %v9578_v23 = vld [vmem:[#allocation31_spill] sm:$0xff] }
 0x1c8   :  { %3247 = vst [vmem:[#allocation2 + $0xb0] sm:$0xff] %v3214_v30  ;;  %v3200_v16 = vmax.f32 %v9113_v25, %v3168_v57  ;;  %v3201_v17 = vmax.f32 %v9115_v55, %v3169_v59  ;;  %v9573_v25 = vld [vmem:[#allocation17_spill] sm:$0xff]  ;;  %v9576_v33 = vld [vmem:[#allocation18_spill] sm:$0xff]  ;;  %v2339_v15 = vadd.f32 %v9578_v23, %v9143_v10  ;;  %v1584_v57 = vmax.f32 %v1538_v42, 0.0 }
 0x1c9   :  { %3248 = vst [vmem:[#allocation2 + $0xb8] sm:$0xff] %v3215_v45  ;;  %v755_v55 = vadd.f32 %v9573_v25, %v9143_v10  ;;  %v769_v43 = vadd.f32 %v9576_v33, %v9143_v10  ;;  %v9579_v45 = vld [vmem:[#allocation32_spill] sm:$0xff]  ;;  %v1585_v59 = vmax.f32 %v1552_v14, 0.0  ;;  %v3438_v25 = vld [vmem:[#allocation2 + $0x42] ss:$8 sm:$0x3] }
 0x1ca   :  { %v3137_v21 = vpop.f32.mrf.mxu2  ;;  %3250 = vst [vmem:[#allocation2 + $0xc0] sm:$0xff] %v3200_v16  ;;  %v816_v16 = vmax.f32 %v783_v12, 0.0  ;;  %v3444_v60 = vld [vmem:[#allocation2 + $0xa2] ss:$8 sm:$0x3] }
 0x1cb   :  { %v3151_v6 = vpop.f32.mrf.mxu3  ;;  %v3138_v3 = vadd.f32 %v3137_v21, %v9000_v11  ;;  %3251 = vst [vmem:[#allocation2 + $0xc8] sm:$0xff] %v3201_v17  ;;  %v814_v18 = vmax.f32 %v755_v55, 0.0  ;;  %v3125_v5 = vpop.f32.mrf.mxu1  ;;  %v2353_v21 = vadd.f32 %v9579_v45, %v9143_v10  ;;  %v2385_v17 = vmax.f32 %v2339_v15, 0.0  ;;  %v3276_v61 = vld [vmem:[%s9523_s3 + $0x10] sm:$0x3]  ;;  %v3275_v33 = vld [vmem:[%s9523_s3 + $0x8] sm:$0xff] }
 0x1cc   :  { %v3152_v52 = vadd.f32 %v3151_v6, %v9000_v11  ;;  %v9572_v11 = vld [vmem:[#allocation16_spill] sm:$0xff]  ;;  %v3126_v26 = vadd.f32 %v3125_v5, %v9143_v10  ;;  %v3533_v5 = vld [vmem:[#allocation2 + $0xa3] ss:$8 sm:$0x3]  ;;  %v3277_v14 = vld [vmem:[%s9523_s3 + $0x18] sm:$0x3]  ;;  %3407 = vmatpush.xpose.msra.mxu2 %v3276_v61 }
 0x1cd   :  { %v3170_v54 = vmax.f32 %v3138_v3, 0.0  ;;  %v741_v40 = vadd.f32 %v9572_v11, %v9143_v10  ;;  %3427 = vmatpush.xpose.msra.mxu3 %v3277_v14  ;;  %v3703_v9 = vld [vmem:[#allocation2 + $0x25] ss:$8 sm:$0x3]  ;;  %v6320_v14 = vld [vmem:[%s9523_s3 + $0x110] sm:$0x3] }
 0x1ce   :  { %v3171_v46 = vmax.f32 %v3152_v52, 0.0  ;;  %v3185_v0 = vmax.f32 %v3126_v26, 0.0  ;;  %v815_v52 = vmax.f32 %v769_v43, 0.0  ;;  %v3616_v26 = vld [vmem:[#allocation2 + $0x44] ss:$8 sm:$0x3] }
 0x1cf   :  { %v3202_v49 = vmax.f32 %v9127_v7, %v3170_v54  ;;  %v1524_v7 = vadd.f32 %v8968_v38, %v9143_v10  ;;  %v813_v27 = vmax.f32 %v741_v40, 0.0  ;;  %v3265_v38 = vld [vmem:[#allocation2 + $0x60] ss:$8 sm:$0x3]  ;;  %v2386_v54 = vmax.f32 %v2353_v21, 0.0 }
 0x1d0   :  { %v3203_v13 = vmax.f32 %v9129_v8, %v3171_v46  ;;  %v2311_v8 = vadd.f32 %v9119_v56, %v9143_v10  ;;  %v3111_v56 = vpop.f32.mrf.mxu0  ;;  %v3434_v46 = vld [vmem:[#allocation2 + $0x2] ss:$8 sm:$0x3]  ;;  %v1617_v40 = vmax.f32 %v816_v16, %v1585_v59  ;;  %v3701_v43 = vld [vmem:[#allocation2 + $0x5] ss:$8 sm:$0x3] }
 0x1d1   :  { %3255 = vst [vmem:[#allocation2 + $0xe0] sm:$0xff] %v3202_v49  ;;  %v1583_v34 = vmax.f32 %v1524_v7, 0.0  ;;  %v1614_v20 = vmax.f32 %v813_v27, %v1582_v51  ;;  %v3112_v58 = vadd.f32 %v3111_v56, %v9143_v10  ;;  %v3440_v7 = vld [vmem:[#allocation2 + $0x62] ss:$8 sm:$0x3]  ;;  %3428 = vmatpush.xpose.msra.mxu3 %v3275_v33 }
 0x1d2   :  { %3256 = vst [vmem:[#allocation2 + $0xe8] sm:$0xff] %v3203_v13  ;;  %v3291_v2 = vld [vmem:[#allocation2 + $0xc1] ss:$8 sm:$0x3]  ;;  %v2383_v28 = vmax.f32 %v2311_v8, 0.0  ;;  %v3139_v48 = vpop.f32.mrf.mxu2 }
 0x1d3   :  { %3319 = vst [vmem:[#allocation1 + $0x6] ss:$9 sm:$0xff] %v3291_v2  ;;  %v1615_v44 = vmax.f32 %v814_v18, %v1583_v34  ;;  %v3184_v35 = vmax.f32 %v3112_v58, 0.0  ;;  %v3271_v63 = vld [vmem:[#allocation2 + $0xc0] ss:$8 sm:$0x3]  ;;  %v3153_v30 = vpop.f32.mrf.mxu3  ;;  %v3140_v6 = vadd.f32 %v3139_v48, %v9143_v10  ;;  %v1616_v2 = vmax.f32 %v815_v52, %v1584_v57 }
 0x1d4   :  { %v2415_v22 = vmax.f32 %v1614_v20, %v2383_v28  ;;  %v3154_v3 = vadd.f32 %v3153_v30, %v9143_v10  ;;  %v2418_v10 = vmax.f32 %v1617_v40, %v2386_v54  ;;  %v3442_v8 = vld [vmem:[#allocation2 + $0x82] ss:$8 sm:$0x3]  ;;  %v3531_v56 = vld [vmem:[#allocation2 + $0x83] ss:$8 sm:$0x3] }
 0x1d5   :  { %v2416_v32 = vmax.f32 %v1615_v44, %v2384_v37  ;;  %v3186_v11 = vmax.f32 %v3140_v6, 0.0  ;;  %v2417_v39 = vmax.f32 %v1616_v2, %v2385_v17  ;;  %v3446_v18 = vld [vmem:[#allocation2 + $0xc2] ss:$8 sm:$0x3]  ;;  %v3274_v48 = vld [vmem:[%s9523_s3] sm:$0xff] }
 0x1d6   :  { %v3216_v1 = vmax.f32 %v2415_v22, %v3184_v35  ;;  %v3187_v55 = vmax.f32 %v3154_v3, 0.0  ;;  %v3525_v37 = vld [vmem:[#allocation2 + $0x23] ss:$8 sm:$0x3]  ;;  %3408 = vmatpush.xpose.msra.mxu2 %v3274_v48  ;;  %v6294_v57 = vld [vmem:[%s9523_s3 + $0x40] sm:$0xff] }
 0x1d7   :  { %v3217_v31 = vmax.f32 %v2416_v32, %v3185_v0  ;;  %v3218_v27 = vmax.f32 %v2417_v39, %v3186_v11  ;;  %v3535_v20 = vld [vmem:[#allocation2 + $0xc3] ss:$8 sm:$0x3]  ;;  %v3614_v58 = vld [vmem:[#allocation2 + $0x24] ss:$8 sm:$0x3] }
 0x1d8   :  { %3252 = vst [vmem:[#allocation2 + $0xd0] sm:$0xff] %v3216_v1  ;;  %v3219_v51 = vmax.f32 %v2418_v10, %v3187_v55  ;;  %v3618_v32 = vld [vmem:[#allocation2 + $0x64] ss:$8 sm:$0x3]  ;;  %v6300_v52 = vld [vmem:[%s9523_s3 + $0x70] sm:$0x3] }
 0x1d9   :  { %v3293_v62 = vld [vmem:[#allocation2 + $0xe1] ss:$8 sm:$0x3]  ;;  %v3273_v29 = vld [vmem:[#allocation2 + $0xe0] ss:$8 sm:$0x3] }
 0x1da   :  { %3321 = vst [vmem:[#allocation1 + $0x7] ss:$9 sm:$0xff] %v3293_v62  ;;  %v3436_v62 = vld [vmem:[#allocation2 + $0x22] ss:$8 sm:$0x3]  ;;  %3584 = vmatpush.xpose.msrb.mxu2 %v6300_v52  ;;  %v6298_v17 = vld [vmem:[%s9523_s3 + $0x60] sm:$0xff] }
 0x1db   :  { %3253 = vst [vmem:[#allocation2 + $0xd8] sm:$0xff] %v3217_v31  ;;  %v3448_v34 = vld [vmem:[#allocation2 + $0xe2] ss:$8 sm:$0x3]  ;;  %v6290_v31 = vld [vmem:[%s9523_s3 + $0x20] sm:$0xff] }
 0x1dc   :  { %3257 = vst [vmem:[#allocation2 + $0xf0] sm:$0xff] %v3218_v27  ;;  %v3537_v44 = vld [vmem:[#allocation2 + $0xe3] ss:$8 sm:$0x3]  ;;  %v6301_v16 = vld [vmem:[%s9523_s3 + $0x78] sm:$0x3] }
 0x1dd   :  { %3258 = vst [vmem:[#allocation2 + $0xf8] sm:$0xff] %v3219_v51  ;;  %v3620_v35 = vld [vmem:[#allocation2 + $0x84] ss:$8 sm:$0x3]  ;;  %3604 = vmatpush.xpose.msrb.mxu3 %v6301_v16  ;;  %v6304_v40 = vld [vmem:[%s9523_s3 + $0x90] sm:$0x3] }
 0x1de   :  { %v3622_v0 = vld [vmem:[#allocation2 + $0xa4] ss:$8 sm:$0x3]  ;;  %v3705_v12 = vld [vmem:[#allocation2 + $0x45] ss:$8 sm:$0x3]  ;;  %3585 = vmatpush.xpose.msrb.mxu2 %v6298_v17 }
 0x1df   :  { %v3624_v1 = vld [vmem:[#allocation2 + $0xc4] ss:$8 sm:$0x3]  ;;  %v3707_v30 = vld [vmem:[#allocation2 + $0x65] ss:$8 sm:$0x3] }
 0x1e0   :  { %v3626_v42 = vld [vmem:[#allocation2 + $0xe4] ss:$8 sm:$0x3]  ;;  %v3709_v45 = vld [vmem:[#allocation2 + $0x85] ss:$8 sm:$0x3] }
 0x1e1   :  { %v9276_v53 = vld [vmem:[#allocation1] sm:$0xff]  ;;  %v9278_v36 = vld [vmem:[#allocation1 + $0x9] sm:$0xff]  ;;  %v6321_v48 = vld [vmem:[%s9523_s3 + $0x118] sm:$0x3] }
 0x1e2   :  { %3374 = vst [vmem:[#allocation1] ss:$9 sm:$0xff] %v3259_v47  ;;  %v3523_v47 = vld [vmem:[#allocation2 + $0x3] ss:$8 sm:$0x3]  ;;  %v6302_v10 = vld [vmem:[%s9523_s3 + $0x80] sm:$0xff] }
 0x1e3   :  { %3376 = vst [vmem:[#allocation1 + $0x1] ss:$9 sm:$0xff] %v3261_v19  ;;  %v3711_v21 = vld [vmem:[#allocation2 + $0xa5] ss:$8 sm:$0x3] }
 0x1e4   :  { %3378 = vst [vmem:[#allocation1 + $0x2] ss:$9 sm:$0xff] %v3263_v50  ;;  %v3527_v50 = vld [vmem:[#allocation2 + $0x43] ss:$8 sm:$0x3] }
 0x1e5   :  { %3380 = vst [vmem:[#allocation1 + $0x3] ss:$9 sm:$0xff] %v3265_v38  ;;  %v3529_v38 = vld [vmem:[#allocation2 + $0x63] ss:$8 sm:$0x3] }
 0x1e6   :  { %3382 = vst [vmem:[#allocation1 + $0x4] ss:$9 sm:$0xff] %v3267_v24  ;;  %v3612_v24 = vld [vmem:[#allocation2 + $0x4] ss:$8 sm:$0x3] }
 0x1e7   :  { %3384 = vst [vmem:[#allocation1 + $0x5] ss:$9 sm:$0xff] %v3269_v4  ;;  %v6295_v6 = vld [vmem:[%s9523_s3 + $0x48] sm:$0xff]  ;;  %v6308_v27 = vld [vmem:[%s9523_s3 + $0xb0] sm:$0x3] }
 0x1e8   :  { %3386 = vst [vmem:[#allocation1 + $0x6] ss:$9 sm:$0xff] %v3271_v63  ;;  %v6292_v63 = vld [vmem:[%s9523_s3 + $0x30] sm:$0x3]  ;;  %v6299_v54 = vld [vmem:[%s9523_s3 + $0x68] sm:$0xff] }
 0x1e9   :  { %3388 = vst [vmem:[#allocation1 + $0x7] ss:$9 sm:$0xff] %v3273_v29  ;;  %v6293_v29 = vld [vmem:[%s9523_s3 + $0x38] sm:$0x3]  ;;  %3340 = vmatpush.xpose.msra.mxu0 %v6292_v63  ;;  %3605 = vmatpush.xpose.msrb.mxu3 %v6299_v54  ;;  %v6328_v17 = vld [vmem:[%s9523_s3 + $0x150] sm:$0x3] }
 0x1ea   :  { %3360 = vmatpush.xpose.msra.mxu1 %v6293_v29  ;;  %v3713_v59 = vld [vmem:[#allocation2 + $0xc5] ss:$8 sm:$0x3]  ;;  %v3796_v11 = vld [vmem:[#allocation2 + $0x66] ss:$8 sm:$0x3] }
 0x1eb   :  { %v3715_v3 = vld [vmem:[#allocation2 + $0xe5] ss:$8 sm:$0x3]  ;;  %v3798_v55 = vld [vmem:[#allocation2 + $0x86] ss:$8 sm:$0x3] }
 0x1ec   :  { %v3800_v39 = vld [vmem:[#allocation2 + $0xa6] ss:$8 sm:$0x3]  ;;  %v3879_v51 = vld [vmem:[#allocation2 + $0x7] ss:$8 sm:$0x3] }
 0x1ed   :  { %3341 = vmatpush.xpose.msra.mxu0 %v6290_v31  ;;  %v3972_v31 = vld [vmem:[#allocation2 + $0x50] ss:$8 sm:$0x3]  ;;  %v4065_v52 = vld [vmem:[#allocation2 + $0x91] ss:$8 sm:$0x3] }
 0x1ee   :  { %3361 = vmatpush.xpose.msra.mxu1 %v6291_v41  ;;  %v6315_v41 = vld [vmem:[%s9523_s3 + $0xe8] sm:$0xff]  ;;  %v3976_v61 = vld [vmem:[#allocation2 + $0x90] ss:$8 sm:$0x3] }
 0x1ef   :  { %v3978_v33 = vld [vmem:[#allocation2 + $0xb0] ss:$8 sm:$0x3]  ;;  %v4067_v16 = vld [vmem:[#allocation2 + $0xb1] ss:$8 sm:$0x3] }
 0x1f0   :  { %v9296_v49 = vld [vmem:[#allocation1] sm:$0xff]  ;;  %v9298_v13 = vld [vmem:[#allocation1 + $0x9] sm:$0xff]  ;;  %3342 = vmatmul.f32.vlgmr.msra.gmra.mxu0 %v9276_v53  ;;  %v6329_v54 = vld [vmem:[%s9523_s3 + $0x158] sm:$0x3] }
 0x1f1   :  { %3462 = vst [vmem:[#allocation1] ss:$9 sm:$0xff] %v3434_v46  ;;  %3362 = vmatmul.f32.vlgmr.msra.gmra.mxu1 %v9278_v36  ;;  %v6296_v53 = vld [vmem:[%s9523_s3 + $0x50] sm:$0x3]  ;;  %v6297_v36 = vld [vmem:[%s9523_s3 + $0x58] sm:$0x3]  ;;  %3409 = vmatmul.f32.vlgmr.msra.gmra.mxu2 %v9296_v49 }
 0x1f2   :  { %3464 = vst [vmem:[#allocation1 + $0x1] ss:$9 sm:$0xff] %v3436_v62  ;;  %3429 = vmatmul.f32.vlgmr.msra.gmra.mxu3 %v9298_v13  ;;  %3495 = vmatpush.xpose.msrb.mxu0 %v6296_v53  ;;  %v3790_v46 = vld [vmem:[#allocation2 + $0x6] ss:$8 sm:$0x3] }
 0x1f3   :  { %3466 = vst [vmem:[#allocation1 + $0x2] ss:$9 sm:$0xff] %v3438_v25  ;;  %3515 = vmatpush.xpose.msrb.mxu1 %v6297_v36  ;;  %v3792_v49 = vld [vmem:[#allocation2 + $0x26] ss:$8 sm:$0x3]  ;;  %3762 = vmatpush.xpose.msra.mxu2 %v6308_v27 }
 0x1f4   :  { %3468 = vst [vmem:[#allocation1 + $0x3] ss:$9 sm:$0xff] %v3440_v7  ;;  %v3794_v13 = vld [vmem:[#allocation2 + $0x46] ss:$8 sm:$0x3] }
 0x1f5   :  { %3470 = vst [vmem:[#allocation1 + $0x4] ss:$9 sm:$0xff] %v3442_v8  ;;  %v6305_v25 = vld [vmem:[%s9523_s3 + $0x98] sm:$0x3]  ;;  %v6303_v8 = vld [vmem:[%s9523_s3 + $0x88] sm:$0xff] }
 0x1f6   :  { %3472 = vst [vmem:[#allocation1 + $0x5] ss:$9 sm:$0xff] %v3444_v60  ;;  %3496 = vmatpush.xpose.msrb.mxu0 %v6294_v57  ;;  %v3802_v7 = vld [vmem:[#allocation2 + $0xc6] ss:$8 sm:$0x3] }
 0x1f7   :  { %3474 = vst [vmem:[#allocation1 + $0x6] ss:$9 sm:$0xff] %v3446_v18  ;;  %3516 = vmatpush.xpose.msrb.mxu1 %v6295_v6  ;;  %v3804_v60 = vld [vmem:[#allocation2 + $0xe6] ss:$8 sm:$0x3]  ;;  %v6322_v6 = vld [vmem:[%s9523_s3 + $0x120] sm:$0xff] }
 0x1f8   :  { %3476 = vst [vmem:[#allocation1 + $0x7] ss:$9 sm:$0xff] %v3448_v34  ;;  %v6309_v18 = vld [vmem:[%s9523_s3 + $0xb8] sm:$0x3] }
 0x1f9   :  { %3782 = vmatpush.xpose.msra.mxu3 %v6309_v18  ;;  %v3881_v34 = vld [vmem:[#allocation2 + $0x27] ss:$8 sm:$0x3]  ;;  %v6325_v53 = vld [vmem:[%s9523_s3 + $0x138] sm:$0x3] }
 0x1fa   :  { %3673 = vmatpush.xpose.msra.mxu0 %v6304_v40  ;;  %v4057_v36 = vld [vmem:[#allocation2 + $0x11] ss:$8 sm:$0x3]  ;;  %v4146_v40 = vld [vmem:[#allocation2 + $0x12] ss:$8 sm:$0x3] }
 0x1fb   :  { %3693 = vmatpush.xpose.msra.mxu1 %v6305_v25  ;;  %v4148_v25 = vld [vmem:[#allocation2 + $0x32] ss:$8 sm:$0x3] }
 0x1fc   :  { %v4154_v27 = vld [vmem:[#allocation2 + $0x92] ss:$8 sm:$0x3] }
 0x1fd   :  { %v4156_v18 = vld [vmem:[#allocation2 + $0xb2] ss:$8 sm:$0x3] }
 0x1fe   :  { %3674 = vmatpush.xpose.msra.mxu0 %v6302_v10  ;;  %v4152_v10 = vld [vmem:[#allocation2 + $0x72] ss:$8 sm:$0x3] }
 0x1ff   :  { %v9300_v28 = vld [vmem:[#allocation1] sm:$0xff]  ;;  %v9302_v19 = vld [vmem:[#allocation1 + $0x9] sm:$0xff]  ;;  %3694 = vmatpush.xpose.msra.mxu1 %v6303_v8 }
 0x200   :  { %3551 = vst [vmem:[#allocation1] ss:$9 sm:$0xff] %v3523_v47  ;;  %3497 = vmatmul.f32.vlgmr.msrb.gmra.mxu0 %v9300_v28  ;;  %3517 = vmatmul.f32.vlgmr.msrb.gmra.mxu1 %v9302_v19  ;;  %v6306_v47 = vld [vmem:[%s9523_s3 + $0xa0] sm:$0xff]  ;;  %v6307_v28 = vld [vmem:[%s9523_s3 + $0xa8] sm:$0xff] }
 0x201   :  { %3553 = vst [vmem:[#allocation1 + $0x1] ss:$9 sm:$0xff] %v3525_v37  ;;  %v3883_v19 = vld [vmem:[#allocation2 + $0x47] ss:$8 sm:$0x3]  ;;  %3763 = vmatpush.xpose.msra.mxu2 %v6306_v47  ;;  %3783 = vmatpush.xpose.msra.mxu3 %v6307_v28  ;;  %v6330_v8 = vld [vmem:[%s9523_s3 + $0x160] sm:$0xff] }
 0x202   :  { %3555 = vst [vmem:[#allocation1 + $0x2] ss:$9 sm:$0xff] %v3527_v50  ;;  %v6337_v47 = vld [vmem:[%s9523_s3 + $0x198] sm:$0x3] }
 0x203   :  { %3557 = vst [vmem:[#allocation1 + $0x3] ss:$9 sm:$0xff] %v3529_v38  ;;  %v3885_v38 = vld [vmem:[#allocation2 + $0x67] ss:$8 sm:$0x3] }
 0x204   :  { %3559 = vst [vmem:[#allocation1 + $0x4] ss:$9 sm:$0xff] %v3531_v56  ;;  %v3887_v56 = vld [vmem:[#allocation2 + $0x87] ss:$8 sm:$0x3] }
 0x205   :  { %3561 = vst [vmem:[#allocation1 + $0x5] ss:$9 sm:$0xff] %v3533_v5  ;;  %v6312_v5 = vld [vmem:[%s9523_s3 + $0xd0] sm:$0x3] }
 0x206   :  { %3563 = vst [vmem:[#allocation1 + $0x6] ss:$9 sm:$0xff] %v3535_v20  ;;  %v6313_v20 = vld [vmem:[%s9523_s3 + $0xd8] sm:$0x3]  ;;  %3851 = vmatpush.xpose.msrb.mxu0 %v6312_v5 }
 0x207   :  { %3565 = vst [vmem:[#allocation1 + $0x7] ss:$9 sm:$0xff] %v3537_v44  ;;  %v3889_v44 = vld [vmem:[#allocation2 + $0xa7] ss:$8 sm:$0x3]  ;;  %3871 = vmatpush.xpose.msrb.mxu1 %v6313_v20 }
 0x208   :  { %v4160_v28 = vld [vmem:[#allocation2 + $0xf2] ss:$8 sm:$0x3]  ;;  %v4239_v20 = vld [vmem:[#allocation2 + $0x53] ss:$8 sm:$0x3] }
 0x20e   :  { %v9304_v4 = vld [vmem:[#allocation1] sm:$0xff]  ;;  %v9306_v22 = vld [vmem:[#allocation1 + $0x9] sm:$0xff] }
 0x20f   :  { %3640 = vst [vmem:[#allocation1] ss:$9 sm:$0xff] %v3612_v24  ;;  %3586 = vmatmul.f32.vlgmr.msrb.gmra.mxu2 %v9304_v4  ;;  %3606 = vmatmul.f32.vlgmr.msrb.gmra.mxu3 %v9306_v22  ;;  %v3891_v24 = vld [vmem:[#allocation2 + $0xc7] ss:$8 sm:$0x3] }
 0x210   :  { %3642 = vst [vmem:[#allocation1 + $0x1] ss:$9 sm:$0xff] %v3614_v58  ;;  %v3893_v58 = vld [vmem:[#allocation2 + $0xe7] ss:$8 sm:$0x3] }
 0x211   :  { %3644 = vst [vmem:[#allocation1 + $0x2] ss:$9 sm:$0xff] %v3616_v26  ;;  %v6310_v26 = vld [vmem:[%s9523_s3 + $0xc0] sm:$0xff]  ;;  %v6311_v4 = vld [vmem:[%s9523_s3 + $0xc8] sm:$0xff]  ;;  %v6316_v22 = vld [vmem:[%s9523_s3 + $0xf0] sm:$0x3] }
 0x212   :  { %3646 = vst [vmem:[#allocation1 + $0x3] ss:$9 sm:$0xff] %v3618_v32  ;;  %3852 = vmatpush.xpose.msrb.mxu0 %v6310_v26  ;;  %3872 = vmatpush.xpose.msrb.mxu1 %v6311_v4  ;;  %v6317_v32 = vld [vmem:[%s9523_s3 + $0xf8] sm:$0x3]  ;;  %v6340_v4 = vld [vmem:[%s9523_s3 + $0x1b0] sm:$0x3] }
 0x213   :  { %3648 = vst [vmem:[#allocation1 + $0x4] ss:$9 sm:$0xff] %v3620_v35  ;;  %3940 = vmatpush.xpose.msrb.mxu2 %v6316_v22  ;;  %3960 = vmatpush.xpose.msrb.mxu3 %v6317_v32  ;;  %v3968_v35 = vld [vmem:[#allocation2 + $0x10] ss:$8 sm:$0x3] }
 0x214   :  { %3650 = vst [vmem:[#allocation1 + $0x5] ss:$9 sm:$0xff] %v3622_v0  ;;  %v3970_v0 = vld [vmem:[#allocation2 + $0x30] ss:$8 sm:$0x3] }
 0x215   :  { %3652 = vst [vmem:[#allocation1 + $0x6] ss:$9 sm:$0xff] %v3624_v1  ;;  %v6314_v1 = vld [vmem:[%s9523_s3 + $0xe0] sm:$0xff]  ;;  %v6341_v22 = vld [vmem:[%s9523_s3 + $0x1b8] sm:$0x3] }
 0x216   :  { %3654 = vst [vmem:[#allocation1 + $0x7] ss:$9 sm:$0xff] %v3626_v42  ;;  %v3974_v42 = vld [vmem:[#allocation2 + $0x70] ss:$8 sm:$0x3] }
 0x217   :  { %3941 = vmatpush.xpose.msrb.mxu2 %v6314_v1  ;;  %3961 = vmatpush.xpose.msrb.mxu3 %v6315_v41  ;;  %v4247_v26 = vld [vmem:[#allocation2 + $0xd3] ss:$8 sm:$0x3]  ;;  %v4328_v41 = vld [vmem:[#allocation2 + $0x54] ss:$8 sm:$0x3] }
 0x218   :  { %v4249_v32 = vld [vmem:[#allocation2 + $0xf3] ss:$8 sm:$0x3] }
 0x21d   :  { %v9334_v23 = vld [vmem:[#allocation1] sm:$0xff]  ;;  %v9336_v15 = vld [vmem:[#allocation1 + $0x9] sm:$0xff] }
 0x21e   :  { %3729 = vst [vmem:[#allocation1] ss:$9 sm:$0xff] %v3701_v43  ;;  %3675 = vmatmul.f32.vlgmr.msra.gmra.mxu0 %v9334_v23  ;;  %3695 = vmatmul.f32.vlgmr.msra.gmra.mxu1 %v9336_v15  ;;  %v3980_v43 = vld [vmem:[#allocation2 + $0xd0] ss:$8 sm:$0x3]  ;;  %v6319_v23 = vld [vmem:[%s9523_s3 + $0x108] sm:$0xff] }
 0x21f   :  { %3731 = vst [vmem:[#allocation1 + $0x1] ss:$9 sm:$0xff] %v3703_v9  ;;  %4029 = vmatpush.xpose.msra.mxu0 %v6320_v14  ;;  %4049 = vmatpush.xpose.msra.mxu1 %v6321_v48  ;;  %v3982_v9 = vld [vmem:[#allocation2 + $0xf0] ss:$8 sm:$0x3] }
 0x220   :  { %3733 = vst [vmem:[#allocation1 + $0x2] ss:$9 sm:$0xff] %v3705_v12  ;;  %v6318_v12 = vld [vmem:[%s9523_s3 + $0x100] sm:$0xff]  ;;  %v6324_v15 = vld [vmem:[%s9523_s3 + $0x130] sm:$0x3] }
 0x221   :  { %3735 = vst [vmem:[#allocation1 + $0x3] ss:$9 sm:$0xff] %v3707_v30  ;;  %v4059_v30 = vld [vmem:[#allocation2 + $0x31] ss:$8 sm:$0x3] }
 0x222   :  { %3737 = vst [vmem:[#allocation1 + $0x4] ss:$9 sm:$0xff] %v3709_v45  ;;  %v4061_v45 = vld [vmem:[#allocation2 + $0x51] ss:$8 sm:$0x3] }
 0x223   :  { %3739 = vst [vmem:[#allocation1 + $0x5] ss:$9 sm:$0xff] %v3711_v21  ;;  %4030 = vmatpush.xpose.msra.mxu0 %v6318_v12  ;;  %4050 = vmatpush.xpose.msra.mxu1 %v6319_v23  ;;  %v4334_v14 = vld [vmem:[#allocation2 + $0xb4] ss:$8 sm:$0x3]  ;;  %v6343_v23 = vld [vmem:[%s9523_s3 + $0x1c8] sm:$0xff] }
 0x224   :  { %3741 = vst [vmem:[#allocation1 + $0x6] ss:$9 sm:$0xff] %v3713_v59  ;;  %v6323_v59 = vld [vmem:[%s9523_s3 + $0x128] sm:$0xff]  ;;  %v4336_v48 = vld [vmem:[#allocation2 + $0xd4] ss:$8 sm:$0x3] }
 0x225   :  { %3743 = vst [vmem:[#allocation1 + $0x7] ss:$9 sm:$0xff] %v3715_v3  ;;  %v4063_v3 = vld [vmem:[#allocation2 + $0x71] ss:$8 sm:$0x3] }
 0x226   :  { %v6342_v12 = vld [vmem:[%s9523_s3 + $0x1c0] sm:$0xff] }
 0x22c   :  { %v3744_v2 = vld [vmem:[#allocation1] sm:$0xff]  ;;  %v3745_v62 = vld [vmem:[#allocation1 + $0x9] sm:$0xff] }
 0x22d   :  { %3818 = vst [vmem:[#allocation1] ss:$9 sm:$0xff] %v3790_v46  ;;  %3764 = vmatmul.f32.vlgmr.msra.gmra.mxu2 %v3744_v2  ;;  %3784 = vmatmul.f32.vlgmr.msra.gmra.mxu3 %v3745_v62  ;;  %v4069_v46 = vld [vmem:[#allocation2 + $0xd1] ss:$8 sm:$0x3]  ;;  %v6327_v2 = vld [vmem:[%s9523_s3 + $0x148] sm:$0xff] }
 0x22e   :  { %3820 = vst [vmem:[#allocation1 + $0x1] ss:$9 sm:$0xff] %v3792_v49  ;;  %4118 = vmatpush.xpose.msra.mxu2 %v6324_v15  ;;  %4138 = vmatpush.xpose.msra.mxu3 %v6325_v53  ;;  %v4071_v49 = vld [vmem:[#allocation2 + $0xf1] ss:$8 sm:$0x3] }
 0x22f   :  { %3822 = vst [vmem:[#allocation1 + $0x2] ss:$9 sm:$0xff] %v3794_v13  ;;  %v6326_v13 = vld [vmem:[%s9523_s3 + $0x140] sm:$0xff]  ;;  %v6332_v62 = vld [vmem:[%s9523_s3 + $0x170] sm:$0x3] }
 0x230   :  { %3824 = vst [vmem:[#allocation1 + $0x3] ss:$9 sm:$0xff] %v3796_v11  ;;  %v6333_v11 = vld [vmem:[%s9523_s3 + $0x178] sm:$0x3] }
 0x231   :  { %3826 = vst [vmem:[#allocation1 + $0x4] ss:$9 sm:$0xff] %v3798_v55  ;;  %v4150_v55 = vld [vmem:[#allocation2 + $0x52] ss:$8 sm:$0x3] }
 0x232   :  { %3828 = vst [vmem:[#allocation1 + $0x5] ss:$9 sm:$0xff] %v3800_v39  ;;  %4119 = vmatpush.xpose.msra.mxu2 %v6322_v6  ;;  %4139 = vmatpush.xpose.msra.mxu3 %v6323_v59  ;;  %v4413_v15 = vld [vmem:[#allocation2 + $0x15] ss:$8 sm:$0x3] }
 0x233   :  { %3830 = vst [vmem:[#allocation1 + $0x6] ss:$9 sm:$0xff] %v3802_v7  ;;  %v4415_v53 = vld [vmem:[#allocation2 + $0x35] ss:$8 sm:$0x3] }
 0x234   :  { %3832 = vst [vmem:[#allocation1 + $0x7] ss:$9 sm:$0xff] %v3804_v60  ;;  %v6331_v60 = vld [vmem:[%s9523_s3 + $0x168] sm:$0xff]  ;;  %v4423_v6 = vld [vmem:[#allocation2 + $0xb5] ss:$8 sm:$0x3] }
 0x235   :  { %v4425_v59 = vld [vmem:[#allocation2 + $0xd5] ss:$8 sm:$0x3] }
 0x23b   :  { %v3833_v37 = vld [vmem:[#allocation1] sm:$0xff]  ;;  %v3834_v50 = vld [vmem:[#allocation1 + $0x9] sm:$0xff] }
 0x23c   :  { %3907 = vst [vmem:[#allocation1] ss:$9 sm:$0xff] %v3879_v51  ;;  %3853 = vmatmul.f32.vlgmr.msrb.gmra.mxu0 %v3833_v37  ;;  %3873 = vmatmul.f32.vlgmr.msrb.gmra.mxu1 %v3834_v50  ;;  %v4158_v51 = vld [vmem:[#allocation2 + $0xd2] ss:$8 sm:$0x3]  ;;  %v6335_v37 = vld [vmem:[%s9523_s3 + $0x188] sm:$0xff] }
 0x23d   :  { %3909 = vst [vmem:[#allocation1 + $0x1] ss:$9 sm:$0xff] %v3881_v34  ;;  %4207 = vmatpush.xpose.msrb.mxu0 %v6328_v17  ;;  %4227 = vmatpush.xpose.msrb.mxu1 %v6329_v54  ;;  %v6336_v34 = vld [vmem:[%s9523_s3 + $0x190] sm:$0x3]  ;;  %v6346_v17 = vld [vmem:[%s9523_s3 + $0x1e0] sm:$0xff]  ;;  %v6347_v54 = vld [vmem:[%s9523_s3 + $0x1e8] sm:$0xff] }
 0x23e   :  { %3911 = vst [vmem:[#allocation1 + $0x2] ss:$9 sm:$0xff] %v3883_v19  ;;  %v6334_v19 = vld [vmem:[%s9523_s3 + $0x180] sm:$0xff] }
 0x23f   :  { %3913 = vst [vmem:[#allocation1 + $0x3] ss:$9 sm:$0xff] %v3885_v38  ;;  %v4235_v50 = vld [vmem:[#allocation2 + $0x13] ss:$8 sm:$0x3] }
 0x240   :  { %3915 = vst [vmem:[#allocation1 + $0x4] ss:$9 sm:$0xff] %v3887_v56  ;;  %v4237_v38 = vld [vmem:[#allocation2 + $0x33] ss:$8 sm:$0x3] }
 0x241   :  { %3917 = vst [vmem:[#allocation1 + $0x5] ss:$9 sm:$0xff] %v3889_v44  ;;  %4208 = vmatpush.xpose.msrb.mxu0 %v6326_v13  ;;  %4228 = vmatpush.xpose.msrb.mxu1 %v6327_v2  ;;  %v4241_v44 = vld [vmem:[#allocation2 + $0x73] ss:$8 sm:$0x3] }
 0x242   :  { %3919 = vst [vmem:[#allocation1 + $0x6] ss:$9 sm:$0xff] %v3891_v24  ;;  %v4243_v24 = vld [vmem:[#allocation2 + $0x93] ss:$8 sm:$0x3] }
 0x243   :  { %3921 = vst [vmem:[#allocation1 + $0x7] ss:$9 sm:$0xff] %v3893_v58  ;;  %v4245_v58 = vld [vmem:[#allocation2 + $0xb3] ss:$8 sm:$0x3] }
 0x244   :  { %v4504_v2 = vld [vmem:[#allocation2 + $0x36] ss:$8 sm:$0x3] }
 0x24a   :  { %v3922_v63 = vld [vmem:[#allocation1] sm:$0xff]  ;;  %v3923_v29 = vld [vmem:[#allocation1 + $0x9] sm:$0xff] }
 0x24b   :  { %3996 = vst [vmem:[#allocation1] ss:$9 sm:$0xff] %v3968_v35  ;;  %3942 = vmatmul.f32.vlgmr.msrb.gmra.mxu2 %v3922_v63  ;;  %3962 = vmatmul.f32.vlgmr.msrb.gmra.mxu3 %v3923_v29  ;;  %v6338_v35 = vld [vmem:[%s9523_s3 + $0x1a0] sm:$0xff] }
 0x24c   :  { %3998 = vst [vmem:[#allocation1 + $0x1] ss:$9 sm:$0xff] %v3970_v0  ;;  %4296 = vmatpush.xpose.msrb.mxu2 %v6332_v62  ;;  %4316 = vmatpush.xpose.msrb.mxu3 %v6333_v11  ;;  %v6339_v0 = vld [vmem:[%s9523_s3 + $0x1a8] sm:$0xff]  ;;  %v4324_v63 = vld [vmem:[#allocation2 + $0x14] ss:$8 sm:$0x3] }
 0x24d   :  { %4000 = vst [vmem:[#allocation1 + $0x2] ss:$9 sm:$0xff] %v3972_v31  ;;  %v4326_v29 = vld [vmem:[#allocation2 + $0x34] ss:$8 sm:$0x3] }
 0x24e   :  { %4002 = vst [vmem:[#allocation1 + $0x3] ss:$9 sm:$0xff] %v3974_v42  ;;  %v4330_v42 = vld [vmem:[#allocation2 + $0x74] ss:$8 sm:$0x3] }
 0x24f   :  { %4004 = vst [vmem:[#allocation1 + $0x4] ss:$9 sm:$0xff] %v3976_v61  ;;  %v4332_v61 = vld [vmem:[#allocation2 + $0x94] ss:$8 sm:$0x3] }
 0x250   :  { %4006 = vst [vmem:[#allocation1 + $0x5] ss:$9 sm:$0xff] %v3978_v33  ;;  %4297 = vmatpush.xpose.msrb.mxu2 %v6330_v8  ;;  %4317 = vmatpush.xpose.msrb.mxu3 %v6331_v60  ;;  %v6344_v33 = vld [vmem:[%s9523_s3 + $0x1d0] sm:$0x3] }
 0x251   :  { %4008 = vst [vmem:[#allocation1 + $0x6] ss:$9 sm:$0xff] %v3980_v43  ;;  %v6345_v43 = vld [vmem:[%s9523_s3 + $0x1d8] sm:$0x3] }
 0x252   :  { %4010 = vst [vmem:[#allocation1 + $0x7] ss:$9 sm:$0xff] %v3982_v9  ;;  %v4338_v9 = vld [vmem:[#allocation2 + $0xf4] ss:$8 sm:$0x3] }
 0x253   :  { %v4506_v62 = vld [vmem:[#allocation2 + $0x56] ss:$8 sm:$0x3]  ;;  %v4593_v60 = vld [vmem:[#allocation2 + $0x37] ss:$8 sm:$0x3] }
 0x254   :  { %v4508_v11 = vld [vmem:[#allocation2 + $0x76] ss:$8 sm:$0x3] }
 0x259   :  { %v4011_v21 = vld [vmem:[#allocation1] sm:$0xff]  ;;  %v4012_v57 = vld [vmem:[#allocation1 + $0x9] sm:$0xff] }
 0x25a   :  { %4085 = vst [vmem:[#allocation1] ss:$9 sm:$0xff] %v4057_v36  ;;  %4031 = vmatmul.f32.vlgmr.msra.gmra.mxu0 %v4011_v21  ;;  %4051 = vmatmul.f32.vlgmr.msra.gmra.mxu1 %v4012_v57  ;;  %v4419_v21 = vld [vmem:[#allocation2 + $0x75] ss:$8 sm:$0x3] }
 0x25b   :  { %4087 = vst [vmem:[#allocation1 + $0x1] ss:$9 sm:$0xff] %v4059_v30  ;;  %4385 = vmatpush.xpose.msra.mxu0 %v6336_v34  ;;  %4405 = vmatpush.xpose.msra.mxu1 %v6337_v47  ;;  %v4421_v57 = vld [vmem:[#allocation2 + $0x95] ss:$8 sm:$0x3] }
 0x25c   :  { %4089 = vst [vmem:[#allocation1 + $0x2] ss:$9 sm:$0xff] %v4061_v45  ;;  %v4417_v45 = vld [vmem:[#allocation2 + $0x55] ss:$8 sm:$0x3] }
 0x25d   :  { %4091 = vst [vmem:[#allocation1 + $0x3] ss:$9 sm:$0xff] %v4063_v3  ;;  %v6348_v3 = vld [vmem:[%s9523_s3 + $0x1f0] sm:$0x3] }
 0x25e   :  { %4093 = vst [vmem:[#allocation1 + $0x4] ss:$9 sm:$0xff] %v4065_v52  ;;  %v6349_v52 = vld [vmem:[%s9523_s3 + $0x1f8] sm:$0x3] }
 0x25f   :  { %4095 = vst [vmem:[#allocation1 + $0x5] ss:$9 sm:$0xff] %v4067_v16  ;;  %4386 = vmatpush.xpose.msra.mxu0 %v6334_v19  ;;  %4406 = vmatpush.xpose.msra.mxu1 %v6335_v37  ;;  %v4427_v16 = vld [vmem:[#allocation2 + $0xf5] ss:$8 sm:$0x3] }
 0x260   :  { %4097 = vst [vmem:[#allocation1 + $0x6] ss:$9 sm:$0xff] %v4069_v46  ;;  %v4502_v46 = vld [vmem:[#allocation2 + $0x16] ss:$8 sm:$0x3] }
 0x261   :  { %4099 = vst [vmem:[#allocation1 + $0x7] ss:$9 sm:$0xff] %v4071_v49  ;;  %v4601_v34 = vld [vmem:[#allocation2 + $0xb7] ss:$8 sm:$0x3] }
 0x262   :  { %v4603_v47 = vld [vmem:[#allocation2 + $0xd7] ss:$8 sm:$0x3] }
 0x268   :  { %v4100_v39 = vld [vmem:[#allocation1] sm:$0xff]  ;;  %v4101_v7 = vld [vmem:[#allocation1 + $0x9] sm:$0xff] }
 0x269   :  { %4174 = vst [vmem:[#allocation1] ss:$9 sm:$0xff] %v4146_v40  ;;  %4120 = vmatmul.f32.vlgmr.msra.gmra.mxu2 %v4100_v39  ;;  %4140 = vmatmul.f32.vlgmr.msra.gmra.mxu3 %v4101_v7  ;;  %v4510_v40 = vld [vmem:[#allocation2 + $0x96] ss:$8 sm:$0x3] }
 0x26a   :  { %4176 = vst [vmem:[#allocation1 + $0x1] ss:$9 sm:$0xff] %v4148_v25  ;;  %4474 = vmatpush.xpose.msra.mxu2 %v6340_v4  ;;  %4494 = vmatpush.xpose.msra.mxu3 %v6341_v22  ;;  %v4512_v25 = vld [vmem:[#allocation2 + $0xb6] ss:$8 sm:$0x3] }
 0x26b   :  { %4178 = vst [vmem:[#allocation1 + $0x2] ss:$9 sm:$0xff] %v4150_v55  ;;  %v4514_v55 = vld [vmem:[#allocation2 + $0xd6] ss:$8 sm:$0x3] }
 0x26c   :  { %4180 = vst [vmem:[#allocation1 + $0x3] ss:$9 sm:$0xff] %v4152_v10  ;;  %v4516_v39 = vld [vmem:[#allocation2 + $0xf6] ss:$8 sm:$0x3] }
 0x26d   :  { %4182 = vst [vmem:[#allocation1 + $0x4] ss:$9 sm:$0xff] %v4154_v27  ;;  %v4591_v7 = vld [vmem:[#allocation2 + $0x17] ss:$8 sm:$0x3] }
 0x26e   :  { %4184 = vst [vmem:[#allocation1 + $0x5] ss:$9 sm:$0xff] %v4156_v18  ;;  %4475 = vmatpush.xpose.msra.mxu2 %v6338_v35  ;;  %4495 = vmatpush.xpose.msra.mxu3 %v6339_v0  ;;  %v4595_v27 = vld [vmem:[#allocation2 + $0x57] ss:$8 sm:$0x3] }
 0x26f   :  { %4186 = vst [vmem:[#allocation1 + $0x6] ss:$9 sm:$0xff] %v4158_v51  ;;  %v4597_v18 = vld [vmem:[#allocation2 + $0x77] ss:$8 sm:$0x3] }
 0x270   :  { %4188 = vst [vmem:[#allocation1 + $0x7] ss:$9 sm:$0xff] %v4160_v28  ;;  %v4599_v51 = vld [vmem:[#allocation2 + $0x97] ss:$8 sm:$0x3] }
 0x271   :  { %v4605_v28 = vld [vmem:[#allocation2 + $0xf7] ss:$8 sm:$0x3] }
 0x277   :  { %v4189_v56 = vld [vmem:[#allocation1] sm:$0xff]  ;;  %v4190_v5 = vld [vmem:[#allocation1 + $0x9] sm:$0xff] }
 0x278   :  { %4263 = vst [vmem:[#allocation1] ss:$9 sm:$0xff] %v4235_v50  ;;  %4209 = vmatmul.f32.vlgmr.msrb.gmra.mxu0 %v4189_v56  ;;  %4229 = vmatmul.f32.vlgmr.msrb.gmra.mxu1 %v4190_v5  ;;  %v3343_v50 = vpop.f32.mrf.mxu0  ;;  %v3410_v56 = vpop.f32.mrf.mxu2 }
 0x279   :  { %4265 = vst [vmem:[#allocation1 + $0x1] ss:$9 sm:$0xff] %v4237_v38  ;;  %4563 = vmatpush.xpose.msrb.mxu0 %v6344_v33  ;;  %4583 = vmatpush.xpose.msrb.mxu1 %v6345_v43  ;;  %v3363_v38 = vpop.f32.mrf.mxu1  ;;  %v3430_v5 = vpop.f32.mrf.mxu3 }
 0x27a   :  { %4267 = vst [vmem:[#allocation1 + $0x2] ss:$9 sm:$0xff] %v4239_v20  ;;  %v3364_v22 = vadd.f32 %v3363_v38, %v3343_v50 }
 0x27b   :  { %4269 = vst [vmem:[#allocation1 + $0x3] ss:$9 sm:$0xff] %v4241_v44 }
 0x27c   :  { %4271 = vst [vmem:[#allocation1 + $0x4] ss:$9 sm:$0xff] %v4243_v24 }
 0x27d   :  { %4273 = vst [vmem:[#allocation1 + $0x5] ss:$9 sm:$0xff] %v4245_v58  ;;  %4564 = vmatpush.xpose.msrb.mxu0 %v6342_v12  ;;  %4584 = vmatpush.xpose.msrb.mxu1 %v6343_v23 }
 0x27e   :  { %4275 = vst [vmem:[#allocation1 + $0x6] ss:$9 sm:$0xff] %v4247_v26 }
 0x27f   :  { %4277 = vst [vmem:[#allocation1 + $0x7] ss:$9 sm:$0xff] %v4249_v32  ;;  %v3411_v32 = vadd.f32 %v3410_v56, %v3364_v22 }
 0x280   :  { %v3498_v20 = vpop.f32.mrf.mxu0 }
 0x281   :  { %v3518_v44 = vpop.f32.mrf.mxu1 }
 0x286   :  { %v4278_v1 = vld [vmem:[#allocation1] sm:$0xff]  ;;  %v4279_v31 = vld [vmem:[#allocation1 + $0x9] sm:$0xff] }
 0x287   :  { %4352 = vst [vmem:[#allocation1] ss:$9 sm:$0xff] %v4324_v63  ;;  %4298 = vmatmul.f32.vlgmr.msrb.gmra.mxu2 %v4278_v1  ;;  %4318 = vmatmul.f32.vlgmr.msrb.gmra.mxu3 %v4279_v31  ;;  %v3431_v63 = vadd.f32 %v3430_v5, %v3411_v32 }
 0x288   :  { %4354 = vst [vmem:[#allocation1 + $0x1] ss:$9 sm:$0xff] %v4326_v29  ;;  %4652 = vmatpush.xpose.msrb.mxu2 %v6348_v3  ;;  %4672 = vmatpush.xpose.msrb.mxu3 %v6349_v52  ;;  %v3519_v29 = vadd.f32 %v3518_v44, %v3498_v20 }
 0x289   :  { %4356 = vst [vmem:[#allocation1 + $0x2] ss:$9 sm:$0xff] %v4328_v41 }
 0x28a   :  { %4358 = vst [vmem:[#allocation1 + $0x3] ss:$9 sm:$0xff] %v4330_v42  ;;  %v3521_v42 = vadd.f32 %v3519_v29, %v3431_v63 }
 0x28b   :  { %4360 = vst [vmem:[#allocation1 + $0x4] ss:$9 sm:$0xff] %v4332_v61 }
 0x28c   :  { %4362 = vst [vmem:[#allocation1 + $0x5] ss:$9 sm:$0xff] %v4334_v14  ;;  %4653 = vmatpush.xpose.msrb.mxu2 %v6346_v17  ;;  %4673 = vmatpush.xpose.msrb.mxu3 %v6347_v54 }
 0x28d   :  { %4364 = vst [vmem:[#allocation1 + $0x6] ss:$9 sm:$0xff] %v4336_v48 }
 0x28e   :  { %4366 = vst [vmem:[#allocation1 + $0x7] ss:$9 sm:$0xff] %v4338_v9 }
 0x292   :  { %v3587_v24 = vpop.f32.mrf.mxu2  ;;  %v3607_v58 = vpop.f32.mrf.mxu3 }
 0x293   :  { %v3608_v41 = vadd.f32 %v3607_v58, %v3587_v24 }
 0x295   :  { %v4367_v36 = vld [vmem:[#allocation1] sm:$0xff]  ;;  %v4368_v30 = vld [vmem:[#allocation1 + $0x9] sm:$0xff]  ;;  %v3610_v48 = vadd.f32 %v3608_v41, %v3521_v42 }
 0x296   :  { %4387 = vmatmul.f32.vlgmr.msra.gmra.mxu0 %v4367_v36  ;;  %4407 = vmatmul.f32.vlgmr.msra.gmra.mxu1 %v4368_v30  ;;  %4441 = vst [vmem:[#allocation1] ss:$9 sm:$0xff] %v4413_v15 }
 0x297   :  { %4443 = vst [vmem:[#allocation1 + $0x1] ss:$9 sm:$0xff] %v4415_v53 }
 0x298   :  { %4445 = vst [vmem:[#allocation1 + $0x2] ss:$9 sm:$0xff] %v4417_v45 }
 0x299   :  { %4447 = vst [vmem:[#allocation1 + $0x3] ss:$9 sm:$0xff] %v4419_v21 }
 0x29a   :  { %4449 = vst [vmem:[#allocation1 + $0x4] ss:$9 sm:$0xff] %v4421_v57 }
 0x29b   :  { %4451 = vst [vmem:[#allocation1 + $0x5] ss:$9 sm:$0xff] %v4423_v6  ;;  %v3676_v26 = vpop.f32.mrf.mxu0  ;;  %v3696_v4 = vpop.f32.mrf.mxu1 }
 0x29c   :  { %4453 = vst [vmem:[#allocation1 + $0x6] ss:$9 sm:$0xff] %v4425_v59  ;;  %v3697_v33 = vadd.f32 %v3696_v4, %v3676_v26 }
 0x29d   :  { %4455 = vst [vmem:[#allocation1 + $0x7] ss:$9 sm:$0xff] %v4427_v16 }
 0x29e   :  { %v3699_v23 = vadd.f32 %v3697_v33, %v3610_v48 }
 0x2a4   :  { %v4456_v49 = vld [vmem:[#allocation1] sm:$0xff]  ;;  %v4457_v13 = vld [vmem:[#allocation1 + $0x9] sm:$0xff] }
 0x2a5   :  { %4476 = vmatmul.f32.vlgmr.msra.gmra.mxu2 %v4456_v49  ;;  %4496 = vmatmul.f32.vlgmr.msra.gmra.mxu3 %v4457_v13  ;;  %4530 = vst [vmem:[#allocation1] ss:$9 sm:$0xff] %v4502_v46 }
 0x2a6   :  { %4532 = vst [vmem:[#allocation1 + $0x1] ss:$9 sm:$0xff] %v4504_v2 }
 0x2a7   :  { %4534 = vst [vmem:[#allocation1 + $0x2] ss:$9 sm:$0xff] %v4506_v62 }
 0x2a8   :  { %4536 = vst [vmem:[#allocation1 + $0x3] ss:$9 sm:$0xff] %v4508_v11 }
 0x2a9   :  { %4538 = vst [vmem:[#allocation1 + $0x4] ss:$9 sm:$0xff] %v4510_v40 }
 0x2aa   :  { %4540 = vst [vmem:[#allocation1 + $0x5] ss:$9 sm:$0xff] %v4512_v25 }
 0x2ab   :  { %4542 = vst [vmem:[#allocation1 + $0x6] ss:$9 sm:$0xff] %v4514_v55 }
 0x2ac   :  { %4544 = vst [vmem:[#allocation1 + $0x7] ss:$9 sm:$0xff] %v4516_v39 }
 0x2b0   :  { %v3765_v35 = vpop.f32.mrf.mxu2  ;;  %v3785_v0 = vpop.f32.mrf.mxu3 }
 0x2b1   :  { %v3786_v43 = vadd.f32 %v3785_v0, %v3765_v35 }
 0x2b3   :  { %v4545_v10 = vld [vmem:[#allocation1] sm:$0xff]  ;;  %v4546_v8 = vld [vmem:[#allocation1 + $0x9] sm:$0xff]  ;;  %v3788_v15 = vadd.f32 %v3786_v43, %v3699_v23 }
 0x2b4   :  { %4565 = vmatmul.f32.vlgmr.msrb.gmra.mxu0 %v4545_v10  ;;  %4585 = vmatmul.f32.vlgmr.msrb.gmra.mxu1 %v4546_v8  ;;  %4619 = vst [vmem:[#allocation1] ss:$9 sm:$0xff] %v4591_v7 }
 0x2b5   :  { %4621 = vst [vmem:[#allocation1 + $0x1] ss:$9 sm:$0xff] %v4593_v60 }
 0x2b6   :  { %4623 = vst [vmem:[#allocation1 + $0x2] ss:$9 sm:$0xff] %v4595_v27 }
 0x2b7   :  { %4625 = vst [vmem:[#allocation1 + $0x3] ss:$9 sm:$0xff] %v4597_v18 }
 0x2b8   :  { %4627 = vst [vmem:[#allocation1 + $0x4] ss:$9 sm:$0xff] %v4599_v51 }
 0x2b9   :  { %4629 = vst [vmem:[#allocation1 + $0x5] ss:$9 sm:$0xff] %v4601_v34  ;;  %v3854_v1 = vpop.f32.mrf.mxu0  ;;  %v3874_v31 = vpop.f32.mrf.mxu1 }
 0x2ba   :  { %4631 = vst [vmem:[#allocation1 + $0x6] ss:$9 sm:$0xff] %v4603_v47  ;;  %v3875_v53 = vadd.f32 %v3874_v31, %v3854_v1 }
 0x2bb   :  { %4633 = vst [vmem:[#allocation1 + $0x7] ss:$9 sm:$0xff] %v4605_v28 }
 0x2bc   :  { %v3877_v21 = vadd.f32 %v3875_v53, %v3788_v15 }
 0x2c2   :  { %v4634_v19 = vld [vmem:[#allocation1] sm:$0xff]  ;;  %v4635_v37 = vld [vmem:[#allocation1 + $0x9] sm:$0xff] }
 0x2c3   :  { %4654 = vmatmul.f32.vlgmr.msrb.gmra.mxu2 %v4634_v19  ;;  %4674 = vmatmul.f32.vlgmr.msrb.gmra.mxu3 %v4635_v37  ;;  %v6675_v19 = vld [vmem:[%s9524_s4] ss:$0 sm:$0xff] }
 0x2ce   :  { %v3943_v61 = vpop.f32.mrf.mxu2  ;;  %v3963_v14 = vpop.f32.mrf.mxu3 }
 0x2cf   :  { %v3964_v45 = vadd.f32 %v3963_v14, %v3943_v61 }
 0x2d1   :  { %v3966_v59 = vadd.f32 %v3964_v45, %v3877_v21 }
 0x2d7   :  { %v4032_v9 = vpop.f32.mrf.mxu0  ;;  %v4052_v12 = vpop.f32.mrf.mxu1 }
 0x2d8   :  { %v4053_v3 = vadd.f32 %v4052_v12, %v4032_v9 }
 0x2da   :  { %v4055_v54 = vadd.f32 %v4053_v3, %v3966_v59 }
 0x2ec   :  { %v4121_v36 = vpop.f32.mrf.mxu2  ;;  %v4141_v30 = vpop.f32.mrf.mxu3 }
 0x2ed   :  { %v4142_v52 = vadd.f32 %v4141_v30, %v4121_v36 }
 0x2ef   :  { %v4144_v46 = vadd.f32 %v4142_v52, %v4055_v54 }
 0x2f5   :  { %v4210_v57 = vpop.f32.mrf.mxu0  ;;  %v4230_v6 = vpop.f32.mrf.mxu1 }
 0x2f6   :  { %v4231_v49 = vadd.f32 %v4230_v6, %v4210_v57 }
 0x2f8   :  { %v4233_v11 = vadd.f32 %v4231_v49, %v4144_v46 }
 0x30a   :  { %v4299_v16 = vpop.f32.mrf.mxu2  ;;  %v4319_v17 = vpop.f32.mrf.mxu3 }
 0x30b   :  { %v4320_v62 = vadd.f32 %v4319_v17, %v4299_v16 }
 0x30d   :  { %v4322_v55 = vadd.f32 %v4320_v62, %v4233_v11 }
 0x313   :  { %v4388_v13 = vpop.f32.mrf.mxu0  ;;  %v4408_v2 = vpop.f32.mrf.mxu1 }
 0x314   :  { %v4409_v39 = vadd.f32 %v4408_v2, %v4388_v13 }
 0x316   :  { %v4411_v60 = vadd.f32 %v4409_v39, %v4322_v55 }
 0x328   :  { %v4477_v40 = vpop.f32.mrf.mxu2  ;;  %v4497_v25 = vpop.f32.mrf.mxu3 }
 0x329   :  { %v4498_v7 = vadd.f32 %v4497_v25, %v4477_v40 }
 0x32b   :  { %v4500_v27 = vadd.f32 %v4498_v7, %v4411_v60 }
 0x331   :  { %v4566_v10 = vpop.f32.mrf.mxu0  ;;  %v4586_v8 = vpop.f32.mrf.mxu1 }
 0x332   :  { %v4587_v18 = vadd.f32 %v4586_v8, %v4566_v10 }
 0x334   :  { %v4589_v47 = vadd.f32 %v4587_v18, %v4500_v27 }
 0x346   :  { %v4655_v51 = vpop.f32.mrf.mxu2  ;;  %v4675_v34 = vpop.f32.mrf.mxu3 }
 0x347   :  { %v4676_v28 = vadd.f32 %v4675_v34, %v4655_v51 }
 0x349   :  { %v4678_v37 = vadd.f32 %v4676_v28, %v4589_v47 }
 0x34b   :  { %v4683_v50 = vadd.f32 %v6675_v19, %v4678_v37 }
 0x34d   :  { %4685 = vst.msk [vmem:[#allocation3] sm:$0xff] %vm4684_vm3, %v4683_v50 }
 0x34e   :  { %4696 = dma.vmem_to_hbm [thread:$0]  %s4692_s25, 128, %s4694_s28, [#allocation4]  }
 0x34f   :  { %6702 = dma.done.wait [#allocation4], 128  }
 0x350   :  { %6703 = vsyncadd [#allocation4], 4294967168 }
 0x351   :  { %4701 = vsyncpa [#allocation4], 1 }

</bundles_post_ra>
